<compile_context>
chip_gen: v5e
topology: v5e:2x2
jax: 0.10.0
libtpu: 0.0.40
codegen_flags: <defaults>
</compile_context>

<pallas_src>
import numpy as np
import jax
import jax.numpy as jnp
from jax import lax
from jax.experimental import pallas as pl
from jax.experimental.pallas import tpu as pltpu

N_LAYERS = 3
H_DIM = 35
HOUT_DIM = 64
F_IN = 92
NEG_SLOPE = 0.2


def hetero_rel_conv_kernel(
    x_ref,        # (1, T*N, 92)  bf16
    Hb_ref,       # (1, T*N, T*M) int8  block-diagonal incidence
    ea_ref,       # (1, T*M, 35)  bf16
    Pb_ref,       # (1, T*B, T*N) bf16  block-diagonal one-hot pooling
    w_emb_ref, b_emb_ref,
    w_ext_ref,    # (3, 35, 36) bf16 : [W_l | W_l @ att_x_l]
    v_e_ref,      # (3, 35)     bf16 : rows are W_l @ att_e_l
    bias_ref,     # (3, 1, 35)  f32
    w_proj_ref, b_proj_ref,
    w_out_ref,    # (64, 1) f32
    b_out_ref,    # (1, 1)  f32
    o_ref,        # (1, 1, T*B) f32
):
    f32 = jnp.float32
    bf16 = jnp.bfloat16

    x = x_ref[0]                        # (TN, 92)  bf16
    Hf = Hb_ref[0].astype(f32)          # (TN, TM)
    e_attr = ea_ref[0]                  # (TM, 35)  bf16
    Pm = Pb_ref[0]                      # (TB, TN)  bf16

    # ---- embed: Linear(92 -> 35), T instances stacked along rows ----
    h = jnp.dot(x, w_emb_ref[...], preferred_element_type=f32) + b_emb_ref[...]

    # ---- hoisted invariants (mask, degree normalizers, hyperedge-att scores) ----
    Hmask = Hf > 0.0
    mask_add = jnp.where(Hmask, 0.0, -1e30)                          # (TN, TM)

    deg_n = jnp.sum(Hf, axis=1, keepdims=True)                       # (TN, 1) node degree
    Dinv = jnp.where(deg_n > 0.0,
                     pl.reciprocal(jnp.maximum(deg_n, 1.0), approx=True), 0.0)
    deg_e = jnp.sum(Hf, axis=0, keepdims=True)                       # (1, TM) edge degree
    Binv = jnp.where(deg_e > 0.0,
                     pl.reciprocal(jnp.maximum(deg_e, 1.0), approx=True), 0.0)

    # S_E[l, tm] = e_attr[tm] . (W_l @ att_e_l)   -- all 3 layers, one small matmul
    S_E = lax.dot_general(v_e_ref[...], e_attr, (((1,), (1,)), ((), ())),
                          preferred_element_type=f32)                # (3, TM)

    # ---- 3 x HypergraphConv with attention (statically unrolled) ----
    for l in range(N_LAYERS):
        xl_ext = jnp.dot(h.astype(bf16), w_ext_ref[l],
                         preferred_element_type=f32)                 # (TN, 36)
        xl = xl_ext[:, :H_DIM]                                       # (TN, 35)
        s_x = xl_ext[:, H_DIM:H_DIM + 1]                             # (TN, 1) = xl @ att_x
        s_e = S_E[l:l + 1, :]                                        # (1, TM)

        # lane-dense block-diagonal attention scores (cross-instance entries are masked off)
        a = s_x + s_e                                                # (TN, TM)
        a = jnp.where(a > 0.0, a, NEG_SLOPE * a)                     # leaky_relu(0.2)
        a = a + mask_add

        # masked softmax over nodes within each hyperedge (column-wise)
        col_max = jnp.max(a, axis=0, keepdims=True)                  # (1, TM)
        p = jnp.exp(a - col_max)                                     # masked -> underflow to 0
        inv_den = pl.reciprocal(jnp.sum(p, axis=0, keepdims=True) + 1e-16,
                                approx=False)                        # exact (per review)
        alpha_e = (p * (inv_den * Binv)).astype(bf16)                # B^-1 folded in
        alpha_d = (p * inv_den).astype(bf16)

        # node -> hyperedge : out_edge = B^-1 * (alpha^T @ xl)   (block-diag => per-instance)
        out_edge = lax.dot_general(alpha_e, xl.astype(bf16),
                                   (((0,), (0,)), ((), ())),
                                   preferred_element_type=f32)       # (TM, 35)
        # hyperedge -> node : h = D^-1 * (alpha @ out_edge) + bias
        agg = jnp.dot(alpha_d, out_edge.astype(bf16),
                      preferred_element_type=f32)                    # (TN, 35)
        h = Dinv * agg + bias_ref[l]

    # ---- scatter(x, batch, reduce='mean') as block-diagonal one-hot pooling ----
    counts = jnp.sum(Pm.astype(f32), axis=1, keepdims=True)          # (TB, 1)
    pooled = jnp.dot(Pm, h.astype(bf16), preferred_element_type=f32) * pl.reciprocal(
        jnp.maximum(counts, 1.0), approx=True)                       # (TB, 35)

    # ---- proj -> Softplus ----
    z = jnp.dot(pooled.astype(bf16), w_proj_ref[...],
                preferred_element_type=f32) + b_proj_ref[...]        # (TB, 64)
    # torch.nn.Softplus(beta=1, threshold=20)
    z = jnp.where(z > 20.0, z, jnp.log(1.0 + jnp.exp(jnp.minimum(z, 20.0))))

    # ---- out: VPU multiply + sublane reduce, lane-dense (1, TB) row store ----
    zt = z.T                                                         # (64, TB)
    row = jnp.sum(zt * w_out_ref[...], axis=0, keepdims=True) + b_out_ref[...]
    o_ref[0] = row                                                   # (1, TB)


def _pick_instances_per_step(num_inst):
    # Largest T that divides I while keeping grid >= 2 (keeps both v7x TCs busy).
    for cand in (16, 8, 4, 2):
        if num_inst % cand == 0 and num_inst // cand >= 2:
            return cand
    return 1


def hetero_rel_conv(x, Hmat, e_attr, P, prm, *, instances_per_step=None):
    """x: (I,N,92)  Hmat: (I,N,M) 0/1  e_attr: (I,M,35)  P: (I,B,N) one-hot  ->  (I,B,1)"""
    f32, bf16 = jnp.float32, jnp.bfloat16
    I_INST, N, _ = x.shape
    M = Hmat.shape[2]
    B = P.shape[1]

    T = instances_per_step or _pick_instances_per_step(I_INST)
    assert I_INST % T == 0
    G = I_INST // T

    # Fold attention projections into the weights (wrapper-side, outside the kernel).
    W = prm["w_lin"]                                        # (3, 35, 35)
    att = prm["att"]                                        # (3, 2, 35)
    u = jnp.einsum("lij,lj->li", W, att[:, 0, :])           # W_l @ att_x_l
    w_ext = jnp.concatenate([W, u[:, :, None]], axis=2).astype(bf16)   # (3, 35, 36)
    v_e = jnp.einsum("lij,lj->li", W, att[:, 1, :]).astype(bf16)       # (3, 35)

    # Pack T instances per grid step.
    xg = x.reshape(G, T * N, F_IN).astype(bf16)                        # (G, T*N, 92)
    eg = e_attr.reshape(G, T * M, H_DIM).astype(bf16)                  # (G, T*M, 35)

    eyeT = jnp.eye(T, dtype=f32)
    Hg = Hmat.reshape(G, T, N, M)
    H_big = jnp.einsum("gtnm,ts->gtnsm", Hg, eyeT).reshape(
        G, T * N, T * M).astype(jnp.int8)                              # block-diag incidence
    Pg = P.reshape(G, T, B, N)
    P_big = jnp.einsum("gtbn,ts->gtbsn", Pg, eyeT).reshape(
        G, T * B, T * N).astype(bf16)                                  # block-diag pooling

    args = (
        xg, H_big, eg, P_big,
        prm["w_emb"].astype(bf16), prm["b_emb"].astype(f32),
        w_ext, v_e, prm["bias"].astype(f32),
        prm["w_proj"].astype(bf16), prm["b_proj"].astype(f32),
        prm["w_out"].astype(f32), prm["b_out"].astype(f32),
    )

    def grp_spec(shape):
        nd = len(shape)
        return pl.BlockSpec((1,) + tuple(shape[1:]),
                            lambda g, _nd=nd: (g,) + (0,) * (_nd - 1))

    def shared_spec(shape):
        nd = len(shape)
        return pl.BlockSpec(tuple(shape), lambda g, _nd=nd: (0,) * _nd)

    in_specs = [
        grp_spec(xg.shape), grp_spec(H_big.shape),
        grp_spec(eg.shape), grp_spec(P_big.shape),
    ] + [shared_spec(a.shape) for a in args[4:]]

    out_spec = pl.BlockSpec((1, 1, T * B), lambda g: (g, 0, 0))

    out = pl.pallas_call(
        hetero_rel_conv_kernel,
        out_shape=jax.ShapeDtypeStruct((G, 1, T * B), f32),
        grid=(G,),
        in_specs=in_specs,
        out_specs=out_spec,
        compiler_params=pltpu.CompilerParams(
            dimension_semantics=("parallel",),
            vmem_limit_bytes=32 * 1024 * 1024,
        ),
    )(*args)

    return out.reshape(I_INST, B, 1)


def reference(x, Hmat, e_attr, P, prm):
    """Pure-JAX single-instance reference (un-fused weights, f32 HIGHEST)."""
    hp = lax.Precision.HIGHEST
    h = jnp.dot(x, prm["w_emb"], precision=hp) + prm["b_emb"]
    Dinv = jnp.sum(Hmat, axis=1, keepdims=True)
    Dinv = jnp.where(Dinv > 0.0, 1.0 / Dinv, 0.0)
    Bdeg = jnp.sum(Hmat, axis=0)
    Binv_col = jnp.where(Bdeg > 0.0, 1.0 / Bdeg, 0.0)[:, None]
    for l in range(N_LAYERS):
        W, attl, b = prm["w_lin"][l], prm["att"][l], prm["bias"][l]
        xl = jnp.dot(h, W, precision=hp)
        el = jnp.dot(e_attr, W, precision=hp)
        s_x = jnp.sum(xl * attl[0:1, :], axis=-1, keepdims=True)
        s_e = jnp.sum(el * attl[1:2, :], axis=-1)
        a = s_x + s_e[None, :]
        a = jnp.where(a > 0.0, a, NEG_SLOPE * a)
        a_m = jnp.where(Hmat > 0.0, a, -1e30)
        col_max = jnp.max(a_m, axis=0, keepdims=True)
        p = jnp.where(Hmat > 0.0, jnp.exp(a - col_max), 0.0)
        alpha = p / (jnp.sum(p, axis=0, keepdims=True) + 1e-16)
        out_edge = Binv_col * jnp.dot(alpha.T, xl, precision=hp)
        h = Dinv * jnp.dot(alpha, out_edge, precision=hp) + b
    counts = jnp.sum(P, axis=1, keepdims=True)
    pooled = jnp.dot(P, h, precision=hp) / jnp.maximum(counts, 1.0)
    z = jnp.dot(pooled, prm["w_proj"], precision=hp) + prm["b_proj"]
    z = jnp.where(z > 20.0, z, jnp.log(1.0 + jnp.exp(jnp.minimum(z, 20.0))))
    return jnp.dot(z, prm["w_out"], precision=hp) + prm["b_out"]


def init_params(key):
    ks = jax.random.split(key, 9)
    s = 0.1
    return {
        "w_emb":  jax.random.normal(ks[0], (F_IN, H_DIM), jnp.float32) * s,
        "b_emb":  jax.random.normal(ks[1], (1, H_DIM), jnp.float32) * s,
        "w_lin":  jax.random.normal(ks[2], (N_LAYERS, H_DIM, H_DIM), jnp.float32) * s,
        "att":    jax.random.normal(ks[3], (N_LAYERS, 2, H_DIM), jnp.float32) * s,
        "bias":   jax.random.normal(ks[4], (N_LAYERS, 1, H_DIM), jnp.float32) * s,
        "w_proj": jax.random.normal(ks[5], (H_DIM, HOUT_DIM), jnp.float32) * s,
        "b_proj": jax.random.normal(ks[6], (1, HOUT_DIM), jnp.float32) * s,
        "w_out":  jax.random.normal(ks[7], (HOUT_DIM, 1), jnp.float32) * s,
        "b_out":  jax.random.normal(ks[8], (1, 1), jnp.float32) * s,
    }


if __name__ == "__main__":
    key = jax.random.PRNGKey(0)
    k_x, k_h, k_e, k_p = jax.random.split(key, 4)

    # instances, nodes, hyperedges, graphs per instance (T=8 -> grid of 2 steps)
    I_INST, N, M, B = 16, 16, 8, 2
    x = jax.random.normal(k_x, (I_INST, N, F_IN), jnp.float32)

    # deterministic incidence: random pattern + guarantees of non-empty rows/cols
    Hmat = (jax.random.uniform(k_h, (I_INST, N, M)) < 0.35).astype(jnp.float32)
    Hmat = Hmat.at[:, jnp.arange(M), jnp.arange(M)].set(1.0)
    Hmat = Hmat.at[:, jnp.arange(N), jnp.arange(N) % M].set(1.0)

    e_attr = jax.random.normal(k_e, (I_INST, M, H_DIM), jnp.float32)

    batch = jnp.repeat(jnp.arange(B), N // B)                              # (N,)
    P1 = (batch[None, :] == jnp.arange(B)[:, None]).astype(jnp.float32)    # (B, N)
    P = jnp.tile(P1[None], (I_INST, 1, 1))                                 # (I, B, N)

    params = init_params(k_p)

    out = jax.block_until_ready(hetero_rel_conv(x, Hmat, e_attr, P, params))
    ref = jax.vmap(lambda xi, Hi, ei, Pi: reference(xi, Hi, ei, Pi, params))(
        x, Hmat, e_attr, P)
    # bf16 MXU operands (per perf review) -> slightly looser tolerance than pure-f32.
    np.testing.assert_allclose(np.asarray(out), np.asarray(ref), rtol=5e-2, atol=5e-2)
    print("KERNEL_OK")
</pallas_src>

<mosaic_0001>
module attributes {stable_mosaic.version = 11 : i64} {
  func.func @hetero_rel_conv_kernel(%arg0: i32, %arg1: memref<1x128x92xbf16, #tpu.memory_space<vmem>>, %arg2: memref<1x128x64xi8, #tpu.memory_space<vmem>>, %arg3: memref<1x64x35xbf16, #tpu.memory_space<vmem>>, %arg4: memref<1x16x128xbf16, #tpu.memory_space<vmem>>, %arg5: memref<92x35xbf16, #tpu.memory_space<vmem>>, %arg6: memref<1x35xf32, #tpu.memory_space<vmem>>, %arg7: memref<3x35x36xbf16, #tpu.memory_space<vmem>>, %arg8: memref<3x35xbf16, #tpu.memory_space<vmem>>, %arg9: memref<3x1x35xf32, #tpu.memory_space<vmem>>, %arg10: memref<35x64xbf16, #tpu.memory_space<vmem>>, %arg11: memref<1x64xf32, #tpu.memory_space<vmem>>, %arg12: memref<64x1xf32, #tpu.memory_space<vmem>>, %arg13: memref<1x1xf32, #tpu.memory_space<vmem>>, %arg14: memref<1x1x16xf32, #tpu.memory_space<vmem>>) attributes {dimension_semantics = [#tpu.dimension_semantics<parallel>], iteration_bounds = array<i64: 2>, scalar_prefetch = 0 : i64, scratch_operands = 0 : i64, tpu.core_type = #tpu.core_type<tc>, window_params = [{transform_indices = @transform_0, window_bounds = array<i64: 1, 128, 92>}, {transform_indices = @transform_1, window_bounds = array<i64: 1, 128, 64>}, {transform_indices = @transform_2, window_bounds = array<i64: 1, 64, 35>}, {transform_indices = @transform_3, window_bounds = array<i64: 1, 16, 128>}, {pipeline_mode = #tpu.pipeline_mode<synchronous>, transform_indices = @transform_4, window_bounds = array<i64: 92, 35>}, {pipeline_mode = #tpu.pipeline_mode<synchronous>, transform_indices = @transform_5, window_bounds = array<i64: 1, 35>}, {pipeline_mode = #tpu.pipeline_mode<synchronous>, transform_indices = @transform_6, window_bounds = array<i64: 3, 35, 36>}, {pipeline_mode = #tpu.pipeline_mode<synchronous>, transform_indices = @transform_7, window_bounds = array<i64: 3, 35>}, {pipeline_mode = #tpu.pipeline_mode<synchronous>, transform_indices = @transform_8, window_bounds = array<i64: 3, 1, 35>}, {pipeline_mode = #tpu.pipeline_mode<synchronous>, transform_indices = @transform_9, window_bounds = array<i64: 35, 64>}, {pipeline_mode = #tpu.pipeline_mode<synchronous>, transform_indices = @transform_10, window_bounds = array<i64: 1, 64>}, {pipeline_mode = #tpu.pipeline_mode<synchronous>, transform_indices = @transform_11, window_bounds = array<i64: 64, 1>}, {pipeline_mode = #tpu.pipeline_mode<synchronous>, transform_indices = @transform_12, window_bounds = array<i64: 1, 1>}, {transform_indices = @transform_13, window_bounds = array<i64: 1, 1, 16>}]} {
    %c0 = arith.constant 0 : index
    %c0_0 = arith.constant 0 : index
    %c0_1 = arith.constant 0 : index
    %0 = vector.load %arg1[%c0, %c0_0, %c0_1] : memref<1x128x92xbf16, #tpu.memory_space<vmem>>, vector<1x128x92xbf16>
    %1 = vector.shape_cast %0 : vector<1x128x92xbf16> to vector<128x92xbf16>
    %c0_2 = arith.constant 0 : index
    %c0_3 = arith.constant 0 : index
    %c0_4 = arith.constant 0 : index
    %2 = vector.load %arg2[%c0_2, %c0_3, %c0_4] : memref<1x128x64xi8, #tpu.memory_space<vmem>>, vector<1x128x64xi8>
    %3 = vector.shape_cast %2 : vector<1x128x64xi8> to vector<128x64xi8>
    %4 = arith.sitofp %3 : vector<128x64xi8> to vector<128x64xf32>
    %c0_5 = arith.constant 0 : index
    %c0_6 = arith.constant 0 : index
    %c0_7 = arith.constant 0 : index
    %5 = vector.load %arg3[%c0_5, %c0_6, %c0_7] : memref<1x64x35xbf16, #tpu.memory_space<vmem>>, vector<1x64x35xbf16>
    %6 = vector.shape_cast %5 : vector<1x64x35xbf16> to vector<64x35xbf16>
    %c0_8 = arith.constant 0 : index
    %c0_9 = arith.constant 0 : index
    %c0_10 = arith.constant 0 : index
    %7 = vector.load %arg4[%c0_8, %c0_9, %c0_10] : memref<1x16x128xbf16, #tpu.memory_space<vmem>>, vector<1x16x128xbf16>
    %8 = vector.shape_cast %7 : vector<1x16x128xbf16> to vector<16x128xbf16>
    %c0_11 = arith.constant 0 : index
    %c0_12 = arith.constant 0 : index
    %9 = vector.load %arg5[%c0_11, %c0_12] : memref<92x35xbf16, #tpu.memory_space<vmem>>, vector<92x35xbf16>
    %cst = arith.constant dense<0.000000e+00> : vector<128x35xf32>
    %10 = tpu.matmul %1, %9, %cst {dimension_numbers = #tpu.dot_dimension_numbers<[1], [0], [0], [1], [0, 0, 1, 1], [], []>} : vector<128x92xbf16>, vector<92x35xbf16>, vector<128x35xf32> -> vector<128x35xf32>
    %c0_13 = arith.constant 0 : index
    %c0_14 = arith.constant 0 : index
    %11 = vector.load %arg6[%c0_13, %c0_14] : memref<1x35xf32, #tpu.memory_space<vmem>>, vector<1x35xf32>
    %12 = vector.broadcast %11 : vector<1x35xf32> to vector<128x35xf32>
    %13 = arith.addf %10, %12 : vector<128x35xf32>
    %cst_15 = arith.constant 0.000000e+00 : f32
    %14 = vector.broadcast %cst_15 : f32 to vector<128x64xf32>
    %15 = arith.cmpf ogt, %4, %14 : vector<128x64xf32>
    %cst_16 = arith.constant 0.000000e+00 : f32
    %cst_17 = arith.constant -1.000000e+30 : f32
    %16 = vector.broadcast %cst_16 : f32 to vector<128x64xf32>
    %17 = vector.broadcast %cst_17 : f32 to vector<128x64xf32>
    %18 = arith.select %15, %16, %17 : vector<128x64xi1>, vector<128x64xf32>
    %cst_18 = arith.constant dense<0.000000e+00> : vector<128xf32>
    %19 = vector.multi_reduction <add>, %4, %cst_18 [1] : vector<128x64xf32> to vector<128xf32>
    %20 = vector.shape_cast %19 : vector<128xf32> to vector<128x1xf32>
    %cst_19 = arith.constant 0.000000e+00 : f32
    %21 = vector.broadcast %cst_19 : f32 to vector<128x1xf32>
    %22 = arith.cmpf ogt, %20, %21 : vector<128x1xf32>
    %cst_20 = arith.constant 1.000000e+00 : f32
    %23 = vector.broadcast %cst_20 : f32 to vector<128x1xf32>
    %24 = arith.maximumf %20, %23 : vector<128x1xf32>
    %25 = tpu.reciprocal %24 {approx = true} : vector<128x1xf32> -> vector<128x1xf32>
    %cst_21 = arith.constant 0.000000e+00 : f32
    %26 = vector.broadcast %cst_21 : f32 to vector<128x1xf32>
    %27 = arith.select %22, %25, %26 : vector<128x1xi1>, vector<128x1xf32>
    %cst_22 = arith.constant dense<0.000000e+00> : vector<64xf32>
    %28 = vector.multi_reduction <add>, %4, %cst_22 [0] : vector<128x64xf32> to vector<64xf32>
    %29 = vector.shape_cast %28 : vector<64xf32> to vector<1x64xf32>
    %cst_23 = arith.constant 0.000000e+00 : f32
    %30 = vector.broadcast %cst_23 : f32 to vector<1x64xf32>
    %31 = arith.cmpf ogt, %29, %30 : vector<1x64xf32>
    %cst_24 = arith.constant 1.000000e+00 : f32
    %32 = vector.broadcast %cst_24 : f32 to vector<1x64xf32>
    %33 = arith.maximumf %29, %32 : vector<1x64xf32>
    %34 = tpu.reciprocal %33 {approx = true} : vector<1x64xf32> -> vector<1x64xf32>
    %cst_25 = arith.constant 0.000000e+00 : f32
    %35 = vector.broadcast %cst_25 : f32 to vector<1x64xf32>
    %36 = arith.select %31, %34, %35 : vector<1x64xi1>, vector<1x64xf32>
    %c0_26 = arith.constant 0 : index
    %c0_27 = arith.constant 0 : index
    %37 = vector.load %arg8[%c0_26, %c0_27] : memref<3x35xbf16, #tpu.memory_space<vmem>>, vector<3x35xbf16>
    %cst_28 = arith.constant dense<0.000000e+00> : vector<3x64xf32>
    %38 = tpu.matmul %37, %6, %cst_28 {dimension_numbers = #tpu.dot_dimension_numbers<[1], [1], [0], [0], [0, 0, 1, 0], [], []>} : vector<3x35xbf16>, vector<64x35xbf16>, vector<3x64xf32> -> vector<3x64xf32>
    %39 = arith.truncf %13 : vector<128x35xf32> to vector<128x35xbf16>
    %c0_29 = arith.constant 0 : index
    %c0_30 = arith.constant 0 : index
    %c0_31 = arith.constant 0 : index
    %40 = vector.load %arg7[%c0_29, %c0_30, %c0_31] : memref<3x35x36xbf16, #tpu.memory_space<vmem>>, vector<1x35x36xbf16>
    %41 = vector.shape_cast %40 : vector<1x35x36xbf16> to vector<35x36xbf16>
    %cst_32 = arith.constant dense<0.000000e+00> : vector<128x36xf32>
    %42 = tpu.matmul %39, %41, %cst_32 {dimension_numbers = #tpu.dot_dimension_numbers<[1], [0], [0], [1], [0, 0, 1, 1], [], []>} : vector<128x35xbf16>, vector<35x36xbf16>, vector<128x36xf32> -> vector<128x36xf32>
    %43 = vector.extract_strided_slice %42 {offsets = [0, 0], sizes = [128, 35], strides = [1, 1]} : vector<128x36xf32> to vector<128x35xf32>
    %44 = vector.extract_strided_slice %42 {offsets = [0, 35], sizes = [128, 1], strides = [1, 1]} : vector<128x36xf32> to vector<128x1xf32>
    %45 = vector.extract_strided_slice %38 {offsets = [0, 0], sizes = [1, 64], strides = [1, 1]} : vector<3x64xf32> to vector<1x64xf32>
    %46 = vector.broadcast %44 : vector<128x1xf32> to vector<128x64xf32>
    %47 = vector.broadcast %45 : vector<1x64xf32> to vector<128x64xf32>
    %48 = arith.addf %46, %47 : vector<128x64xf32>
    %cst_33 = arith.constant 0.000000e+00 : f32
    %49 = vector.broadcast %cst_33 : f32 to vector<128x64xf32>
    %50 = arith.cmpf ogt, %48, %49 : vector<128x64xf32>
    %cst_34 = arith.constant 2.000000e-01 : f32
    %51 = vector.broadcast %cst_34 : f32 to vector<128x64xf32>
    %52 = arith.mulf %51, %48 : vector<128x64xf32>
    %53 = arith.select %50, %48, %52 : vector<128x64xi1>, vector<128x64xf32>
    %54 = arith.addf %53, %18 : vector<128x64xf32>
    %cst_35 = arith.constant dense<0xFF800000> : vector<64xf32>
    %55 = vector.multi_reduction <maximumf>, %54, %cst_35 [0] : vector<128x64xf32> to vector<64xf32>
    %56 = vector.shape_cast %55 : vector<64xf32> to vector<1x64xf32>
    %57 = vector.broadcast %56 : vector<1x64xf32> to vector<128x64xf32>
    %58 = arith.subf %54, %57 : vector<128x64xf32>
    %59 = math.exp %58 : vector<128x64xf32>
    %cst_36 = arith.constant dense<0.000000e+00> : vector<64xf32>
    %60 = vector.multi_reduction <add>, %59, %cst_36 [0] : vector<128x64xf32> to vector<64xf32>
    %61 = vector.shape_cast %60 : vector<64xf32> to vector<1x64xf32>
    %cst_37 = arith.constant 1.000000e-16 : f32
    %62 = vector.broadcast %cst_37 : f32 to vector<1x64xf32>
    %63 = arith.addf %61, %62 : vector<1x64xf32>
    %64 = tpu.reciprocal %63 : vector<1x64xf32> -> vector<1x64xf32>
    %65 = arith.mulf %64, %36 : vector<1x64xf32>
    %66 = vector.broadcast %65 : vector<1x64xf32> to vector<128x64xf32>
    %67 = arith.mulf %59, %66 : vector<128x64xf32>
    %68 = arith.truncf %67 : vector<128x64xf32> to vector<128x64xbf16>
    %69 = vector.broadcast %64 : vector<1x64xf32> to vector<128x64xf32>
    %70 = arith.mulf %59, %69 : vector<128x64xf32>
    %71 = arith.truncf %70 : vector<128x64xf32> to vector<128x64xbf16>
    %72 = arith.truncf %43 : vector<128x35xf32> to vector<128x35xbf16>
    %cst_38 = arith.constant dense<0.000000e+00> : vector<64x35xf32>
    %73 = tpu.matmul %68, %72, %cst_38 {dimension_numbers = #tpu.dot_dimension_numbers<[0], [0], [1], [1], [0, 1, 1, 1], [], []>} : vector<128x64xbf16>, vector<128x35xbf16>, vector<64x35xf32> -> vector<64x35xf32>
    %74 = arith.truncf %73 : vector<64x35xf32> to vector<64x35xbf16>
    %cst_39 = arith.constant dense<0.000000e+00> : vector<128x35xf32>
    %75 = tpu.matmul %71, %74, %cst_39 {dimension_numbers = #tpu.dot_dimension_numbers<[1], [0], [0], [1], [0, 0, 1, 1], [], []>} : vector<128x64xbf16>, vector<64x35xbf16>, vector<128x35xf32> -> vector<128x35xf32>
    %76 = vector.broadcast %27 : vector<128x1xf32> to vector<128x35xf32>
    %77 = arith.mulf %76, %75 : vector<128x35xf32>
    %c0_40 = arith.constant 0 : index
    %c0_41 = arith.constant 0 : index
    %c0_42 = arith.constant 0 : index
    %78 = vector.load %arg9[%c0_40, %c0_41, %c0_42] : memref<3x1x35xf32, #tpu.memory_space<vmem>>, vector<1x1x35xf32>
    %79 = vector.shape_cast %78 : vector<1x1x35xf32> to vector<1x35xf32>
    %80 = vector.broadcast %79 : vector<1x35xf32> to vector<128x35xf32>
    %81 = arith.addf %77, %80 : vector<128x35xf32>
    %82 = arith.truncf %81 : vector<128x35xf32> to vector<128x35xbf16>
    %c1 = arith.constant 1 : index
    %c0_43 = arith.constant 0 : index
    %c0_44 = arith.constant 0 : index
    %83 = vector.load %arg7[%c1, %c0_43, %c0_44] : memref<3x35x36xbf16, #tpu.memory_space<vmem>>, vector<1x35x36xbf16>
    %84 = vector.shape_cast %83 : vector<1x35x36xbf16> to vector<35x36xbf16>
    %cst_45 = arith.constant dense<0.000000e+00> : vector<128x36xf32>
    %85 = tpu.matmul %82, %84, %cst_45 {dimension_numbers = #tpu.dot_dimension_numbers<[1], [0], [0], [1], [0, 0, 1, 1], [], []>} : vector<128x35xbf16>, vector<35x36xbf16>, vector<128x36xf32> -> vector<128x36xf32>
    %86 = vector.extract_strided_slice %85 {offsets = [0, 0], sizes = [128, 35], strides = [1, 1]} : vector<128x36xf32> to vector<128x35xf32>
    %87 = vector.extract_strided_slice %85 {offsets = [0, 35], sizes = [128, 1], strides = [1, 1]} : vector<128x36xf32> to vector<128x1xf32>
    %88 = vector.extract_strided_slice %38 {offsets = [1, 0], sizes = [1, 64], strides = [1, 1]} : vector<3x64xf32> to vector<1x64xf32>
    %89 = vector.broadcast %87 : vector<128x1xf32> to vector<128x64xf32>
    %90 = vector.broadcast %88 : vector<1x64xf32> to vector<128x64xf32>
    %91 = arith.addf %89, %90 : vector<128x64xf32>
    %cst_46 = arith.constant 0.000000e+00 : f32
    %92 = vector.broadcast %cst_46 : f32 to vector<128x64xf32>
    %93 = arith.cmpf ogt, %91, %92 : vector<128x64xf32>
    %cst_47 = arith.constant 2.000000e-01 : f32
    %94 = vector.broadcast %cst_47 : f32 to vector<128x64xf32>
    %95 = arith.mulf %94, %91 : vector<128x64xf32>
    %96 = arith.select %93, %91, %95 : vector<128x64xi1>, vector<128x64xf32>
    %97 = arith.addf %96, %18 : vector<128x64xf32>
    %cst_48 = arith.constant dense<0xFF800000> : vector<64xf32>
    %98 = vector.multi_reduction <maximumf>, %97, %cst_48 [0] : vector<128x64xf32> to vector<64xf32>
    %99 = vector.shape_cast %98 : vector<64xf32> to vector<1x64xf32>
    %100 = vector.broadcast %99 : vector<1x64xf32> to vector<128x64xf32>
    %101 = arith.subf %97, %100 : vector<128x64xf32>
    %102 = math.exp %101 : vector<128x64xf32>
    %cst_49 = arith.constant dense<0.000000e+00> : vector<64xf32>
    %103 = vector.multi_reduction <add>, %102, %cst_49 [0] : vector<128x64xf32> to vector<64xf32>
    %104 = vector.shape_cast %103 : vector<64xf32> to vector<1x64xf32>
    %cst_50 = arith.constant 1.000000e-16 : f32
    %105 = vector.broadcast %cst_50 : f32 to vector<1x64xf32>
    %106 = arith.addf %104, %105 : vector<1x64xf32>
    %107 = tpu.reciprocal %106 : vector<1x64xf32> -> vector<1x64xf32>
    %108 = arith.mulf %107, %36 : vector<1x64xf32>
    %109 = vector.broadcast %108 : vector<1x64xf32> to vector<128x64xf32>
    %110 = arith.mulf %102, %109 : vector<128x64xf32>
    %111 = arith.truncf %110 : vector<128x64xf32> to vector<128x64xbf16>
    %112 = vector.broadcast %107 : vector<1x64xf32> to vector<128x64xf32>
    %113 = arith.mulf %102, %112 : vector<128x64xf32>
    %114 = arith.truncf %113 : vector<128x64xf32> to vector<128x64xbf16>
    %115 = arith.truncf %86 : vector<128x35xf32> to vector<128x35xbf16>
    %cst_51 = arith.constant dense<0.000000e+00> : vector<64x35xf32>
    %116 = tpu.matmul %111, %115, %cst_51 {dimension_numbers = #tpu.dot_dimension_numbers<[0], [0], [1], [1], [0, 1, 1, 1], [], []>} : vector<128x64xbf16>, vector<128x35xbf16>, vector<64x35xf32> -> vector<64x35xf32>
    %117 = arith.truncf %116 : vector<64x35xf32> to vector<64x35xbf16>
    %cst_52 = arith.constant dense<0.000000e+00> : vector<128x35xf32>
    %118 = tpu.matmul %114, %117, %cst_52 {dimension_numbers = #tpu.dot_dimension_numbers<[1], [0], [0], [1], [0, 0, 1, 1], [], []>} : vector<128x64xbf16>, vector<64x35xbf16>, vector<128x35xf32> -> vector<128x35xf32>
    %119 = vector.broadcast %27 : vector<128x1xf32> to vector<128x35xf32>
    %120 = arith.mulf %119, %118 : vector<128x35xf32>
    %c1_53 = arith.constant 1 : index
    %c0_54 = arith.constant 0 : index
    %c0_55 = arith.constant 0 : index
    %121 = vector.load %arg9[%c1_53, %c0_54, %c0_55] : memref<3x1x35xf32, #tpu.memory_space<vmem>>, vector<1x1x35xf32>
    %122 = vector.shape_cast %121 : vector<1x1x35xf32> to vector<1x35xf32>
    %123 = vector.broadcast %122 : vector<1x35xf32> to vector<128x35xf32>
    %124 = arith.addf %120, %123 : vector<128x35xf32>
    %125 = arith.truncf %124 : vector<128x35xf32> to vector<128x35xbf16>
    %c2 = arith.constant 2 : index
    %c0_56 = arith.constant 0 : index
    %c0_57 = arith.constant 0 : index
    %126 = vector.load %arg7[%c2, %c0_56, %c0_57] : memref<3x35x36xbf16, #tpu.memory_space<vmem>>, vector<1x35x36xbf16>
    %127 = vector.shape_cast %126 : vector<1x35x36xbf16> to vector<35x36xbf16>
    %cst_58 = arith.constant dense<0.000000e+00> : vector<128x36xf32>
    %128 = tpu.matmul %125, %127, %cst_58 {dimension_numbers = #tpu.dot_dimension_numbers<[1], [0], [0], [1], [0, 0, 1, 1], [], []>} : vector<128x35xbf16>, vector<35x36xbf16>, vector<128x36xf32> -> vector<128x36xf32>
    %129 = vector.extract_strided_slice %128 {offsets = [0, 0], sizes = [128, 35], strides = [1, 1]} : vector<128x36xf32> to vector<128x35xf32>
    %130 = vector.extract_strided_slice %128 {offsets = [0, 35], sizes = [128, 1], strides = [1, 1]} : vector<128x36xf32> to vector<128x1xf32>
    %131 = vector.extract_strided_slice %38 {offsets = [2, 0], sizes = [1, 64], strides = [1, 1]} : vector<3x64xf32> to vector<1x64xf32>
    %132 = vector.broadcast %130 : vector<128x1xf32> to vector<128x64xf32>
    %133 = vector.broadcast %131 : vector<1x64xf32> to vector<128x64xf32>
    %134 = arith.addf %132, %133 : vector<128x64xf32>
    %cst_59 = arith.constant 0.000000e+00 : f32
    %135 = vector.broadcast %cst_59 : f32 to vector<128x64xf32>
    %136 = arith.cmpf ogt, %134, %135 : vector<128x64xf32>
    %cst_60 = arith.constant 2.000000e-01 : f32
    %137 = vector.broadcast %cst_60 : f32 to vector<128x64xf32>
    %138 = arith.mulf %137, %134 : vector<128x64xf32>
    %139 = arith.select %136, %134, %138 : vector<128x64xi1>, vector<128x64xf32>
    %140 = arith.addf %139, %18 : vector<128x64xf32>
    %cst_61 = arith.constant dense<0xFF800000> : vector<64xf32>
    %141 = vector.multi_reduction <maximumf>, %140, %cst_61 [0] : vector<128x64xf32> to vector<64xf32>
    %142 = vector.shape_cast %141 : vector<64xf32> to vector<1x64xf32>
    %143 = vector.broadcast %142 : vector<1x64xf32> to vector<128x64xf32>
    %144 = arith.subf %140, %143 : vector<128x64xf32>
    %145 = math.exp %144 : vector<128x64xf32>
    %cst_62 = arith.constant dense<0.000000e+00> : vector<64xf32>
    %146 = vector.multi_reduction <add>, %145, %cst_62 [0] : vector<128x64xf32> to vector<64xf32>
    %147 = vector.shape_cast %146 : vector<64xf32> to vector<1x64xf32>
    %cst_63 = arith.constant 1.000000e-16 : f32
    %148 = vector.broadcast %cst_63 : f32 to vector<1x64xf32>
    %149 = arith.addf %147, %148 : vector<1x64xf32>
    %150 = tpu.reciprocal %149 : vector<1x64xf32> -> vector<1x64xf32>
    %151 = arith.mulf %150, %36 : vector<1x64xf32>
    %152 = vector.broadcast %151 : vector<1x64xf32> to vector<128x64xf32>
    %153 = arith.mulf %145, %152 : vector<128x64xf32>
    %154 = arith.truncf %153 : vector<128x64xf32> to vector<128x64xbf16>
    %155 = vector.broadcast %150 : vector<1x64xf32> to vector<128x64xf32>
    %156 = arith.mulf %145, %155 : vector<128x64xf32>
    %157 = arith.truncf %156 : vector<128x64xf32> to vector<128x64xbf16>
    %158 = arith.truncf %129 : vector<128x35xf32> to vector<128x35xbf16>
    %cst_64 = arith.constant dense<0.000000e+00> : vector<64x35xf32>
    %159 = tpu.matmul %154, %158, %cst_64 {dimension_numbers = #tpu.dot_dimension_numbers<[0], [0], [1], [1], [0, 1, 1, 1], [], []>} : vector<128x64xbf16>, vector<128x35xbf16>, vector<64x35xf32> -> vector<64x35xf32>
    %160 = arith.truncf %159 : vector<64x35xf32> to vector<64x35xbf16>
    %cst_65 = arith.constant dense<0.000000e+00> : vector<128x35xf32>
    %161 = tpu.matmul %157, %160, %cst_65 {dimension_numbers = #tpu.dot_dimension_numbers<[1], [0], [0], [1], [0, 0, 1, 1], [], []>} : vector<128x64xbf16>, vector<64x35xbf16>, vector<128x35xf32> -> vector<128x35xf32>
    %162 = vector.broadcast %27 : vector<128x1xf32> to vector<128x35xf32>
    %163 = arith.mulf %162, %161 : vector<128x35xf32>
    %c2_66 = arith.constant 2 : index
    %c0_67 = arith.constant 0 : index
    %c0_68 = arith.constant 0 : index
    %164 = vector.load %arg9[%c2_66, %c0_67, %c0_68] : memref<3x1x35xf32, #tpu.memory_space<vmem>>, vector<1x1x35xf32>
    %165 = vector.shape_cast %164 : vector<1x1x35xf32> to vector<1x35xf32>
    %166 = vector.broadcast %165 : vector<1x35xf32> to vector<128x35xf32>
    %167 = arith.addf %163, %166 : vector<128x35xf32>
    %168 = arith.extf %8 : vector<16x128xbf16> to vector<16x128xf32>
    %cst_69 = arith.constant dense<0.000000e+00> : vector<16xf32>
    %169 = vector.multi_reduction <add>, %168, %cst_69 [1] : vector<16x128xf32> to vector<16xf32>
    %170 = vector.shape_cast %169 : vector<16xf32> to vector<16x1xf32>
    %171 = arith.truncf %167 : vector<128x35xf32> to vector<128x35xbf16>
    %cst_70 = arith.constant dense<0.000000e+00> : vector<16x35xf32>
    %172 = tpu.matmul %8, %171, %cst_70 {dimension_numbers = #tpu.dot_dimension_numbers<[1], [0], [0], [1], [0, 0, 1, 1], [], []>} : vector<16x128xbf16>, vector<128x35xbf16>, vector<16x35xf32> -> vector<16x35xf32>
    %cst_71 = arith.constant 1.000000e+00 : f32
    %173 = vector.broadcast %cst_71 : f32 to vector<16x1xf32>
    %174 = arith.maximumf %170, %173 : vector<16x1xf32>
    %175 = tpu.reciprocal %174 {approx = true} : vector<16x1xf32> -> vector<16x1xf32>
    %176 = vector.broadcast %175 : vector<16x1xf32> to vector<16x35xf32>
    %177 = arith.mulf %172, %176 : vector<16x35xf32>
    %178 = arith.truncf %177 : vector<16x35xf32> to vector<16x35xbf16>
    %c0_72 = arith.constant 0 : index
    %c0_73 = arith.constant 0 : index
    %179 = vector.load %arg10[%c0_72, %c0_73] : memref<35x64xbf16, #tpu.memory_space<vmem>>, vector<35x64xbf16>
    %cst_74 = arith.constant dense<0.000000e+00> : vector<16x64xf32>
    %180 = tpu.matmul %178, %179, %cst_74 {dimension_numbers = #tpu.dot_dimension_numbers<[1], [0], [0], [1], [0, 0, 1, 1], [], []>} : vector<16x35xbf16>, vector<35x64xbf16>, vector<16x64xf32> -> vector<16x64xf32>
    %c0_75 = arith.constant 0 : index
    %c0_76 = arith.constant 0 : index
    %181 = vector.load %arg11[%c0_75, %c0_76] : memref<1x64xf32, #tpu.memory_space<vmem>>, vector<1x64xf32>
    %182 = vector.broadcast %181 : vector<1x64xf32> to vector<16x64xf32>
    %183 = arith.addf %180, %182 : vector<16x64xf32>
    %cst_77 = arith.constant 2.000000e+01 : f32
    %184 = vector.broadcast %cst_77 : f32 to vector<16x64xf32>
    %185 = arith.cmpf ogt, %183, %184 : vector<16x64xf32>
    %cst_78 = arith.constant 2.000000e+01 : f32
    %186 = vector.broadcast %cst_78 : f32 to vector<16x64xf32>
    %187 = arith.minimumf %183, %186 : vector<16x64xf32>
    %188 = math.exp %187 : vector<16x64xf32>
    %cst_79 = arith.constant 1.000000e+00 : f32
    %189 = vector.broadcast %cst_79 : f32 to vector<16x64xf32>
    %190 = arith.addf %189, %188 : vector<16x64xf32>
    %191 = math.log %190 : vector<16x64xf32>
    %192 = arith.select %185, %183, %191 : vector<16x64xi1>, vector<16x64xf32>
    %193 = tpu.transpose %192, [1, 0] : vector<16x64xf32> -> vector<64x16xf32>
    %c0_80 = arith.constant 0 : index
    %c0_81 = arith.constant 0 : index
    %194 = vector.load %arg12[%c0_80, %c0_81] : memref<64x1xf32, #tpu.memory_space<vmem>>, vector<64x1xf32>
    %195 = vector.broadcast %194 : vector<64x1xf32> to vector<64x16xf32>
    %196 = arith.mulf %193, %195 : vector<64x16xf32>
    %cst_82 = arith.constant dense<0.000000e+00> : vector<16xf32>
    %197 = vector.multi_reduction <add>, %196, %cst_82 [0] : vector<64x16xf32> to vector<16xf32>
    %198 = vector.shape_cast %197 : vector<16xf32> to vector<1x16xf32>
    %c0_83 = arith.constant 0 : index
    %c0_84 = arith.constant 0 : index
    %199 = vector.load %arg13[%c0_83, %c0_84] : memref<1x1xf32, #tpu.memory_space<vmem>>, vector<1x1xf32>
    %200 = vector.broadcast %199 : vector<1x1xf32> to vector<1x16xf32>
    %201 = arith.addf %198, %200 : vector<1x16xf32>
    %c0_85 = arith.constant 0 : index
    %c0_86 = arith.constant 0 : index
    %c0_87 = arith.constant 0 : index
    %202 = vector.load %arg14[%c0_85, %c0_86, %c0_87] : memref<1x1x16xf32, #tpu.memory_space<vmem>>, vector<1x1x16xf32>
    %203 = vector.shape_cast %202 : vector<1x1x16xf32> to vector<1x16xf32>
    %204 = vector.shape_cast %201 : vector<1x16xf32> to vector<1x1x16xf32>
    tpu.vector_store %arg14[%c0_85, %c0_86, %c0_87], %204 {strides = array<i32>} : memref<1x1x16xf32, #tpu.memory_space<vmem>>, vector<1x1x16xf32>,
    return
  }
  func.func @transform_0(%arg0: i32) -> (i32, i32, i32) {
    %c0_i32 = arith.constant 0 : i32
    %c0_i32_0 = arith.constant 0 : i32
    %c0_i32_1 = arith.constant 0 : i32
    return %arg0, %c0_i32, %c0_i32_0 : i32, i32, i32
  }
  func.func @transform_1(%arg0: i32) -> (i32, i32, i32) {
    %c0_i32 = arith.constant 0 : i32
    %c0_i32_0 = arith.constant 0 : i32
    %c0_i32_1 = arith.constant 0 : i32
    return %arg0, %c0_i32, %c0_i32_0 : i32, i32, i32
  }
  func.func @transform_2(%arg0: i32) -> (i32, i32, i32) {
    %c0_i32 = arith.constant 0 : i32
    %c0_i32_0 = arith.constant 0 : i32
    %c0_i32_1 = arith.constant 0 : i32
    return %arg0, %c0_i32, %c0_i32_0 : i32, i32, i32
  }
  func.func @transform_3(%arg0: i32) -> (i32, i32, i32) {
    %c0_i32 = arith.constant 0 : i32
    %c0_i32_0 = arith.constant 0 : i32
    %c0_i32_1 = arith.constant 0 : i32
    return %arg0, %c0_i32, %c0_i32_0 : i32, i32, i32
  }
  func.func @transform_4(%arg0: i32) -> (i32, i32) {
    %c0_i32 = arith.constant 0 : i32
    %c0_i32_0 = arith.constant 0 : i32
    %c0_i32_1 = arith.constant 0 : i32
    return %c0_i32, %c0_i32_0 : i32, i32
  }
  func.func @transform_5(%arg0: i32) -> (i32, i32) {
    %c0_i32 = arith.constant 0 : i32
    %c0_i32_0 = arith.constant 0 : i32
    %c0_i32_1 = arith.constant 0 : i32
    return %c0_i32, %c0_i32_0 : i32, i32
  }
  func.func @transform_6(%arg0: i32) -> (i32, i32, i32) {
    %c0_i32 = arith.constant 0 : i32
    %c0_i32_0 = arith.constant 0 : i32
    %c0_i32_1 = arith.constant 0 : i32
    %c0_i32_2 = arith.constant 0 : i32
    return %c0_i32, %c0_i32_0, %c0_i32_1 : i32, i32, i32
  }
  func.func @transform_7(%arg0: i32) -> (i32, i32) {
    %c0_i32 = arith.constant 0 : i32
    %c0_i32_0 = arith.constant 0 : i32
    %c0_i32_1 = arith.constant 0 : i32
    return %c0_i32, %c0_i32_0 : i32, i32
  }
  func.func @transform_8(%arg0: i32) -> (i32, i32, i32) {
    %c0_i32 = arith.constant 0 : i32
    %c0_i32_0 = arith.constant 0 : i32
    %c0_i32_1 = arith.constant 0 : i32
    %c0_i32_2 = arith.constant 0 : i32
    return %c0_i32, %c0_i32_0, %c0_i32_1 : i32, i32, i32
  }
  func.func @transform_9(%arg0: i32) -> (i32, i32) {
    %c0_i32 = arith.constant 0 : i32
    %c0_i32_0 = arith.constant 0 : i32
    %c0_i32_1 = arith.constant 0 : i32
    return %c0_i32, %c0_i32_0 : i32, i32
  }
  func.func @transform_10(%arg0: i32) -> (i32, i32) {
    %c0_i32 = arith.constant 0 : i32
    %c0_i32_0 = arith.constant 0 : i32
    %c0_i32_1 = arith.constant 0 : i32
    return %c0_i32, %c0_i32_0 : i32, i32
  }
  func.func @transform_11(%arg0: i32) -> (i32, i32) {
    %c0_i32 = arith.constant 0 : i32
    %c0_i32_0 = arith.constant 0 : i32
    %c0_i32_1 = arith.constant 0 : i32
    return %c0_i32, %c0_i32_0 : i32, i32
  }
  func.func @transform_12(%arg0: i32) -> (i32, i32) {
    %c0_i32 = arith.constant 0 : i32
    %c0_i32_0 = arith.constant 0 : i32
    %c0_i32_1 = arith.constant 0 : i32
    return %c0_i32, %c0_i32_0 : i32, i32
  }
  func.func @transform_13(%arg0: i32) -> (i32, i32, i32) {
    %c0_i32 = arith.constant 0 : i32
    %c0_i32_0 = arith.constant 0 : i32
    %c0_i32_1 = arith.constant 0 : i32
    return %arg0, %c0_i32, %c0_i32_0 : i32, i32, i32
  }
}

</mosaic_0001>

<bundles_post_ra>
// kernel: tpu_custom_call.1
= control target key start
LH: loop header
LB: loop body
LE: loop exit
PB: predicated region body
PF: predicated region fallthrough
CT: control target
= control target key end

     0   :  { %s5171_s0 = inlined_call_operand.vmem [shape: bf16[2,128,92], index: 0, kind: input, shape index: {}]   ;;  %s5172_s1 = inlined_call_operand.vmem [shape: s8[2,128,64], index: 1, kind: input, shape index: {}]   ;;  %s5173_s2 = inlined_call_operand.vmem [shape: bf16[2,64,35], index: 2, kind: input, shape index: {}]   ;;  %s5174_s3 = inlined_call_operand.vmem [shape: bf16[2,16,128], index: 3, kind: input, shape index: {}]   ;;  %s5175_s4 = inlined_call_operand.vmem [shape: bf16[92,35], index: 4, kind: input, shape index: {}]   ;;  %s5176_s5 = inlined_call_operand.vmem [shape: f32[1,35], index: 5, kind: input, shape index: {}]   ;;  %s5177_s6 = inlined_call_operand.vmem [shape: bf16[3,35,36], index: 6, kind: input, shape index: {}]   ;;  %s5178_s7 = inlined_call_operand.vmem [shape: bf16[3,35], index: 7, kind: input, shape index: {}]   ;;  %s5179_s8 = inlined_call_operand.vmem [shape: f32[3,1,35], index: 8, kind: input, shape index: {}]   ;;  %s5180_s9 = inlined_call_operand.vmem [shape: bf16[35,64], index: 9, kind: input, shape index: {}]   ;;  %s5181_s10 = inlined_call_operand.vmem [shape: f32[1,64], index: 10, kind: input, shape index: {}]   ;;  %s5182_s11 = inlined_call_operand.vmem [shape: f32[64,1], index: 11, kind: input, shape index: {}]   ;;  %s5183_s12 = inlined_call_operand.<no memory space> [shape: f32[1,1], index: 12, kind: input, shape index: {}]   ;;  %s5184_s13 = inlined_call_operand.hbm [shape: f32[2,1,16], index: 13, kind: output, shape index: {}]  }
   0x1   :  { %v18_v0 = vstv %s5183_s12 }
   0x2   :  { %19 = vst [vmem:[#allocation2] sm:$0x1] %v18_v0 }
   0x3   :  { %20 = vsyncpa [#allocation4], 0 }
   0x4   :  { %22 = vsyncpa [#allocation4 + $0x1], 0  ;;  %s3743_s27 = smov 0   ;;  %s3745_s28 = smov 0  }
   0x5   :  { %s3747_s29 = smov 0   ;;  %s3749_s30 = smov 0  }
   0x6 LB: > { %5200 = sst [smem:[#allocation6_spill]] %s3659_s29  ;;  %s3764_s12 = sadd.s32 4294967295, %s3663_s30   ;;  %s3663_s30 = sphi %s3749_s30, %s5237_s30   ;;  %s3659_s29 = sphi %s3747_s29, %s5236_s29   ;;  %s3655_s28 = sphi %s3745_s28, %s5235_s28   ;;  %s3651_s27 = sphi %s3743_s27, %s5234_s27  }
   0x7   : > { %s3136_s14 = sadd.s32 4294967294, %s3663_s30   ;;  %s3768_s15 = sadd.s32 1, %s3663_s30  }
   0x8   : > { %s328_s16 = sadd.s32 1, %s3659_s29  ;;  %s325_s17 = ssub.s32 %s3663_s30, %s3768_s15 }
   0x9   : > { %p338_p0 = scmp.ne.s32.totalorder %s3659_s29, %s3655_s28  ;;  %p326_p1 = scmp.eq.s32.totalorder %s325_s17, 0 }
   0xa   : > { %p339_p2 = scmp.eq.s32.totalorder %s3764_s12, 1  ;;  %p344_p3 = scmp.ne.s32.totalorder %s3655_s28, %s3651_s27 }
   0xb   : > { %p345_p4 = scmp.eq.s32.totalorder %s3136_s14, 1  ;;  %p3139_p7 = scmp.ge.s32.totalorder %s3663_s30, 1 }
   0xc   : > { %s3779_s18 = scalar_select %p326_p1, %s3659_s29, %s328_s16  }
   0xd   : > { %p3781_p5 = por %p339_p2, %p338_p0  ;;  %p3785_p6 = por %p345_p4, %p344_p3 }
   0xe   : > { %5201 = sst [smem:[#allocation7_spill]] %s3779_s18  ;;  %p422_p8 = scmp.lt.s32.totalorder %s3663_s30, 3 }
  0x10   : > { %p423_p9 = pnand %p3139_p7, %p422_p8 }
  0x12   : > { %426 = sbr.rel (%p423_p9) target bundleno = 3755 (0xeab), region = 72 }
  0x17   : > { %v3202_v1 = vld [vmem:[%s5175_s4 + $0x28] sm:$0xf]  ;;  %v3350_v2 = vld [vmem:[%s5175_s4 + $0x28] sm:$0x30]  ;;  %vm679_vm0 = vcmask 1045504   ;;  %v3349_v5 = vld [vmem:[%s5175_s4 + $0x20] sm:$0xff]  ;;  %s3041_s23 = scalar_lea.hbm %s5184_s13, %s3764_s12 }
  0x18   : > { %v3203_v3 = vor.u32 %v3350_v2, %v3202_v1  ;;  %v3348_v6 = vld [vmem:[%s5175_s4 + $0x18] sm:$0xff]  ;;  %p480_p10 = scmp.lt.s32.totalorder %s3764_s12, 1  ;;  %v3347_v7 = vld [vmem:[%s5175_s4 + $0x10] sm:$0xff]  ;;  %v3346_v8 = vld [vmem:[%s5175_s4 + $0x8] sm:$0xff]  ;;  %vm654_vm1 = vcmask 752640   ;;  %vm1004_vm2 = vcmask 1040384  }
  0x19   : > { %v3345_v9 = vld [vmem:[%s5175_s4] sm:$0xff]  ;;  %v964_v16 = vld [vmem:[%s5177_s6 + $0x10] sm:$0x3]  ;;  %vm1005_vm3 = vcmask 1041408   ;;  %v3665_v19 = vmov 65535   ;;  %v3352_v24 = vld [vmem:[%s5177_s6 + $0x8] sm:$0xff] }
  0x1a   : > { %v681_v4 = vsel %vm679_vm0, %v3203_v3, 0  ;;  %s3808_s22 = scalar_select %p480_p10, %s3764_s12, 1  ;;  %v974_v17 = vunpack.c.l.b16 %v964_v16  ;;  %v1006_v20 = vsel %vm1004_vm2, 4294967295, %v3665_v19  ;;  %v3351_v25 = vld [vmem:[%s5177_s6] sm:$0xff]  ;;  %vm923_vm4 = vcmask 285696  }
  0x1b   : > { %685 = vmatpush.bf16.msra.mxu0 %v681_v4  ;;  %v3838_v22 = vsel %vm1005_vm3, %v1006_v20, 0  ;;  %v3853_v28 = vld [vmem:[%s5176_s5] ss:$0 sm:$0xff]  ;;  %v3666_v2 = vmov 35   ;;  %vm764_vm5 = vcmask 523264   ;;  %s478_s18 = sand.u32 1, %s3655_s28  }
  0x1c   : > { %s3328_s25 = sshll.u32 %s3808_s22, 6  ;;  %v977_v18 = vpack.c.b16 %v974_v17, %v974_v17  ;;  %3442 = vset.pattern.permute.xlu0 %v3666_v2  ;;  %3443 = vset.pattern.permute.xlu1 %v3666_v2  ;;  %v902_v4 = vld [vmem:[%s5178_s7] sm:$0x3]  ;;  %s479_s24 = scalar_lea.vmem [#allocation3], %s478_s18 }
  0x1d   : > { %s3820_s29 = scalar_lea.vmem %s5171_s0, %s3328_s25  ;;  %3444 = vset.pattern.permute.xlu2 %v3666_v2  ;;  %s3331_s25 = sshll.u32 %s3808_s22, 3 }
  0x1e   : > { %v3332_v10 = vld [vmem:[%s3820_s29] sm:$0xff]  ;;  %v3333_v11 = vld [vmem:[%s3820_s29 + $0x8] sm:$0xff]  ;;  %v3334_v12 = vld [vmem:[%s3820_s29 + $0x10] sm:$0xff]  ;;  %v1009_v23 = vand.u32 %v3838_v22, %v977_v18  ;;  %s3033_s14 = scalar_lea.sflag [#allocation4], %s478_s18 }
  0x1f   : > { %686 = vmatpush.bf16.msra.mxu0 %v3349_v5  ;;  %v3335_v13 = vld [vmem:[%s3820_s29 + $0x18] sm:$0xff]  ;;  %v3336_v14 = vld [vmem:[%s3820_s29 + $0x20] sm:$0xff]  ;;  %v3337_v15 = vld [vmem:[%s3820_s29 + $0x28] sm:$0xff] }
  0x20   : > { %v3338_v21 = vld [vmem:[%s3820_s29 + $0x30] sm:$0xff]  ;;  %1016 = vmatpush.bf16.msra.mxu2 %v1009_v23  ;;  %v3339_v26 = vld [vmem:[%s3820_s29 + $0x38] sm:$0xff]  ;;  %s3329_s29 = sshll.u32 %s3808_s22, 5 }
  0x21   : > { %s494_s17 = scalar_lea.vmem %s5173_s2, %s3329_s29  ;;  %s3924_s26 = scalar_lea.vmem %s5172_s1, %s3329_s29 }
  0x22   : > { %v3343_v49 = vld [vmem:[%s494_s17 + $0x18] sm:$0xff]  ;;  %v3342_v54 = vld [vmem:[%s494_s17 + $0x10] sm:$0xff]  ;;  %v3341_v58 = vld [vmem:[%s494_s17 + $0x8] sm:$0xff]  ;;  %s5078_s29 = scalar_lea.vmem %s5174_s3, %s3331_s25  ;;  %s3043_s25 = sshll.u32 %s479_s24, 4  ;;  %s3044_s25 = int_to_ptr.vmem [resolvable:$true] %s3043_s25 }
  0x23   : > { %687 = vmatpush.bf16.msra.mxu0 %v3348_v6  ;;  %v937_v50 = vsel %vm923_vm4, %v3343_v49, 0  ;;  %v934_v56 = vsel %vm923_vm4, %v3342_v54, 0  ;;  %v931_v59 = vsel %vm923_vm4, %v3341_v58, 0  ;;  %v3340_v63 = vld [vmem:[%s494_s17] sm:$0xff]  ;;  %s3621_s17 = scalar_lea.hbm %s5184_s13, 2 }
  0x24   : > { %1017 = vmatpush.bf16.msra.mxu2 %v3352_v24  ;;  %943 = vmatpush.bf16.xpose.msra.mxu1 %v937_v50  ;;  %v928_v1 = vsel %vm923_vm4, %v3340_v63, 0 }
  0x27   : > { %688 = vmatpush.bf16.msra.mxu0 %v3347_v7 }
  0x28   : > { %1018 = vmatpush.bf16.msra.mxu2 %v3351_v25 }
  0x2b   : > { %689 = vmatpush.bf16.msra.mxu0 %v3346_v8 }
  0x2c   : > { %944 = vmatpush.bf16.xpose.msra.mxu1 %v934_v56 }
  0x2f   : > { %690 = vmatpush.bf16.msra.mxu0 %v3345_v9 }
  0x32   : > { %3204 = vmatmul.msk.bf16.vlgmr.msra.gmra.mxu0 %vm654_vm1, %v3332_v10 }
  0x34   : > { %945 = vmatpush.bf16.xpose.msra.mxu1 %v931_v59 }
  0x3c   : > { %946 = vmatpush.bf16.xpose.msra.mxu1 %v928_v1 }
  0x42   : > { %3205 = vmatmul.msk.bf16.gmra.mxu0 %vm654_vm1, %v3333_v11 }
  0x43   : > { %3228 = vmatmul.msk.bf16.vlgmr.msra.gmra.mxu1 %vm923_vm4, %v902_v4 }
  0x52   : > { %3206 = vmatmul.msk.bf16.gmra.mxu0 %vm654_vm1, %v3334_v12 }
  0x62   : > { %3207 = vmatmul.msk.bf16.gmra.mxu0 %vm654_vm1, %v3335_v13 }
  0x72   : > { %3208 = vmatmul.msk.bf16.gmra.mxu0 %vm654_vm1, %v3336_v14 }
  0x82   : > { %3209 = vmatmul.msk.bf16.gmra.mxu0 %vm654_vm1, %v3337_v15 }
  0x92   : > { %3210 = vmatmul.msk.bf16.gmra.mxu0 %vm654_vm1, %v3338_v21 }
  0xa2   : > { %3211 = vmatmul.msk.bf16.gmra.mxu0 %vm654_vm1, %v3339_v26 }
  0xaf   : > { %v692_v27 = vpop.f32.mrf.mxu0 }
  0xb0   : > { %v693_v30 = vadd.f32 %v3853_v28, %v692_v27 }
  0xb7   : > { %v694_v29 = vpop.f32.mrf.mxu0 }
  0xb8   : > { %v695_v31 = vadd.f32 %v3853_v28, %v694_v29 }
  0xba   : > { %v952_v32 = vpack.c.bf16 %v695_v31, %v693_v30 }
  0xbc   : > { %3237 = vmatmul.msk.bf16.vlgmr.msra.gmra.mxu2 %vm923_vm4, %v952_v32 }
  0xbf   : > { %v697_v33 = vpop.f32.mrf.mxu0 }
  0xc0   : > { %v698_v35 = vadd.f32 %v3853_v28, %v697_v33  ;;  %v3917_v26 = vpop.f32.mrf.mxu1 }
  0xc7   : > { %v699_v34 = vpop.f32.mrf.mxu0 }
  0xc8   : > { %v700_v36 = vadd.f32 %v3853_v28, %v699_v34  ;;  %v950_v29 = vpop.f32.mrf.mxu1 }
  0xca   : > { %v953_v37 = vpack.c.bf16 %v700_v36, %v698_v35 }
  0xcc   : > { %3238 = vmatmul.msk.bf16.gmra.mxu2 %vm923_vm4, %v953_v37 }
  0xcf   : > { %v702_v38 = vpop.f32.mrf.mxu0 }
  0xd0   : > { %v703_v40 = vadd.f32 %v3853_v28, %v702_v38 }
  0xd7   : > { %v704_v39 = vpop.f32.mrf.mxu0 }
  0xd8   : > { %v705_v41 = vadd.f32 %v3853_v28, %v704_v39 }
  0xda   : > { %v954_v42 = vpack.c.bf16 %v705_v41, %v703_v40  ;;  %v518_v40 = vld [vmem:[%s3924_s26 + $0x8] sm:$0xff] }
  0xdc   : > { %3239 = vmatmul.msk.bf16.gmra.mxu2 %vm923_vm4, %v954_v42 }
  0xdf   : > { %v707_v43 = vpop.f32.mrf.mxu0 }
  0xe0   : > { %v708_v45 = vadd.f32 %v3853_v28, %v707_v43 }
  0xe7   : > { %v709_v44 = vpop.f32.mrf.mxu0 }
  0xe8   : > { %v710_v46 = vadd.f32 %v3853_v28, %v709_v44  ;;  %v525_v44 = vunpack.c.0.s8 %v518_v40 }
  0xea   : > { %v955_v47 = vpack.c.bf16 %v710_v46, %v708_v45  ;;  %v3949_v46 = vcvt.s32.f32 %v525_v44 }
  0xec   : > { %3240 = vmatmul.msk.bf16.gmra.mxu2 %vm923_vm4, %v955_v47  ;;  %v3955_v49 = vsel %vm764_vm5, %v3949_v46, 0.0  ;;  %vm736_vm6 = vcmp.gt.f32.partialorder %v3949_v46, 0.0 }
  0xef   : > { %v712_v48 = vpop.f32.mrf.mxu0 }
  0xf0   : > { %v713_v52 = vadd.f32 %v3853_v28, %v712_v48 }
  0xf7   : > { %v714_v51 = vpop.f32.mrf.mxu0 }
  0xf8   : > { %v715_v53 = vadd.f32 %v3853_v28, %v714_v51 }
  0xfa   : > { %v956_v55 = vpack.c.bf16 %v715_v53, %v713_v52 }
  0xfc   : > { %3241 = vmatmul.msk.bf16.gmra.mxu2 %vm923_vm4, %v956_v55  ;;  %v526_v55 = vunpack.c.1.s8 %v518_v40 }
  0xff   : > { %v717_v57 = vpop.f32.mrf.mxu0 }
 0x100   : > { %v718_v61 = vadd.f32 %v3853_v28, %v717_v57  ;;  %v3963_v57 = vcvt.s32.f32 %v526_v55 }
 0x102   : > { %v780_v59 = vsel %vm764_vm5, %v3963_v57, 0.0  ;;  %vm737_vm13 = vcmp.gt.f32.partialorder %v3963_v57, 0.0 }
 0x107   : > { %v719_v60 = vpop.f32.mrf.mxu0 }
 0x108   : > { %v720_v62 = vadd.f32 %v3853_v28, %v719_v60  ;;  %v527_v60 = vunpack.c.2.s8 %v518_v40 }
 0x10a   : > { %v957_v0 = vpack.c.bf16 %v720_v62, %v718_v61  ;;  %v3967_v63 = vcvt.s32.f32 %v527_v60 }
 0x10c   : > { %3242 = vmatmul.msk.bf16.gmra.mxu2 %vm923_vm4, %v957_v0  ;;  %v783_v1 = vsel %vm764_vm5, %v3967_v63, 0.0  ;;  %vm738_vm3 = vcmp.gt.f32.partialorder %v3967_v63, 0.0 }
 0x10f   : > { %v722_v3 = vpop.f32.mrf.mxu0 }
 0x110   : > { %v723_v6 = vadd.f32 %v3853_v28, %v722_v3  ;;  %v528_v3 = vunpack.c.3.s8 %v518_v40 }
 0x117   : > { %v724_v5 = vpop.f32.mrf.mxu0 }
 0x118   : > { %v725_v7 = vadd.f32 %v3853_v28, %v724_v5  ;;  %v3975_v5 = vcvt.s32.f32 %v528_v3 }
 0x11a   : > { %v958_v8 = vpack.c.bf16 %v725_v7, %v723_v6  ;;  %v519_v6 = vld [vmem:[%s3924_s26 + $0x10] sm:$0xff]  ;;  %v786_v7 = vsel %vm764_vm5, %v3975_v5, 0.0 }
 0x11c   : > { %3243 = vmatmul.msk.bf16.gmra.mxu2 %vm923_vm4, %v958_v8 }
 0x11f   : > { %v727_v9 = vpop.f32.mrf.mxu0 }
 0x120   : > { %v728_v11 = vadd.f32 %v3853_v28, %v727_v9 }
 0x127   : > { %v729_v10 = vpop.f32.mrf.mxu0 }
 0x128   : > { %v730_v12 = vadd.f32 %v3853_v28, %v729_v10  ;;  %v517_v28 = vld [vmem:[%s3924_s26] sm:$0xff]  ;;  %v529_v10 = vunpack.c.0.s8 %v519_v6 }
 0x129   : > { %v521_v30 = vunpack.c.0.s8 %v517_v28  ;;  %v522_v31 = vunpack.c.1.s8 %v517_v28  ;;  %v523_v37 = vunpack.c.2.s8 %v517_v28  ;;  %v524_v45 = vunpack.c.3.s8 %v517_v28  ;;  %v520_v28 = vld [vmem:[%s3924_s26 + $0x18] sm:$0xff]  ;;  %s3045_s26 = sshll.u32 %s3041_s23, 4  ;;  %s3046_s26 = int_to_ptr.hbm [resolvable:$true] %s3045_s26 }
 0x12a   : > { %v959_v13 = vpack.c.bf16 %v730_v12, %v728_v11  ;;  %v3984_v12 = vcvt.s32.f32 %v529_v10  ;;  %v533_v29 = vunpack.c.0.s8 %v520_v28 }
 0x12b   : > { %v3927_v33 = vcvt.s32.f32 %v521_v30  ;;  %v3929_v34 = vcvt.s32.f32 %v522_v31  ;;  %v3941_v39 = vcvt.s32.f32 %v523_v37  ;;  %v3951_v47 = vcvt.s32.f32 %v524_v45 }
 0x12c   : > { %3244 = vmatmul.msk.bf16.gmra.mxu2 %vm923_vm4, %v959_v13  ;;  %v789_v13 = vsel %vm764_vm5, %v3984_v12, 0.0  ;;  %v4006_v31 = vcvt.s32.f32 %v533_v29  ;;  %v534_v37 = vunpack.c.1.s8 %v520_v28  ;;  %vm740_vm1 = vcmp.gt.f32.partialorder %v3984_v12, 0.0 }
 0x12d   : > { %v3933_v35 = vsel %vm764_vm5, %v3927_v33, 0.0  ;;  %v3937_v36 = vsel %vm764_vm5, %v3929_v34, 0.0  ;;  %v3946_v42 = vsel %vm764_vm5, %v3941_v39, 0.0  ;;  %v3959_v50 = vsel %vm764_vm5, %v3951_v47, 0.0 }
 0x12e   : > { %v877_v38 = vadd.f32 %v3937_v36, %v3933_v35  ;;  %vm732_vm8 = vcmp.gt.f32.partialorder %v3927_v33, 0.0  ;;  %vm733_vm10 = vcmp.gt.f32.partialorder %v3929_v34, 0.0  ;;  %vm734_vm12 = vcmp.gt.f32.partialorder %v3941_v39, 0.0 }
 0x12f   : > { %vm735_vm0 = vcmp.gt.f32.partialorder %v3951_v47, 0.0 }
 0x130   : > { %v878_v43 = vadd.f32 %v877_v38, %v3946_v42 }
 0x132   : > { %v879_v51 = vadd.f32 %v878_v43, %v3959_v50 }
 0x134   : > { %v880_v52 = vadd.f32 %v879_v51, %v3955_v49 }
 0x136   : > { %v881_v62 = vadd.f32 %v880_v52, %v780_v59  ;;  %v4019_v52 = vperm.slane %v3917_v26, 0 }
 0x138   : > { %v882_v2 = vadd.f32 %v881_v62, %v783_v1 }
 0x13a   : > { %v883_v9 = vadd.f32 %v882_v2, %v786_v7 }
 0x13f   : > { %v3893_v14 = vpop.f32.mrf.mxu2 }
 0x140   : > { %1062 = vperm.xlu0 %3442, %v3893_v14  }
 0x147   : > { %v3896_v15 = vpop.f32.mrf.mxu2 }
 0x148   : > { %1067 = vperm.xlu0 %3442, %v3896_v15   ;;  %v1407_v11 = vpack.c.bf16 %v3896_v15, %v3893_v14  ;;  %v531_v14 = vunpack.c.2.s8 %v519_v6 }
 0x14a   : > { %v3995_v15 = vcvt.s32.f32 %v531_v14 }
 0x14f   : > { %v3899_v16 = vpop.f32.mrf.mxu2 }
 0x150   : > { %1072 = vperm.xlu1 %3443, %v3899_v16  }
 0x157   : > { %v3902_v17 = vpop.f32.mrf.mxu2 }
 0x158   : > { %1077 = vperm.xlu1 %3443, %v3902_v17   ;;  %v1408_v8 = vpack.c.bf16 %v3902_v17, %v3899_v16  ;;  %v884_v16 = vadd.f32 %v883_v9, %v789_v13 }
 0x15f   : > { %v3905_v18 = vpop.f32.mrf.mxu2 }
 0x160   : > { %1082 = vperm.xlu2 %3444, %v3905_v18  }
 0x167   : > { %v3908_v19 = vpop.f32.mrf.mxu2 }
 0x168   : > { %1087 = vperm.xlu2 %3444, %v3908_v19   ;;  %v1409_v4 = vpack.c.bf16 %v3908_v19, %v3905_v18  ;;  %v530_v18 = vunpack.c.1.s8 %v519_v6 }
 0x16a   : > { %v3989_v17 = vcvt.s32.f32 %v530_v18 }
 0x16c   : > { %v792_v19 = vsel %vm764_vm5, %v3989_v17, 0.0 }
 0x16f   : > { %v3911_v20 = vpop.f32.mrf.mxu2 }
 0x170   : > { %1092 = vperm.xlu0 %3442, %v3911_v20  }
 0x177   : > { %v3914_v21 = vpop.f32.mrf.mxu2 }
 0x178   : > { %1097 = vperm.xlu1 %3443, %v3914_v21   ;;  %v1410_v0 = vpack.c.bf16 %v3914_v21, %v3911_v20  ;;  %v885_v20 = vadd.f32 %v884_v16, %v792_v19  ;;  %v795_v21 = vsel %vm764_vm5, %v3995_v15, 0.0 }
 0x17f   : > { %v1040_v23 = vpop.f32.mrf.mxu2 }
 0x180   : > { %1102 = vperm.xlu2 %3444, %v1040_v23  }
 0x187   : > { %v1042_v24 = vpop.f32.mrf.mxu2 }
 0x188   : > { %1107 = vperm.xlu0 %3442, %v1042_v24   ;;  %v1411_v61 = vpack.c.bf16 %v1042_v24, %v1040_v23  ;;  %v886_v23 = vadd.f32 %v885_v20, %v795_v21  ;;  %v532_v24 = vunpack.c.3.s8 %v519_v6 }
 0x18f   : > { %v1045_v25 = vpop.f32.mrf.mxu2 }
 0x190   : > { %1112 = vperm.xlu1 %3443, %v1045_v25  }
 0x197   : > { %v1047_v27 = vpop.f32.mrf.mxu2 }
 0x198   : > { %1117 = vperm.xlu2 %3444, %v1047_v27   ;;  %v1412_v58 = vpack.c.bf16 %v1047_v27, %v1045_v25  ;;  %v4001_v25 = vcvt.s32.f32 %v532_v24 }
 0x19a   : > { %v798_v27 = vsel %vm764_vm5, %v4001_v25, 0.0 }
 0x19b   : > { %v887_v30 = vadd.f32 %v886_v23, %v798_v27 }
 0x19f   : > { %v1050_v32 = vpop.f32.mrf.mxu2 }
 0x1a0   : > { %1122 = vperm.xlu0 %3442, %v1050_v32  }
 0x1a7   : > { %v1052_v41 = vpop.f32.mrf.mxu2 }
 0x1a8   : > { %1127 = vperm.xlu1 %3443, %v1052_v41   ;;  %v1413_v56 = vpack.c.bf16 %v1052_v41, %v1050_v32  ;;  %v801_v32 = vsel %vm764_vm5, %v4006_v31, 0.0  ;;  %v535_v41 = vunpack.c.2.s8 %v520_v28 }
 0x1aa   : > { %v4014_v44 = vcvt.s32.f32 %v535_v41 }
 0x1af   : > { %v1055_v48 = vpop.f32.mrf.mxu2 }
 0x1b0   : > { %1132 = vperm.xlu2 %3444, %v1055_v48  }
 0x1b2   : > { %v1063_v38 = vpop.permute.xlu0 %1062 }
 0x1b7   : > { %v1057_v53 = vpop.f32.mrf.mxu2 }
 0x1b8   : > { %v1414_v54 = vpack.c.bf16 %v1057_v53, %v1055_v48  ;;  %1137 = vperm.xlu0 %3442, %v1057_v53   ;;  %v807_v48 = vsel %vm764_vm5, %v4014_v44, 0.0 }
 0x1ba   : > { %1431 = vmatpush.bf16.msrb.mxu0 %v1414_v54  ;;  %3359 = vmatpush.bf16.msra.mxu2 %v1414_v54  ;;  %v1083_v40 = vpop.permute.xlu2 %1082  ;;  %v1068_v53 = vpop.permute.xlu0 %1067 }
 0x1bb   : > { %3360 = vmatpush.bf16.msra.mxu3 %v1414_v54 }
 0x1be   : > { %1432 = vmatpush.bf16.msrb.mxu0 %v1413_v56  ;;  %3361 = vmatpush.bf16.msra.mxu2 %v1413_v56 }
 0x1bf   : > { %3362 = vmatpush.bf16.msra.mxu3 %v1413_v56  ;;  %v1145_v56 = vadd.f32 %v4019_v52, %v1083_v40 }
 0x1c1   : > { %vm1161_vm7 = vcmp.gt.f32.partialorder %v1145_v56, 0.0 }
 0x1c2   : > { %1433 = vmatpush.bf16.msrb.mxu0 %v1412_v58  ;;  %3363 = vmatpush.bf16.msra.mxu2 %v1412_v58  ;;  %v1088_v54 = vpop.permute.xlu2 %1087 }
 0x1c3   : > { %3364 = vmatpush.bf16.msra.mxu3 %v1412_v58  ;;  %v1146_v6 = vadd.f32 %v4019_v52, %v1088_v54 }
 0x1c5   : > { %v1178_v34 = vmul.f32 0.2, %v1146_v6  ;;  %vm1162_vm14 = vcmp.gt.f32.partialorder %v1146_v6, 0.0 }
 0x1c6   : > { %1434 = vmatpush.bf16.msrb.mxu0 %v1411_v61  ;;  %3365 = vmatpush.bf16.msra.mxu2 %v1411_v61 }
 0x1c7   : > { %3366 = vmatpush.bf16.msra.mxu3 %v1411_v61  ;;  %v1142_v61 = vadd.f32 %v4019_v52, %v1068_v53 }
 0x1c9   : > { %vm1158_vm11 = vcmp.gt.f32.partialorder %v1142_v61, 0.0 }
 0x1ca   : > { %1435 = vmatpush.bf16.msrb.mxu0 %v1410_v0  ;;  %3367 = vmatpush.bf16.msra.mxu2 %v1410_v0 }
 0x1cb   : > { %3368 = vmatpush.bf16.msra.mxu3 %v1410_v0  ;;  %v1177_v0 = vmul.f32 0.2, %v1145_v56 }
 0x1cd   : > { %v1193_v10 = vsel %vm1161_vm7, %v1145_v56, %v1177_v0  ;;  %vm743_vm7 = vcmp.gt.f32.partialorder %v4001_v25, 0.0 }
 0x1ce   : > { %1436 = vmatpush.bf16.msrb.mxu0 %v1409_v4  ;;  %3369 = vmatpush.bf16.msra.mxu2 %v1409_v4 }
 0x1cf   : > { %3370 = vmatpush.bf16.msra.mxu3 %v1409_v4  ;;  %v1174_v4 = vmul.f32 0.2, %v1142_v61 }
 0x1d2   : > { %1437 = vmatpush.bf16.msrb.mxu0 %v1408_v8  ;;  %3371 = vmatpush.bf16.msra.mxu2 %v1408_v8 }
 0x1d3   : > { %3372 = vmatpush.bf16.msra.mxu3 %v1408_v8  ;;  %v3667_v8 = vmov -1e+30  }
 0x1d4   : > { %v4038_v9 = vsel %vm736_vm6, 0.0, %v3667_v8  ;;  %v4041_v46 = vsel %vm732_vm8, 0.0, %v3667_v8  ;;  %v4044_v33 = vsel %vm733_vm10, 0.0, %v3667_v8  ;;  %v4060_v24 = vsel %vm734_vm12, 0.0, %v3667_v8 }
 0x1d5   : > { %5204 = vst [vmem:[#allocation8_spill] sm:$0xff] %v4038_v9  ;;  %v4048_v18 = vadd.f32 %v1193_v10, %v4038_v9  ;;  %v4063_v57 = vsel %vm737_vm13, 0.0, %v3667_v8  ;;  %vm739_vm6 = vcmp.gt.f32.partialorder %v3975_v5, 0.0  ;;  %v4105_v63 = vsel %vm738_vm3, 0.0, %v3667_v8 }
 0x1d6   : > { %1438 = vmatpush.bf16.msrb.mxu0 %v1407_v11  ;;  %3373 = vmatpush.bf16.msra.mxu2 %v1407_v11  ;;  %5205 = vst [vmem:[#allocation9_spill] sm:$0xff] %v4041_v46  ;;  %vm741_vm10 = vcmp.gt.f32.partialorder %v3989_v17, 0.0 }
 0x1d7   : > { %3374 = vmatpush.bf16.msra.mxu3 %v1407_v11  ;;  %5206 = vst [vmem:[#allocation10_spill] sm:$0xff] %v4044_v33 }
 0x1d8   : > { %5207 = vst [vmem:[#allocation11_spill] sm:$0xff] %v4060_v24 }
 0x1d9   : > { %766 = vadd.xlane.f32.xlu2 %v3933_v35  ;;  %v888_v35 = vadd.f32 %v887_v30, %v801_v32  ;;  %5208 = vst [vmem:[#allocation12_spill] sm:$0xff] %v4063_v57 }
 0x1da   : > { %v1103_v2 = vpop.permute.xlu2 %1102  ;;  %5210 = vst [vmem:[#allocation14_spill] sm:$0xff] %v4105_v63 }
 0x1db   : > { %v1149_v47 = vadd.f32 %v4019_v52, %v1103_v2  ;;  %v4120_v2 = vsel %vm743_vm7, 0.0, %v3667_v8 }
 0x1dc   : > { %5212 = vst [vmem:[#allocation16_spill] sm:$0xff] %v4120_v2 }
 0x1dd   : > { %vm1165_vm8 = vcmp.gt.f32.partialorder %v1149_v47, 0.0 }
 0x1e1   : > { %772 = vadd.xlane.f32.xlu2 %v3946_v42  ;;  %v4010_v42 = vcvt.s32.f32 %v534_v37 }
 0x1e2   : > { %769 = vadd.xlane.f32.xlu0 %v3937_v36  ;;  %v1073_v36 = vpop.permute.xlu1 %1072  ;;  %v1093_v3 = vpop.permute.xlu0 %1092 }
 0x1e3   : > { %v804_v43 = vsel %vm764_vm5, %v4010_v42, 0.0  ;;  %v1147_v30 = vadd.f32 %v4019_v52, %v1093_v3 }
 0x1e4   : > { %v889_v45 = vadd.f32 %v888_v35, %v804_v43  ;;  %v4077_v35 = vsel %vm735_vm0, 0.0, %v3667_v8  ;;  %vm745_vm0 = vcmp.gt.f32.partialorder %v4010_v42, 0.0 }
 0x1e6   : > { %v890_v51 = vadd.f32 %v889_v45, %v807_v48  ;;  %v1179_v45 = vmul.f32 0.2, %v1147_v30 }
 0x1e9   : > { %775 = vadd.xlane.f32.xlu2 %v3959_v50  ;;  %v536_v50 = vunpack.c.3.s8 %v520_v28  ;;  %v4068_v28 = vsel %vm764_vm5, %v4048_v18, -inf }
 0x1ea   : > { %778 = vadd.xlane.f32.xlu0 %v3955_v49  ;;  %v1078_v49 = vpop.permute.xlu1 %1077 }
 0x1eb   : > { %v4021_v55 = vcvt.s32.f32 %v536_v50  ;;  %v1144_v39 = vadd.f32 %v4019_v52, %v1078_v49 }
 0x1ed   : > { %v810_v58 = vsel %vm764_vm5, %v4021_v55, 0.0  ;;  %v1176_v37 = vmul.f32 0.2, %v1144_v39  ;;  %vm1160_vm2 = vcmp.gt.f32.partialorder %v1144_v39, 0.0 }
 0x1ee   : > { %v4027_v60 = vadd.f32 %v890_v51, %v810_v58 }
 0x1ef   : > { %v1192_v53 = vsel %vm1160_vm2, %v1144_v39, %v1176_v37  ;;  %vm746_vm2 = vcmp.gt.f32.partialorder %v4014_v44, 0.0 }
 0x1f1   : > { %781 = vadd.xlane.f32.xlu2 %v780_v59  ;;  %v1141_v59 = vadd.f32 %v4019_v52, %v1063_v38  ;;  %v4087_v38 = vsel %vm740_vm1, 0.0, %v3667_v8 }
 0x1f2   : > { %784 = vadd.xlane.f32.xlu0 %v783_v1  ;;  %v4030_v62 = vpop.permute.xlu1 %1097  ;;  %5209 = vst [vmem:[#allocation13_spill] sm:$0xff] %v4087_v38 }
 0x1f3   : > { %v1173_v1 = vmul.f32 0.2, %v1141_v59  ;;  %vm1157_vm9 = vcmp.gt.f32.partialorder %v1141_v59, 0.0  ;;  %v1148_v49 = vadd.f32 %v4019_v52, %v4030_v62 }
 0x1f5   : > { %v1189_v11 = vsel %vm1157_vm9, %v1141_v59, %v1173_v1  ;;  %vm1163_vm9 = vcmp.gt.f32.partialorder %v1147_v30, 0.0  ;;  %v4115_v1 = vsel %vm739_vm6, 0.0, %v3667_v8  ;;  %v1180_v3 = vmul.f32 0.2, %v1148_v49 }
 0x1f6   : > { %v4052_v20 = vadd.f32 %v1189_v11, %v4041_v46  ;;  %v1195_v0 = vsel %vm1163_vm9, %v1147_v30, %v1179_v45  ;;  %5211 = vst [vmem:[#allocation15_spill] sm:$0xff] %v4115_v1  ;;  %vm1164_vm12 = vcmp.gt.f32.partialorder %v1148_v49, 0.0  ;;  %vm744_vm6 = vcmp.gt.f32.partialorder %v4006_v31, 0.0 }
 0x1f7   : > { %v4133_v25 = vadd.f32 %v1195_v0, %v4105_v63  ;;  %v4152_v31 = vsel %vm746_vm2, 0.0, %v3667_v8  ;;  %v4155_v37 = vsel %vm744_vm6, 0.0, %v3667_v8 }
 0x1f8   : > { %5216 = vst [vmem:[#allocation20_spill] sm:$0xff] %v4155_v37 }
 0x1f9   : > { %787 = vadd.xlane.f32.xlu2 %v786_v7  ;;  %v1143_v7 = vadd.f32 %v4019_v52, %v1073_v36 }
 0x1fa   : > { %790 = vadd.xlane.f32.xlu0 %v789_v13  ;;  %v1190_v13 = vsel %vm1158_vm11, %v1142_v61, %v1174_v4  ;;  %v1108_v23 = vpop.permute.xlu0 %1107  ;;  %vm742_vm11 = vcmp.gt.f32.partialorder %v3995_v15, 0.0 }
 0x1fb   : > { %v1175_v16 = vmul.f32 0.2, %v1143_v7  ;;  %vm1159_vm15 = vcmp.gt.f32.partialorder %v1143_v7, 0.0  ;;  %v4055_v14 = vadd.f32 %v1190_v13, %v4044_v33  ;;  %v1150_v50 = vadd.f32 %v4019_v52, %v1108_v23 }
 0x1fc   : > { %v4130_v5 = vsel %vm742_vm11, 0.0, %v3667_v8  ;;  %v4139_v23 = vsel %vm745_vm0, 0.0, %v3667_v8 }
 0x1fd   : > { %v1191_v29 = vsel %vm1159_vm15, %v1143_v7, %v1175_v16  ;;  %v4081_v12 = vsel %vm764_vm5, %v4055_v14, -inf  ;;  %v1182_v4 = vmul.f32 0.2, %v1150_v50  ;;  %v4127_v7 = vsel %vm741_vm10, 0.0, %v3667_v8  ;;  %5214 = vst [vmem:[#allocation18_spill] sm:$0xff] %v4130_v5 }
 0x1fe   : > { %v4092_v41 = vadd.f32 %v1191_v29, %v4060_v24  ;;  %5213 = vst [vmem:[#allocation17_spill] sm:$0xff] %v4127_v7  ;;  %vm1166_vm13 = vcmp.gt.f32.partialorder %v1150_v50, 0.0  ;;  %v1208_v29 = vadd.f32 %v1192_v53, %v4077_v35 }
 0x1ff   : > { %v1198_v16 = vsel %vm1166_vm13, %v1150_v50, %v1182_v4  ;;  %5215 = vst [vmem:[#allocation19_spill] sm:$0xff] %v4139_v23 }
 0x200   : > { %v4149_v44 = vadd.f32 %v1198_v16, %v4127_v7  ;;  %v1223_v53 = vsel %vm764_vm5, %v4092_v41, -inf  ;;  %v1224_v0 = vsel %vm764_vm5, %v1208_v29, -inf }
 0x201   : > { %793 = vadd.xlane.f32.xlu2 %v792_v19 }
 0x202   : > { %796 = vadd.xlane.f32.xlu0 %v795_v21  ;;  %v1113_v19 = vpop.permute.xlu1 %1112  ;;  %v1118_v21 = vpop.permute.xlu2 %1117 }
 0x203   : > { %v1151_v59 = vadd.f32 %v4019_v52, %v1113_v19 }
 0x205   : > { %v1183_v11 = vmul.f32 0.2, %v1151_v59  ;;  %vm1167_vm15 = vcmp.gt.f32.partialorder %v1151_v59, 0.0 }
 0x209   : > { %799 = vadd.xlane.f32.xlu2 %v798_v27  ;;  %v1194_v27 = vsel %vm1162_vm14, %v1146_v6, %v1178_v34  ;;  %v1196_v34 = vsel %vm1164_vm12, %v1148_v49, %v1180_v3 }
 0x20a   : > { %802 = vadd.xlane.f32.xlu0 %v801_v32  ;;  %v4074_v32 = vsel %vm764_vm5, %v4052_v20, -inf  ;;  %v4084_v36 = vadd.f32 %v1194_v27, %v4063_v57  ;;  %v1133_v54 = vpop.permute.xlu2 %1132 }
 0x20b   : > { %v1226_v40 = vmax.f32 %v4074_v32, %v4068_v28  ;;  %v1155_v15 = vadd.f32 %v4019_v52, %v1133_v54 }
 0x20c   : > { %v4102_v51 = vsel %vm764_vm5, %v4084_v36, -inf }
 0x20d   : > { %v1187_v17 = vmul.f32 0.2, %v1155_v15  ;;  %vm1171_vm3 = vcmp.gt.f32.partialorder %v1155_v15, 0.0  ;;  %v1228_v54 = vmax.f32 %v4081_v12, %v4102_v51 }
 0x20f   : > { %v1203_v30 = vsel %vm1171_vm3, %v1155_v15, %v1187_v17 }
 0x211   : > { %805 = vadd.xlane.f32.xlu2 %v804_v43  ;;  %v1181_v43 = vmul.f32 0.2, %v1149_v47 }
 0x212   : > { %808 = vadd.xlane.f32.xlu0 %v807_v48  ;;  %v1123_v56 = vpop.permute.xlu0 %1122 }
 0x213   : > { %v1197_v62 = vsel %vm1165_vm8, %v1149_v47, %v1181_v43  ;;  %v1153_v6 = vadd.f32 %v4019_v52, %v1123_v56  ;;  %v4146_v47 = vadd.f32 %v1196_v34, %v4115_v1  ;;  %vm747_vm8 = vcmp.gt.f32.partialorder %v4021_v55, 0.0 }
 0x214   : > { %v4143_v42 = vadd.f32 %v1197_v62, %v4087_v38  ;;  %v1229_v56 = vsel %vm764_vm5, %v4133_v25, -inf  ;;  %v4179_v55 = vadd.f32 %v1203_v30, %v4152_v31  ;;  %v4186_v12 = vsel %vm747_vm8, 0.0, %v3667_v8 }
 0x215   : > { %v1185_v19 = vmul.f32 0.2, %v1153_v6  ;;  %vm1169_vm7 = vcmp.gt.f32.partialorder %v1153_v6, 0.0  ;;  %5217 = vst [vmem:[#allocation21_spill] sm:$0xff] %v4186_v12 }
 0x216   : > { %v1245_v8 = vsel %vm764_vm5, %v4179_v55, -inf }
 0x217   : > { %v1201_v43 = vsel %vm1169_vm7, %v1153_v6, %v1185_v19  ;;  %v1230_v6 = vmax.f32 %v1223_v53, %v1229_v56 }
 0x218   : > { %v4182_v62 = vadd.f32 %v1201_v43, %v4155_v37 }
 0x219   : > { %811 = vadd.xlane.f32.xlu2 %v810_v58  ;;  %v1152_v58 = vadd.f32 %v4019_v52, %v1118_v21  ;;  %v1199_v21 = vsel %vm1167_vm15, %v1151_v59, %v1183_v11  ;;  %v1231_v59 = vsel %vm764_vm5, %v4146_v47, -inf }
 0x21a   : > { %v1128_v48 = vpop.permute.xlu1 %1127  ;;  %v1241_v34 = vsel %vm764_vm5, %v4182_v62, -inf }
 0x21b   : > { %v1154_v61 = vadd.f32 %v4019_v52, %v1128_v48  ;;  %v1184_v10 = vmul.f32 0.2, %v1152_v58  ;;  %vm1168_vm14 = vcmp.gt.f32.partialorder %v1152_v58, 0.0  ;;  %v4161_v48 = vadd.f32 %v1199_v21, %v4130_v5 }
 0x21d   : > { %v1186_v13 = vmul.f32 0.2, %v1154_v61  ;;  %vm1170_vm1 = vcmp.gt.f32.partialorder %v1154_v61, 0.0  ;;  %v1200_v39 = vsel %vm1168_vm14, %v1152_v58, %v1184_v10  ;;  %v1237_v4 = vsel %vm764_vm5, %v4161_v48, -inf }
 0x21e   : > { %v4158_v45 = vadd.f32 %v1200_v39, %v4120_v2  ;;  %v1232_v10 = vmax.f32 %v1224_v0, %v1231_v59  ;;  %v1238_v39 = vmax.f32 %v1230_v6, %v1237_v4 }
 0x21f   : > { %v1202_v27 = vsel %vm1170_vm1, %v1154_v61, %v1186_v13  ;;  %v1235_v61 = vsel %vm764_vm5, %v4149_v44, -inf }
 0x220   : > { %v4164_v49 = vadd.f32 %v1202_v27, %v4139_v23  ;;  %v1239_v3 = vsel %vm764_vm5, %v4158_v45, -inf  ;;  %v1236_v11 = vmax.f32 %v1228_v54, %v1235_v61  ;;  %v1246_v30 = vmax.f32 %v1238_v39, %v1245_v8 }
 0x221   : > { %v1240_v19 = vmax.f32 %v1232_v10, %v1239_v3 }
 0x222   : > { %v1243_v15 = vsel %vm764_vm5, %v4164_v49, -inf }
 0x223   : > { %v1244_v21 = vmax.f32 %v1236_v11, %v1243_v15 }
 0x22a   : > { %v1138_v50 = vpop.permute.xlu0 %1137 }
 0x22b   : > { %v1156_v58 = vadd.f32 %v4019_v52, %v1138_v50  ;;  %v1233_v52 = vsel %vm764_vm5, %v4143_v42, -inf }
 0x22c   : > { %v1234_v17 = vmax.f32 %v1226_v40, %v1233_v52 }
 0x22d   : > { %vm1172_vm9 = vcmp.gt.f32.partialorder %v1156_v58, 0.0  ;;  %v1188_v51 = vmul.f32 0.2, %v1156_v58 }
 0x22e   : > { %v1242_v43 = vmax.f32 %v1234_v17, %v1241_v34 }
 0x22f   : > { %v1204_v13 = vsel %vm1172_vm9, %v1156_v58, %v1188_v51 }
 0x230   : > { %v4201_v16 = vadd.f32 %v1204_v13, %v4186_v12  ;;  %v1249_v53 = vmax.f32 %v1242_v43, %v1244_v21 }
 0x232   : > { %v1247_v27 = vsel %vm764_vm5, %v4201_v16, -inf }
 0x233   : > { %v1248_v50 = vmax.f32 %v1240_v19, %v1247_v27 }
 0x235   : > { %v1250_v54 = vmax.f32 %v1246_v30, %v1248_v50 }
 0x237   : > { %v1251_v56 = vmax.f32 %v1249_v53, %v1250_v54 }
 0x239   : > { %v1252_v58 = vrot.slane %v1251_v56, 4 }
 0x23b   : > { %v1253_v59 = vmax.f32 %v1251_v56, %v1252_v58 }
 0x23d   : > { %v1254_v61 = vrot.slane %v1253_v59, 2 }
 0x23f   : > { %v1255_v0 = vmax.f32 %v1253_v59, %v1254_v61 }
 0x241   : > { %v1256_v51 = vrot.slane %v1255_v0, 1 }
 0x243   : > { %v4208_v13 = vmax.f32 %v1255_v0, %v1256_v51 }
 0x245   : > { %v1258_v28 = vsub.f32 %v4052_v20, %v4208_v13  ;;  %v1259_v32 = vsub.f32 %v4055_v14, %v4208_v13  ;;  %v1260_v40 = vsub.f32 %v4092_v41, %v4208_v13  ;;  %v1261_v52 = vsub.f32 %v1208_v29, %v4208_v13 }
 0x246   : > { %v1262_v3 = vsub.f32 %v4048_v18, %v4208_v13  ;;  %v1263_v6 = vsub.f32 %v4084_v36, %v4208_v13  ;;  %v1264_v20 = vsub.f32 %v4133_v25, %v4208_v13  ;;  %v1265_v41 = vsub.f32 %v4146_v47, %v4208_v13 }
 0x247   : > { %v1274_v4 = vmul.f32 1.442695, %v1258_v28  ;;  %v1276_v15 = vmul.f32 1.442695, %v1259_v32  ;;  %v1278_v10 = vmul.f32 1.442695, %v1260_v40  ;;  %v1266_v18 = vsub.f32 %v4143_v42, %v4208_v13 }
 0x248   : > { %v1280_v11 = vmul.f32 1.442695, %v1261_v52  ;;  %v1282_v14 = vmul.f32 1.442695, %v1262_v3  ;;  %v1284_v29 = vmul.f32 1.442695, %v1263_v6  ;;  %v1267_v25 = vsub.f32 %v4149_v44, %v4208_v13 }
 0x249   : > { %3453 = vpow2.f32 %v1274_v4  ;;  %v1286_v8 = vmul.f32 1.442695, %v1264_v20  ;;  %v1288_v17 = vmul.f32 1.442695, %v1265_v41  ;;  %v1268_v21 = vsub.f32 %v4161_v48, %v4208_v13 }
 0x24a   : > { %3455 = vpow2.f32 %v1276_v15  ;;  %v1290_v27 = vmul.f32 1.442695, %v1266_v18  ;;  %v1269_v50 = vsub.f32 %v4158_v45, %v4208_v13  ;;  %v1292_v53 = vmul.f32 1.442695, %v1267_v25 }
 0x24b   : > { %3457 = vpow2.f32 %v1278_v10  ;;  %v1270_v48 = vsub.f32 %v4182_v62, %v4208_v13  ;;  %v1294_v59 = vmul.f32 1.442695, %v1268_v21  ;;  %v1271_v45 = vsub.f32 %v4164_v49, %v4208_v13 }
 0x24c   : > { %3459 = vpow2.f32 %v1280_v11  ;;  %v1296_v28 = vmul.f32 1.442695, %v1269_v50  ;;  %v1272_v62 = vsub.f32 %v4179_v55, %v4208_v13  ;;  %v1273_v49 = vsub.f32 %v4201_v16, %v4208_v13 }
 0x24d   : > { %3461 = vpow2.f32 %v1282_v14  ;;  %v1298_v3 = vmul.f32 1.442695, %v1270_v48  ;;  %v1300_v10 = vmul.f32 1.442695, %v1271_v45  ;;  %v892_v50 = vrot.slane %v4027_v60, 4 }
 0x24e   : > { %3463 = vpow2.f32 %v1284_v29  ;;  %v1302_v55 = vmul.f32 1.442695, %v1272_v62 }
 0x24f   : > { %v4227_v36 = vpop.eup %3453  ;;  %3465 = vpow2.f32 %v1286_v8  ;;  %v1304_v8 = vmul.f32 1.442695, %v1273_v49 }
 0x250   : > { %v4229_v34 = vpop.eup %3455  ;;  %v1306_v19 = vsel %vm764_vm5, %v4227_v36, 0.0  ;;  %3467 = vpow2.f32 %v1288_v17 }
 0x251   : > { %v4235_v47 = vpop.eup %3457  ;;  %v1307_v39 = vsel %vm764_vm5, %v4229_v34, 0.0  ;;  %3469 = vpow2.f32 %v1290_v27 }
 0x252   : > { %v4239_v42 = vpop.eup %3459  ;;  %v1308_v30 = vadd.f32 %v1307_v39, %v1306_v19  ;;  %v1309_v44 = vsel %vm764_vm5, %v4235_v47, 0.0  ;;  %3471 = vpow2.f32 %v1292_v53 }
 0x253   : > { %v4245_v43 = vpop.eup %3461  ;;  %v1311_v56 = vsel %vm764_vm5, %v4239_v42, 0.0  ;;  %3473 = vpow2.f32 %v1294_v59 }
 0x254   : > { %v1310_v54 = vadd.f32 %v1309_v44, %v1308_v30  ;;  %v4251_v58 = vpop.eup %3463  ;;  %v1313_v0 = vsel %vm764_vm5, %v4245_v43, 0.0  ;;  %3475 = vpow2.f32 %v1296_v28 }
 0x255   : > { %v4257_v51 = vpop.eup %3465  ;;  %v1315_v40 = vsel %vm764_vm5, %v4251_v58, 0.0  ;;  %3477 = vpow2.f32 %v1298_v3 }
 0x256   : > { %v1312_v61 = vadd.f32 %v1311_v56, %v1310_v54  ;;  %v4263_v52 = vpop.eup %3467  ;;  %v1317_v15 = vsel %vm764_vm5, %v4257_v51, 0.0  ;;  %3479 = vpow2.f32 %v1300_v10 }
 0x257   : > { %v4269_v6 = vpop.eup %3469  ;;  %v1319_v20 = vsel %vm764_vm5, %v4263_v52, 0.0  ;;  %3481 = vpow2.f32 %v1302_v55 }
 0x258   : > { %v1314_v32 = vadd.f32 %v1313_v0, %v1312_v61  ;;  %v4275_v14 = vpop.eup %3471  ;;  %v1321_v29 = vsel %vm764_vm5, %v4269_v6, 0.0  ;;  %3483 = vpow2.f32 %v1304_v8  ;;  %v893_v0 = vadd.f32 %v892_v50, %v4027_v60 }
 0x259   : > { %v4279_v18 = vpop.eup %3473  ;;  %v1323_v16 = vsel %vm764_vm5, %v4275_v14, 0.0 }
 0x25a   : > { %v1316_v4 = vadd.f32 %v1315_v40, %v1314_v32  ;;  %v4283_v13 = vpop.eup %3475  ;;  %v1325_v19 = vsel %vm764_vm5, %v4279_v18, 0.0  ;;  %v894_v62 = vrot.slane %v893_v0, 2 }
 0x25b   : > { %v4287_v39 = vpop.eup %3477  ;;  %v1327_v27 = vsel %vm764_vm5, %v4283_v13, 0.0 }
 0x25c   : > { %v1318_v11 = vadd.f32 %v1317_v15, %v1316_v4  ;;  %v4291_v30 = vpop.eup %3479  ;;  %v1329_v53 = vsel %vm764_vm5, %v4287_v39, 0.0  ;;  %v895_v15 = vadd.f32 %v894_v62, %v893_v0 }
 0x25d   : > { %v4296_v54 = vpop.eup %3481  ;;  %v1331_v48 = vsel %vm764_vm5, %v4291_v30, 0.0 }
 0x25e   : > { %v1320_v41 = vadd.f32 %v1319_v20, %v1318_v11  ;;  %v4300_v59 = vpop.eup %3483  ;;  %v1333_v45 = vsel %vm764_vm5, %v4296_v54, 0.0  ;;  %v896_v11 = vrot.slane %v895_v15, 1 }
 0x25f   : > { %v1335_v32 = vsel %vm764_vm5, %v4300_v59, 0.0 }
 0x260   : > { %v1322_v25 = vadd.f32 %v1321_v29, %v1320_v41  ;;  %v897_v41 = vadd.f32 %v896_v11, %v895_v15 }
 0x262   : > { %v1324_v17 = vadd.f32 %v1323_v16, %v1322_v25  ;;  %v899_v60 = vmax.f32 %v897_v41, 1.0  ;;  %vm898_vm10 = vcmp.gt.f32.partialorder %v897_v41, 0.0 }
 0x264   : > { %v1326_v21 = vadd.f32 %v1325_v19, %v1324_v17 }
 0x266   : > { %v1328_v44 = vadd.f32 %v1327_v27, %v1326_v21 }
 0x268   : > { %v1330_v56 = vadd.f32 %v1329_v53, %v1328_v44 }
 0x26a   : > { %v1332_v61 = vadd.f32 %v1331_v48, %v1330_v56 }
 0x26c   : > { %v1334_v28 = vadd.f32 %v1333_v45, %v1332_v61 }
 0x26e   : > { %v1336_v40 = vadd.f32 %v1335_v32, %v1334_v28 }
 0x270   : > { %v1337_v3 = vrot.slane %v1336_v40, 4 }
 0x272   : > { %v1338_v4 = vadd.f32 %v1337_v3, %v1336_v40 }
 0x274   : > { %v1339_v49 = vrot.slane %v1338_v4, 2 }
 0x276   : > { %v1340_v10 = vadd.f32 %v1339_v49, %v1338_v4 }
 0x278   : > { %v1341_v20 = vrot.slane %v1340_v10, 1 }
 0x27a   : > { %v1342_v55 = vadd.f32 %v1341_v20, %v1340_v10 }
 0x27c   : > { %v1343_v29 = vadd.f32 1e-16, %v1342_v55 }
 0x27e   : > { %3485 = vrcp.f32 %v1343_v29  ;;  %v1355_v17 = vand.u32 2147483648, %v1343_v29  ;;  %v1353_v27 = vand.u32 2147483647, %v1343_v29  ;;  %vm1349_vm12 = vweird.f32 %v1343_v29 }
 0x27f   : > { %3487 = vrcp.f32 %v899_v60 }
 0x280   : > { %v1356_v53 = vor.u32 1.1754944e-38, %v1355_v17  ;;  %vm1354_vm14 = vcmp.eq.f32.partialorder %v1353_v27, 8.507059e+37 }
 0x284   : > { %v3486_v8 = vpop.eup %3485 }
 0x285   : > { %v1345_v25 = vmul.f32 %v3486_v8, %v1343_v29  ;;  %v3488_v19 = vpop.eup %3487  ;;  %vm1350_vm11 = vweird.f32 %v3486_v8 }
 0x286   : > { %v4307_v50 = vsel %vm898_vm10, %v3488_v19, 0.0  ;;  %vm1351_vm13 = vmor %vm1349_vm12, %vm1350_vm11 }
 0x287   : > { %v1346_v16 = vsub.f32 1.0, %v1345_v25 }
 0x289   : > { %v1347_v21 = vmul.f32 %v3486_v8, %v1346_v16 }
 0x28b   : > { %v1348_v44 = vadd.f32 %v3486_v8, %v1347_v21 }
 0x28d   : > { %v1352_v56 = vsel %vm1351_vm13, %v3486_v8, %v1348_v44 }
 0x28e   : > { %v1357_v48 = vsel %vm1354_vm14, %v1356_v53, %v1352_v56 }
 0x28f   : > { %v1358_v61 = vmul.f32 %v1357_v48, %v4307_v50  ;;  %v4311_v0 = vmul.f32 %v4227_v36, %v1357_v48  ;;  %v4314_v45 = vmul.f32 %v4229_v34, %v1357_v48  ;;  %v4317_v28 = vmul.f32 %v4235_v47, %v1357_v48 }
 0x290   : > { %v4320_v32 = vmul.f32 %v4239_v42, %v1357_v48  ;;  %v4323_v40 = vmul.f32 %v4245_v43, %v1357_v48  ;;  %v4326_v62 = vmul.f32 %v4251_v58, %v1357_v48  ;;  %v4329_v3 = vmul.f32 %v4257_v51, %v1357_v48 }
 0x291   : > { %v1359_v4 = vmul.f32 %v4227_v36, %v1358_v61  ;;  %v1360_v15 = vmul.f32 %v4229_v34, %v1358_v61  ;;  %v1361_v49 = vmul.f32 %v4235_v47, %v1358_v61  ;;  %v1362_v10 = vmul.f32 %v4239_v42, %v1358_v61 }
 0x292   : > { %v1363_v11 = vmul.f32 %v4245_v43, %v1358_v61  ;;  %v1364_v20 = vmul.f32 %v4251_v58, %v1358_v61  ;;  %v1365_v55 = vmul.f32 %v4257_v51, %v1358_v61  ;;  %v1366_v41 = vmul.f32 %v4263_v52, %v1358_v61 }
 0x293   : > { %v1375_v29 = vpack.c.bf16 %v1360_v15, %v1359_v4  ;;  %v1376_v60 = vpack.c.bf16 %v1362_v10, %v1361_v49  ;;  %v1367_v8 = vmul.f32 %v4269_v6, %v1358_v61  ;;  %v1368_v36 = vmul.f32 %v4275_v14, %v1358_v61 }
 0x294   : > { %v1377_v25 = vpack.c.bf16 %v1364_v20, %v1363_v11  ;;  %v1378_v34 = vpack.c.bf16 %v1366_v41, %v1365_v55  ;;  %v1369_v47 = vmul.f32 %v4279_v18, %v1358_v61  ;;  %v1370_v42 = vmul.f32 %v4283_v13, %v1358_v61 }
 0x295   : > { %1415 = vxpose.xlu1.c.b16.start [1/8] (narrow) %v1375_v29, 64  ;;  %v1379_v43 = vpack.c.bf16 %v1368_v36, %v1367_v8  ;;  %v1371_v58 = vmul.f32 %v4287_v39, %v1358_v61  ;;  %v1372_v51 = vmul.f32 %v4291_v30, %v1358_v61  ;;  %v1373_v16 = vmul.f32 %v4296_v54, %v1358_v61 }
 0x296   : > { %v1380_v17 = vpack.c.bf16 %v1370_v42, %v1369_v47  ;;  %v1374_v19 = vmul.f32 %v4300_v59, %v1358_v61  ;;  %v1399_v21 = vpack.c.bf16 %v4314_v45, %v4311_v0  ;;  %v1400_v27 = vpack.c.bf16 %v4320_v32, %v4317_v28 }
 0x297   : > { %v1381_v44 = vpack.c.bf16 %v1372_v51, %v1371_v58  ;;  %v1401_v53 = vpack.c.bf16 %v4326_v62, %v4323_v40  ;;  %v1390_v56 = vmul.f32 %v4263_v52, %v1357_v48  ;;  %v1391_v4 = vmul.f32 %v4269_v6, %v1357_v48  ;;  %v3353_v58 = vld [vmem:[%s5177_s6 + $0x14] sm:$0xff]  ;;  %v767_v51 = vpop.xlane.xlu2 %766 }
 0x298   : > { %v1382_v15 = vpack.c.bf16 %v1374_v19, %v1373_v16  ;;  %v1392_v49 = vmul.f32 %v4275_v14, %v1357_v48  ;;  %v1393_v10 = vmul.f32 %v4279_v18, %v1357_v48  ;;  %v1394_v61 = vmul.f32 %v4283_v13, %v1357_v48 }
 0x299   : > { %v1402_v0 = vpack.c.bf16 %v1390_v56, %v4329_v3  ;;  %v1395_v45 = vmul.f32 %v4287_v39, %v1357_v48  ;;  %v1396_v28 = vmul.f32 %v4291_v30, %v1357_v48  ;;  %v1397_v32 = vmul.f32 %v4296_v54, %v1357_v48 }
 0x29a   : > { %v1403_v40 = vpack.c.bf16 %v1392_v49, %v1391_v4  ;;  %v1404_v62 = vpack.c.bf16 %v1394_v61, %v1393_v10  ;;  %v1398_v52 = vmul.f32 %v4300_v59, %v1357_v48  ;;  %v829_v16 = vmax.f32 %v767_v51, 1.0 }
 0x29b   : > { %v1405_v6 = vpack.c.bf16 %v1396_v28, %v1395_v45  ;;  %vm813_vm15 = vcmp.gt.f32.partialorder %v767_v51, 0.0 }
 0x29c   : > { %v1406_v11 = vpack.c.bf16 %v1398_v52, %v1397_v32  ;;  %3489 = vrcp.f32 %v829_v16 }
 0x2a5   : > { %1416 = vxpose.xlu1.c.b16.cont [2/8] (narrow) %v1376_v60, 64 }
 0x2b5   : > { %1417 = vxpose.xlu1.c.b16.cont [3/8] (narrow) %v1377_v25, 64  ;;  %v3257_v25 = vld [vmem:[%s5177_s6 + $0x24] sm:$0x3] }
 0x2c5   : > { %1418 = vxpose.xlu1.c.b16.cont [4/8] (narrow) %v1378_v34, 64  ;;  %v1596_v34 = vunpack.c.l.b16 %v3257_v25 }
 0x2c7   : > { %v1599_v47 = vpack.c.b16 %v1596_v34, %v1596_v34 }
 0x2c9   : > { %v1627_v42 = vand.u32 %v1599_v47, %v3838_v22 }
 0x2cb   : > { %1634 = vmatpush.bf16.msrb.mxu3 %v1627_v42 }
 0x2d5   : > { %1419 = vxpose.xlu1.c.b16.cont [5/8] (narrow) %v1379_v43, 64  ;;  %v3354_v43 = vld [vmem:[%s5177_s6 + $0x1c] sm:$0xff] }
 0x2d6   : > { %1635 = vmatpush.bf16.msrb.mxu3 %v3354_v43 }
 0x2da   : > { %1636 = vmatpush.bf16.msrb.mxu3 %v3353_v58 }
 0x2e5   : > { %1420 = vxpose.xlu1.c.b16.cont [6/8] (narrow) %v1380_v17, 64  ;;  %v770_v17 = vpop.xlane.xlu0 %769 }
 0x2e6   : > { %v830_v19 = vmax.f32 %v770_v17, 1.0  ;;  %vm814_vm0 = vcmp.gt.f32.partialorder %v770_v17, 0.0 }
 0x2e8   : > { %3491 = vrcp.f32 %v830_v19 }
 0x2f5   : > { %1421 = vxpose.xlu1.c.b16.cont [7/8] (narrow) %v1381_v44, 64  ;;  %v3490_v44 = vpop.eup %3489 }
 0x2f6   : > { %v3492_v56 = vpop.eup %3491 }
 0x2f7   : > { %v4389_v49 = vsel %vm814_vm0, %v3492_v56, 0.0 }
 0x305   : > { %1422 = vxpose.xlu1.c.b16.end [8/8] (narrow) %v1382_v15, 64  ;;  %v4387_v15 = vld [vmem:[%s5179_s8] ss:$0 sm:$0xff] }
 0x341   : > { %v1423_v14 = vpop.trf.xlu1 }
 0x342   : > { %1439 = vmatmul.bf16.vlgmr.msrb.gmra.mxu0 %v1423_v14 }
 0x351   : > { %v1424_v18 = vpop.trf.xlu1 }
 0x352   : > { %1444 = vmatmul.bf16.vlgmr.msra.gmra.mxu2 %v1424_v18 }
 0x361   : > { %v1425_v13 = vpop.trf.xlu1 }
 0x362   : > { %1449 = vmatmul.bf16.gmra.mxu2 %v1425_v13 }
 0x371   : > { %v1426_v39 = vpop.trf.xlu1 }
 0x372   : > { %1454 = vmatmul.bf16.vlgmr.msra.gmra.mxu3 %v1426_v39 }
 0x3bf   : > { %v1440_v3 = vpop.f32.mrf.mxu0 }
 0x3c7   : > { %v1442_v8 = vpop.f32.mrf.mxu0 }
 0x3c8   : > { %v1460_v36 = vpack.c.bf16 %v1442_v8, %v1440_v3 }
 0x3d5   : > { %v1445_v30 = vpop.f32.mrf.mxu2 }
 0x3dd   : > { %v1447_v54 = vpop.f32.mrf.mxu2 }
 0x3de   : > { %v1461_v60 = vpack.c.bf16 %v1447_v54, %v1445_v30 }
 0x3e5   : > { %v1450_v59 = vpop.f32.mrf.mxu2 }
 0x3ed   : > { %v1452_v41 = vpop.f32.mrf.mxu2 }
 0x3ee   : > { %v1462_v29 = vpack.c.bf16 %v1452_v41, %v1450_v59 }
 0x3f5   : > { %v1455_v48 = vpop.f32.mrf.mxu3 }
 0x3fd   : > { %v1457_v20 = vpop.f32.mrf.mxu3 }
 0x3fe   : > { %v1463_v55 = vpack.c.bf16 %v1457_v20, %v1455_v48 }
 0x400   : > { %1492 = vmatpush.bf16.msrb.mxu1 %v1463_v55 }
 0x404   : > { %1493 = vmatpush.bf16.msrb.mxu1 %v1462_v29 }
 0x408   : > { %1494 = vmatpush.bf16.msrb.mxu1 %v1461_v60 }
 0x40c   : > { %1495 = vmatpush.bf16.msrb.mxu1 %v1460_v36 }
 0x40f   : > { %3245 = vmatmul.msk.bf16.vlgmr.msrb.gmra.mxu1 %vm764_vm5, %v1399_v21  ;;  %v773_v21 = vpop.xlane.xlu2 %772 }
 0x410   : > { %vm815_vm1 = vcmp.gt.f32.partialorder %v773_v21, 0.0 }
 0x417   : > { %v776_v10 = vpop.xlane.xlu2 %775 }
 0x418   : > { %v832_v32 = vmax.f32 %v776_v10, 1.0  ;;  %vm816_vm2 = vcmp.gt.f32.partialorder %v776_v10, 0.0 }
 0x41f   : > { %3246 = vmatmul.msk.bf16.gmra.mxu1 %vm764_vm5, %v1400_v27  ;;  %v782_v54 = vpop.xlane.xlu2 %781 }
 0x420   : > { %v834_v20 = vmax.f32 %v782_v54, 1.0  ;;  %vm818_vm6 = vcmp.gt.f32.partialorder %v782_v54, 0.0 }
 0x427   : > { %v788_v43 = vpop.xlane.xlu2 %787 }
 0x428   : > { %v836_v17 = vmax.f32 %v788_v43, 1.0  ;;  %vm820_vm8 = vcmp.gt.f32.partialorder %v788_v43, 0.0 }
 0x42f   : > { %3247 = vmatmul.msk.bf16.gmra.mxu1 %vm764_vm5, %v1401_v53  ;;  %v4381_v53 = vsel %vm813_vm15, %v3490_v44, 0.0 }
 0x43f   : > { %3248 = vmatmul.msk.bf16.gmra.mxu1 %vm764_vm5, %v1402_v0  ;;  %v831_v0 = vmax.f32 %v773_v21, 1.0 }
 0x441   : > { %3493 = vrcp.f32 %v831_v0 }
 0x442   : > { %3495 = vrcp.f32 %v832_v32 }
 0x44f   : > { %3249 = vmatmul.msk.bf16.gmra.mxu1 %vm764_vm5, %v1403_v40 }
 0x45f   : > { %3250 = vmatmul.msk.bf16.gmra.mxu1 %vm764_vm5, %v1404_v62 }
 0x46f   : > { %3251 = vmatmul.msk.bf16.gmra.mxu1 %vm764_vm5, %v1405_v6  ;;  %v3494_v6 = vpop.eup %3493 }
 0x470   : > { %v3496_v14 = vpop.eup %3495  ;;  %v4395_v18 = vsel %vm815_vm1, %v3494_v6, 0.0 }
 0x471   : > { %v4398_v30 = vsel %vm816_vm2, %v3496_v14, 0.0 }
 0x47f   : > { %3252 = vmatmul.msk.bf16.gmra.mxu1 %vm764_vm5, %v1406_v11  ;;  %v779_v11 = vpop.xlane.xlu0 %778 }
 0x480   : > { %v833_v39 = vmax.f32 %v779_v11, 1.0  ;;  %vm817_vm3 = vcmp.gt.f32.partialorder %v779_v11, 0.0 }
 0x482   : > { %3497 = vrcp.f32 %v833_v39 }
 0x483   : > { %3499 = vrcp.f32 %v834_v20 }
 0x487   : > { %v785_v36 = vpop.xlane.xlu0 %784 }
 0x488   : > { %v3498_v60 = vpop.eup %3497  ;;  %v835_v47 = vmax.f32 %v785_v36, 1.0  ;;  %vm819_vm7 = vcmp.gt.f32.partialorder %v785_v36, 0.0 }
 0x489   : > { %v4404_v8 = vsel %vm817_vm3, %v3498_v60, 0.0  ;;  %v3500_v25 = vpop.eup %3499 }
 0x48a   : > { %v4407_v42 = vsel %vm818_vm6, %v3500_v25, 0.0  ;;  %3501 = vrcp.f32 %v835_v47 }
 0x48b   : > { %3503 = vrcp.f32 %v836_v17 }
 0x48c   : > { %v1497_v27 = vpop.f32.mrf.mxu1 }
 0x48d   : > { %v1537_v4 = vmul.f32 %v1497_v27, %v4381_v53 }
 0x48f   : > { %v1557_v28 = vadd.f32 %v4387_v15, %v1537_v4  ;;  %v791_v4 = vpop.xlane.xlu0 %790 }
 0x490   : > { %v3502_v44 = vpop.eup %3501  ;;  %v837_v0 = vmax.f32 %v791_v4, 1.0  ;;  %vm821_vm9 = vcmp.gt.f32.partialorder %v791_v4, 0.0 }
 0x491   : > { %v4413_v56 = vsel %vm819_vm7, %v3502_v44, 0.0  ;;  %v3504_v10 = vpop.eup %3503 }
 0x492   : > { %3505 = vrcp.f32 %v837_v0 }
 0x494   : > { %v1499_v61 = vpop.f32.mrf.mxu1 }
 0x495   : > { %v1538_v45 = vmul.f32 %v1499_v61, %v4389_v49 }
 0x497   : > { %v1558_v40 = vadd.f32 %v4387_v15, %v1538_v45  ;;  %v4416_v45 = vsel %vm820_vm8, %v3504_v10, 0.0  ;;  %v797_v54 = vpop.xlane.xlu0 %796 }
 0x498   : > { %vm823_vm11 = vcmp.gt.f32.partialorder %v797_v54, 0.0 }
 0x499   : > { %v1573_v62 = vpack.c.bf16 %v1558_v40, %v1557_v28  ;;  %v794_v28 = vpop.xlane.xlu2 %793 }
 0x49a   : > { %vm822_vm10 = vcmp.gt.f32.partialorder %v794_v28, 0.0 }
 0x49b   : > { %3266 = vmatmul.msk.bf16.vlgmr.msrb.gmra.mxu3 %vm923_vm4, %v1573_v62 }
 0x49c   : > { %v1502_v52 = vpop.f32.mrf.mxu1 }
 0x49d   : > { %v1539_v13 = vmul.f32 %v1502_v52, %v4395_v18  ;;  %v838_v52 = vmax.f32 %v794_v28, 1.0 }
 0x49f   : > { %v1559_v3 = vadd.f32 %v4387_v15, %v1539_v13  ;;  %3507 = vrcp.f32 %v838_v52  ;;  %v3506_v13 = vpop.eup %3505 }
 0x4a0   : > { %v4422_v39 = vsel %vm821_vm9, %v3506_v13, 0.0 }
 0x4a1   : > { %v800_v20 = vpop.xlane.xlu2 %799 }
 0x4a2   : > { %v840_v36 = vmax.f32 %v800_v20, 1.0  ;;  %vm824_vm12 = vcmp.gt.f32.partialorder %v800_v20, 0.0 }
 0x4a4   : > { %v1504_v59 = vpop.f32.mrf.mxu1 }
 0x4a5   : > { %v1540_v48 = vmul.f32 %v1504_v59, %v4398_v30  ;;  %v3508_v59 = vpop.eup %3507 }
 0x4a7   : > { %v1560_v55 = vadd.f32 %v4387_v15, %v1540_v48 }
 0x4a9   : > { %v1574_v41 = vpack.c.bf16 %v1560_v55, %v1559_v3  ;;  %v839_v3 = vmax.f32 %v797_v54, 1.0  ;;  %v4425_v55 = vsel %vm822_vm10, %v3508_v59, 0.0 }
 0x4ab   : > { %3267 = vmatmul.msk.bf16.gmra.mxu3 %vm923_vm4, %v1574_v41  ;;  %3509 = vrcp.f32 %v839_v3 }
 0x4ac   : > { %v1507_v29 = vpop.f32.mrf.mxu1  ;;  %3511 = vrcp.f32 %v840_v36 }
 0x4ad   : > { %v1541_v34 = vmul.f32 %v1507_v29, %v4404_v8 }
 0x4af   : > { %v1561_v16 = vadd.f32 %v4387_v15, %v1541_v34 }
 0x4b1   : > { %v3510_v43 = vpop.eup %3509 }
 0x4b4   : > { %v1509_v58 = vpop.f32.mrf.mxu1 }
 0x4b5   : > { %v1542_v51 = vmul.f32 %v1509_v58, %v4407_v42  ;;  %v4431_v58 = vsel %vm823_vm11, %v3510_v43, 0.0 }
 0x4b7   : > { %v1562_v19 = vadd.f32 %v4387_v15, %v1542_v51  ;;  %v803_v51 = vpop.xlane.xlu0 %802 }
 0x4b8   : > { %vm825_vm13 = vcmp.gt.f32.partialorder %v803_v51, 0.0 }
 0x4b9   : > { %v1575_v21 = vpack.c.bf16 %v1562_v19, %v1561_v16  ;;  %v3512_v16 = vpop.eup %3511  ;;  %v841_v19 = vmax.f32 %v803_v51, 1.0 }
 0x4bb   : > { %3268 = vmatmul.msk.bf16.gmra.mxu3 %vm923_vm4, %v1575_v21  ;;  %v806_v21 = vpop.xlane.xlu2 %805  ;;  %3513 = vrcp.f32 %v841_v19 }
 0x4bc   : > { %v1512_v27 = vpop.f32.mrf.mxu1  ;;  %vm826_vm14 = vcmp.gt.f32.partialorder %v806_v21, 0.0 }
 0x4bd   : > { %v1543_v61 = vmul.f32 %v1512_v27, %v4413_v56  ;;  %v4434_v27 = vsel %vm824_vm12, %v3512_v16, 0.0 }
 0x4bf   : > { %v1563_v62 = vadd.f32 %v4387_v15, %v1543_v61  ;;  %v842_v61 = vmax.f32 %v806_v21, 1.0  ;;  %v809_v52 = vpop.xlane.xlu0 %808 }
 0x4c0   : > { %vm827_vm15 = vcmp.gt.f32.partialorder %v809_v52, 0.0 }
 0x4c1   : > { %3515 = vrcp.f32 %v842_v61 }
 0x4c3   : > { %v812_v13 = vpop.xlane.xlu2 %811 }
 0x4c4   : > { %v1514_v32 = vpop.f32.mrf.mxu1  ;;  %v844_v20 = vmax.f32 %v812_v13, 1.0  ;;  %vm828_vm0 = vcmp.gt.f32.partialorder %v812_v13, 0.0 }
 0x4c5   : > { %v1544_v40 = vmul.f32 %v1514_v32, %v4416_v45 }
 0x4c7   : > { %v1564_v6 = vadd.f32 %v4387_v15, %v1544_v40  ;;  %v3514_v40 = vpop.eup %3513 }
 0x4c9   : > { %v1576_v11 = vpack.c.bf16 %v1564_v6, %v1563_v62  ;;  %v4440_v62 = vsel %vm825_vm13, %v3514_v40, 0.0  ;;  %v3516_v6 = vpop.eup %3515 }
 0x4ca   : > { %v4443_v54 = vsel %vm826_vm14, %v3516_v6, 0.0 }
 0x4cb   : > { %3269 = vmatmul.msk.bf16.gmra.mxu3 %vm923_vm4, %v1576_v11 }
 0x4cc   : > { %v1517_v14 = vpop.f32.mrf.mxu1 }
 0x4cd   : > { %v1545_v48 = vmul.f32 %v1517_v14, %v4422_v39  ;;  %v843_v14 = vmax.f32 %v809_v52, 1.0 }
 0x4cf   : > { %v1565_v60 = vadd.f32 %v4387_v15, %v1545_v48  ;;  %3517 = vrcp.f32 %v843_v14 }
 0x4d0   : > { %3519 = vrcp.f32 %v844_v20 }
 0x4d4   : > { %v1519_v41 = vpop.f32.mrf.mxu1 }
 0x4d5   : > { %v1546_v29 = vmul.f32 %v1519_v41, %v4425_v55  ;;  %v3518_v36 = vpop.eup %3517 }
 0x4d7   : > { %v1566_v25 = vadd.f32 %v4387_v15, %v1546_v29 }
 0x4d9   : > { %v1577_v34 = vpack.c.bf16 %v1566_v25, %v1565_v60  ;;  %v4449_v25 = vsel %vm827_vm15, %v3518_v36, 0.0 }
 0x4db   : > { %3270 = vmatmul.msk.bf16.gmra.mxu3 %vm923_vm4, %v1577_v34  ;;  %v3520_v34 = vpop.eup %3519 }
 0x4dc   : > { %v1522_v47 = vpop.f32.mrf.mxu1  ;;  %v4452_v43 = vsel %vm828_vm0, %v3520_v34, 0.0 }
 0x4dd   : > { %v1547_v17 = vmul.f32 %v1522_v47, %v4431_v58 }
 0x4df   : > { %v1567_v10 = vadd.f32 %v4387_v15, %v1547_v17 }
 0x4e4   : > { %v1524_v44 = vpop.f32.mrf.mxu1 }
 0x4e5   : > { %v1548_v4 = vmul.f32 %v1524_v44, %v4434_v27 }
 0x4e7   : > { %v1568_v0 = vadd.f32 %v4387_v15, %v1548_v4 }
 0x4e9   : > { %v1578_v28 = vpack.c.bf16 %v1568_v0, %v1567_v10 }
 0x4eb   : > { %3271 = vmatmul.msk.bf16.gmra.mxu3 %vm923_vm4, %v1578_v28 }
 0x4ec   : > { %v1527_v32 = vpop.f32.mrf.mxu1 }
 0x4ed   : > { %v1549_v11 = vmul.f32 %v1527_v32, %v4440_v62 }
 0x4ef   : > { %v1569_v3 = vadd.f32 %v4387_v15, %v1549_v11 }
 0x4f4   : > { %v1529_v59 = vpop.f32.mrf.mxu1 }
 0x4f5   : > { %v1550_v48 = vmul.f32 %v1529_v59, %v4443_v54 }
 0x4f7   : > { %v1570_v41 = vadd.f32 %v4387_v15, %v1550_v48 }
 0x4f9   : > { %v1579_v29 = vpack.c.bf16 %v1570_v41, %v1569_v3 }
 0x4fb   : > { %3272 = vmatmul.msk.bf16.gmra.mxu3 %vm923_vm4, %v1579_v29 }
 0x4fc   : > { %v1532_v60 = vpop.f32.mrf.mxu1 }
 0x4fd   : > { %v1551_v47 = vmul.f32 %v1532_v60, %v4449_v25 }
 0x4ff   : > { %v1571_v17 = vadd.f32 %v4387_v15, %v1551_v47 }
 0x504   : > { %v1534_v51 = vpop.f32.mrf.mxu1 }
 0x505   : > { %v1552_v16 = vmul.f32 %v1534_v51, %v4452_v43 }
 0x507   : > { %v1572_v19 = vadd.f32 %v4387_v15, %v1552_v16 }
 0x509   : > { %v1580_v21 = vpack.c.bf16 %v1572_v19, %v1571_v17 }
 0x50b   : > { %3273 = vmatmul.msk.bf16.gmra.mxu3 %vm923_vm4, %v1580_v21 }
 0x51e   : > { %v1638_v44 = vpop.f32.mrf.mxu3 }
 0x51f   : > { %1680 = vperm.xlu0 %3442, %v1638_v44  }
 0x526   : > { %v1640_v4 = vpop.f32.mrf.mxu3 }
 0x527   : > { %1685 = vperm.xlu2 %3444, %v1640_v4   ;;  %v2025_v47 = vpack.c.bf16 %v1640_v4, %v1638_v44 }
 0x52e   : > { %v1643_v10 = vpop.f32.mrf.mxu3 }
 0x52f   : > { %1690 = vperm.xlu0 %3442, %v1643_v10  }
 0x536   : > { %v1645_v61 = vpop.f32.mrf.mxu3 }
 0x537   : > { %1695 = vperm.xlu0 %3442, %v1645_v61   ;;  %v2026_v34 = vpack.c.bf16 %v1645_v61, %v1643_v10 }
 0x53e   : > { %v1648_v0 = vpop.f32.mrf.mxu3 }
 0x53f   : > { %1700 = vperm.xlu2 %3444, %v1648_v0  }
 0x546   : > { %v1650_v28 = vpop.f32.mrf.mxu3 }
 0x547   : > { %1705 = vperm.xlu0 %3442, %v1650_v28   ;;  %v2027_v36 = vpack.c.bf16 %v1650_v28, %v1648_v0 }
 0x54e   : > { %v1653_v32 = vpop.f32.mrf.mxu3 }
 0x54f   : > { %1710 = vperm.xlu2 %3444, %v1653_v32  }
 0x556   : > { %v1655_v40 = vpop.f32.mrf.mxu3 }
 0x557   : > { %1715 = vperm.xlu0 %3442, %v1655_v40   ;;  %v2028_v60 = vpack.c.bf16 %v1655_v40, %v1653_v32 }
 0x55e   : > { %v1658_v15 = vpop.f32.mrf.mxu3 }
 0x55f   : > { %1720 = vperm.xlu2 %3444, %v1658_v15  }
 0x566   : > { %v1660_v52 = vpop.f32.mrf.mxu3 }
 0x567   : > { %1725 = vperm.xlu0 %3442, %v1660_v52   ;;  %v2029_v29 = vpack.c.bf16 %v1660_v52, %v1658_v15 }
 0x56e   : > { %v1663_v6 = vpop.f32.mrf.mxu3 }
 0x56f   : > { %1730 = vperm.xlu2 %3444, %v1663_v6  }
 0x576   : > { %v1665_v11 = vpop.f32.mrf.mxu3 }
 0x577   : > { %1735 = vperm.xlu0 %3442, %v1665_v11   ;;  %v2030_v41 = vpack.c.bf16 %v1665_v11, %v1663_v6  ;;  %v4459_v6 = vperm.slane %v3917_v26, 1 }
 0x57e   : > { %v1668_v14 = vpop.f32.mrf.mxu3 }
 0x57f   : > { %1740 = vperm.xlu2 %3444, %v1668_v14  }
 0x581   : > { %v1686_v16 = vpop.permute.xlu2 %1685 }
 0x582   : > { %v1760_v32 = vadd.f32 %v4459_v6, %v1686_v16 }
 0x584   : > { %v1792_v28 = vmul.f32 0.2, %v1760_v32  ;;  %vm1776_vm1 = vcmp.gt.f32.partialorder %v1760_v32, 0.0 }
 0x586   : > { %v1670_v13 = vpop.f32.mrf.mxu3  ;;  %v1808_v61 = vsel %vm1776_vm1, %v1760_v32, %v1792_v28 }
 0x587   : > { %1745 = vperm.xlu1 %3443, %v1670_v13   ;;  %v2031_v20 = vpack.c.bf16 %v1670_v13, %v1668_v14 }
 0x58e   : > { %v1673_v59 = vpop.f32.mrf.mxu3 }
 0x58f   : > { %1750 = vperm.xlu0 %3442, %v1673_v59  }
 0x591   : > { %v1681_v51 = vpop.permute.xlu0 %1680 }
 0x592   : > { %v1759_v44 = vadd.f32 %v4459_v6, %v1681_v51 }
 0x594   : > { %v1791_v52 = vmul.f32 0.2, %v1759_v44  ;;  %vm1775_vm2 = vcmp.gt.f32.partialorder %v1759_v44, 0.0 }
 0x596   : > { %v1675_v48 = vpop.f32.mrf.mxu3 }
 0x597   : > { %v2032_v3 = vpack.c.bf16 %v1675_v48, %v1673_v59  ;;  %1755 = vperm.xlu2 %3444, %v1675_v48  }
 0x599   : > { %2049 = vmatpush.bf16.msra.mxu2 %v2032_v3  ;;  %v1701_v19 = vpop.permute.xlu2 %1700  ;;  %v4466_v3 = vadd.f32 %v1808_v61, %v4044_v33 }
 0x59a   : > { %v1763_v4 = vadd.f32 %v4459_v6, %v1701_v19 }
 0x59c   : > { %v1795_v48 = vmul.f32 0.2, %v1763_v4  ;;  %vm1779_vm3 = vcmp.gt.f32.partialorder %v1763_v4, 0.0 }
 0x59d   : > { %2050 = vmatpush.bf16.msra.mxu2 %v2031_v20 }
 0x5a1   : > { %2051 = vmatpush.bf16.msra.mxu2 %v2030_v41  ;;  %v1691_v17 = vpop.permute.xlu0 %1690 }
 0x5a2   : > { %v1761_v40 = vadd.f32 %v4459_v6, %v1691_v17 }
 0x5a4   : > { %v1793_v20 = vmul.f32 0.2, %v1761_v40  ;;  %vm1777_vm6 = vcmp.gt.f32.partialorder %v1761_v40, 0.0 }
 0x5a5   : > { %2052 = vmatpush.bf16.msra.mxu2 %v2029_v29  ;;  %v1807_v29 = vsel %vm1775_vm2, %v1759_v44, %v1791_v52 }
 0x5a6   : > { %v4477_v17 = vadd.f32 %v1807_v29, %v4041_v46  ;;  %v1809_v19 = vsel %vm1777_vm6, %v1761_v40, %v1793_v20 }
 0x5a7   : > { %v4487_v52 = vadd.f32 %v1809_v19, %v4060_v24 }
 0x5a9   : > { %2053 = vmatpush.bf16.msra.mxu2 %v2028_v60  ;;  %v1696_v21 = vpop.permute.xlu0 %1695  ;;  %v1711_v59 = vpop.permute.xlu2 %1710 }
 0x5aa   : > { %v1762_v41 = vadd.f32 %v4459_v6, %v1696_v21  ;;  %v1765_v60 = vadd.f32 %v4459_v6, %v1711_v59 }
 0x5ac   : > { %v1794_v32 = vmul.f32 0.2, %v1762_v41  ;;  %vm1778_vm7 = vcmp.gt.f32.partialorder %v1762_v41, 0.0  ;;  %v1797_v59 = vmul.f32 0.2, %v1765_v60  ;;  %vm1781_vm8 = vcmp.gt.f32.partialorder %v1765_v60, 0.0 }
 0x5ad   : > { %2054 = vmatpush.bf16.msra.mxu2 %v2027_v36  ;;  %v1811_v36 = vsel %vm1779_vm3, %v1763_v4, %v1795_v48 }
 0x5ae   : > { %v4481_v28 = vadd.f32 %v1811_v36, %v4038_v9  ;;  %v1810_v48 = vsel %vm1778_vm7, %v1762_v41, %v1794_v32 }
 0x5b1   : > { %2055 = vmatpush.bf16.msra.mxu2 %v2026_v34 }
 0x5b5   : > { %2056 = vmatpush.bf16.msra.mxu2 %v2025_v47  ;;  %v4473_v47 = vsel %vm764_vm5, %v4466_v3, -inf }
 0x5b9   : > { %v1706_v14 = vpop.permute.xlu0 %1705  ;;  %v1721_v13 = vpop.permute.xlu2 %1720 }
 0x5ba   : > { %v1764_v34 = vadd.f32 %v4459_v6, %v1706_v14  ;;  %v1767_v14 = vadd.f32 %v4459_v6, %v1721_v13  ;;  %v1813_v13 = vsel %vm1781_vm8, %v1765_v60, %v1797_v59 }
 0x5bc   : > { %v1796_v4 = vmul.f32 0.2, %v1764_v34  ;;  %vm1780_vm9 = vcmp.gt.f32.partialorder %v1764_v34, 0.0  ;;  %vm1783_vm11 = vcmp.gt.f32.partialorder %v1767_v14, 0.0  ;;  %v1799_v36 = vmul.f32 0.2, %v1767_v14 }
 0x5be   : > { %v1815_v60 = vsel %vm1783_vm11, %v1767_v14, %v1799_v36  ;;  %v1826_v14 = vadd.f32 %v1810_v48, %v4077_v35  ;;  %v1841_v48 = vsel %vm764_vm5, %v4487_v52, -inf }
 0x5c9   : > { %v1716_v15 = vpop.permute.xlu0 %1715  ;;  %v1731_v0 = vpop.permute.xlu2 %1730 }
 0x5ca   : > { %v1766_v51 = vadd.f32 %v4459_v6, %v1716_v15  ;;  %v1769_v15 = vadd.f32 %v4459_v6, %v1731_v0  ;;  %v1812_v0 = vsel %vm1780_vm9, %v1764_v34, %v1796_v4  ;;  %v4497_v34 = vadd.f32 %v1813_v13, %v4105_v63 }
 0x5cb   : > { %v1839_v4 = vsel %vm764_vm5, %v4477_v17, -inf  ;;  %v4511_v13 = vadd.f32 %v1815_v60, %v4087_v38  ;;  %v1842_v60 = vsel %vm764_vm5, %v1826_v14, -inf }
 0x5cc   : > { %v1798_v40 = vmul.f32 0.2, %v1766_v51  ;;  %vm1782_vm10 = vcmp.gt.f32.partialorder %v1766_v51, 0.0  ;;  %v1801_v46 = vmul.f32 0.2, %v1769_v15  ;;  %vm1785_vm13 = vcmp.gt.f32.partialorder %v1769_v15, 0.0 }
 0x5ce   : > { %v1814_v24 = vsel %vm1782_vm10, %v1766_v51, %v1798_v40  ;;  %v1817_v59 = vsel %vm1785_vm13, %v1769_v15, %v1801_v46 }
 0x5cf   : > { %v4504_v40 = vadd.f32 %v1814_v24, %v4115_v1  ;;  %v4516_v36 = vadd.f32 %v1817_v59, %v4130_v5 }
 0x5d9   : > { %v1726_v10 = vpop.permute.xlu0 %1725  ;;  %v1741_v11 = vpop.permute.xlu2 %1740 }
 0x5da   : > { %v1768_v21 = vadd.f32 %v4459_v6, %v1726_v10  ;;  %v1771_v10 = vadd.f32 %v4459_v6, %v1741_v11 }
 0x5dc   : > { %v1800_v20 = vmul.f32 0.2, %v1768_v21  ;;  %vm1784_vm12 = vcmp.gt.f32.partialorder %v1768_v21, 0.0  ;;  %v1803_v33 = vmul.f32 0.2, %v1771_v10  ;;  %vm1787_vm0 = vcmp.gt.f32.partialorder %v1771_v10, 0.0 }
 0x5de   : > { %v1816_v11 = vsel %vm1784_vm12, %v1768_v21, %v1800_v20  ;;  %v1843_v21 = vsel %vm764_vm5, %v4481_v28, -inf  ;;  %v1819_v46 = vsel %vm1787_vm0, %v1771_v10, %v1803_v33  ;;  %v1847_v33 = vsel %vm764_vm5, %v4497_v34, -inf }
 0x5df   : > { %v4507_v20 = vadd.f32 %v1816_v11, %v4127_v7 }
 0x5e1   : > { %v1853_v11 = vsel %vm764_vm5, %v4507_v20, -inf }
 0x5e9   : > { %v1736_v16 = vpop.permute.xlu0 %1735 }
 0x5ea   : > { %v1770_v61 = vadd.f32 %v4459_v6, %v1736_v16 }
 0x5ec   : > { %v1802_v16 = vmul.f32 0.2, %v1770_v61  ;;  %vm1786_vm14 = vcmp.gt.f32.partialorder %v1770_v61, 0.0 }
 0x5f1   : > { %v1756_v44 = vpop.permute.xlu2 %1755 }
 0x5f2   : > { %v1774_v29 = vadd.f32 %v4459_v6, %v1756_v44  ;;  %v4493_v44 = vadd.f32 %v1812_v0, %v4063_v57 }
 0x5f4   : > { %v1806_v41 = vmul.f32 0.2, %v1774_v29  ;;  %vm1790_vm1 = vcmp.gt.f32.partialorder %v1774_v29, 0.0 }
 0x5f6   : > { %v1822_v15 = vsel %vm1790_vm1, %v1774_v29, %v1806_v41  ;;  %v1849_v29 = vsel %vm764_vm5, %v4504_v40, -inf  ;;  %v4534_v41 = vadd.f32 %v1819_v46, %v4155_v37  ;;  %v1848_v46 = vmax.f32 %v1841_v48, %v1847_v33 }
 0x5f9   : > { %v1746_v9 = vpop.permute.xlu1 %1745 }
 0x5fa   : > { %v1772_v19 = vadd.f32 %v4459_v6, %v1746_v9  ;;  %v1818_v9 = vsel %vm1786_vm14, %v1770_v61, %v1802_v16  ;;  %v1845_v61 = vsel %vm764_vm5, %v4493_v44, -inf }
 0x5fb   : > { %v4519_v0 = vadd.f32 %v1818_v9, %v4120_v2  ;;  %v1846_v59 = vmax.f32 %v4473_v47, %v1845_v61  ;;  %v1859_v47 = vsel %vm764_vm5, %v4534_v41, -inf }
 0x5fc   : > { %vm1788_vm15 = vcmp.gt.f32.partialorder %v1772_v19, 0.0  ;;  %v1804_v32 = vmul.f32 0.2, %v1772_v19 }
 0x5fe   : > { %v1820_v51 = vsel %vm1788_vm15, %v1772_v19, %v1804_v32  ;;  %v1844_v19 = vmax.f32 %v1839_v4, %v1843_v21  ;;  %v4537_v32 = vadd.f32 %v1822_v15, %v4186_v12  ;;  %v1857_v4 = vsel %vm764_vm5, %v4519_v0, -inf }
 0x5ff   : > { %v4522_v24 = vadd.f32 %v1820_v51, %v4139_v23  ;;  %v1855_v51 = vsel %vm764_vm5, %v4516_v36, -inf  ;;  %v1850_v15 = vmax.f32 %v1842_v60, %v1849_v29 }
 0x600   : > { %v1865_v61 = vsel %vm764_vm5, %v4537_v32, -inf  ;;  %v1856_v5 = vmax.f32 %v1848_v46, %v1855_v51 }
 0x601   : > { %v1751_v16 = vpop.permute.xlu0 %1750  ;;  %v1861_v21 = vsel %vm764_vm5, %v4522_v24, -inf  ;;  %v1858_v2 = vmax.f32 %v1850_v15, %v1857_v4 }
 0x602   : > { %v1773_v10 = vadd.f32 %v4459_v6, %v1751_v16  ;;  %v1851_v6 = vsel %vm764_vm5, %v4511_v13, -inf  ;;  %v1854_v16 = vmax.f32 %v1846_v59, %v1853_v11 }
 0x603   : > { %v1852_v37 = vmax.f32 %v1844_v19, %v1851_v6  ;;  %v1866_v33 = vmax.f32 %v1858_v2, %v1865_v61 }
 0x604   : > { %vm1789_vm2 = vcmp.gt.f32.partialorder %v1773_v10, 0.0  ;;  %v1805_v9 = vmul.f32 0.2, %v1773_v10  ;;  %v1862_v7 = vmax.f32 %v1854_v16, %v1861_v21 }
 0x605   : > { %v1860_v48 = vmax.f32 %v1852_v37, %v1859_v47 }
 0x606   : > { %v1821_v12 = vsel %vm1789_vm2, %v1773_v10, %v1805_v9 }
 0x607   : > { %v4554_v23 = vadd.f32 %v1821_v12, %v4152_v31  ;;  %v1867_v10 = vmax.f32 %v1860_v48, %v1862_v7 }
 0x609   : > { %v1863_v38 = vsel %vm764_vm5, %v4554_v23, -inf }
 0x60a   : > { %v1864_v29 = vmax.f32 %v1856_v5, %v1863_v38 }
 0x60c   : > { %v1868_v11 = vmax.f32 %v1864_v29, %v1866_v33 }
 0x60e   : > { %v1869_v60 = vmax.f32 %v1867_v10, %v1868_v11 }
 0x610   : > { %v1870_v59 = vrot.slane %v1869_v60, 4 }
 0x612   : > { %v1871_v9 = vmax.f32 %v1869_v60, %v1870_v59 }
 0x614   : > { %v1872_v63 = vrot.slane %v1871_v9, 2 }
 0x616   : > { %v1873_v1 = vmax.f32 %v1871_v9, %v1872_v63 }
 0x618   : > { %v1874_v57 = vrot.slane %v1873_v1, 1 }
 0x61a   : > { %v4558_v12 = vmax.f32 %v1873_v1, %v1874_v57 }
 0x61c   : > { %v1876_v19 = vsub.f32 %v4477_v17, %v4558_v12  ;;  %v1877_v6 = vsub.f32 %v4466_v3, %v4558_v12  ;;  %v1878_v2 = vsub.f32 %v4487_v52, %v4558_v12  ;;  %v1879_v38 = vsub.f32 %v1826_v14, %v4558_v12 }
 0x61d   : > { %v1880_v7 = vsub.f32 %v4481_v28, %v4558_v12  ;;  %v1881_v63 = vsub.f32 %v4493_v44, %v4558_v12  ;;  %v1882_v17 = vsub.f32 %v4497_v34, %v4558_v12  ;;  %v1883_v52 = vsub.f32 %v4504_v40, %v4558_v12 }
 0x61e   : > { %v1892_v5 = vmul.f32 1.442695, %v1876_v19  ;;  %v1894_v57 = vmul.f32 1.442695, %v1877_v6  ;;  %v1896_v1 = vmul.f32 1.442695, %v1878_v2  ;;  %v1884_v28 = vsub.f32 %v4511_v13, %v4558_v12 }
 0x61f   : > { %v1898_v37 = vmul.f32 1.442695, %v1879_v38  ;;  %v1900_v3 = vmul.f32 1.442695, %v1880_v7  ;;  %v1902_v14 = vmul.f32 1.442695, %v1881_v63  ;;  %v1885_v34 = vsub.f32 %v4507_v20, %v4558_v12 }
 0x620   : > { %3521 = vpow2.f32 %v1892_v5  ;;  %v1904_v44 = vmul.f32 1.442695, %v1882_v17  ;;  %v1906_v21 = vmul.f32 1.442695, %v1883_v52  ;;  %v1886_v16 = vsub.f32 %v4516_v36, %v4558_v12 }
 0x621   : > { %3523 = vpow2.f32 %v1894_v57  ;;  %v1908_v47 = vmul.f32 1.442695, %v1884_v28  ;;  %v1887_v33 = vsub.f32 %v4519_v0, %v4558_v12  ;;  %v1910_v29 = vmul.f32 1.442695, %v1885_v34 }
 0x622   : > { %3525 = vpow2.f32 %v1896_v1  ;;  %v1888_v36 = vsub.f32 %v4534_v41, %v4558_v12  ;;  %v1912_v59 = vmul.f32 1.442695, %v1886_v16  ;;  %v1889_v0 = vsub.f32 %v4522_v24, %v4558_v12 }
 0x623   : > { %3527 = vpow2.f32 %v1898_v37  ;;  %v1914_v2 = vmul.f32 1.442695, %v1887_v33  ;;  %v1890_v41 = vsub.f32 %v4554_v23, %v4558_v12 }
 0x624   : > { %3529 = vpow2.f32 %v1900_v3  ;;  %v1916_v63 = vmul.f32 1.442695, %v1888_v36  ;;  %v1918_v24 = vmul.f32 1.442695, %v1889_v0  ;;  %v1891_v3 = vsub.f32 %v4537_v32, %v4558_v12 }
 0x625   : > { %3531 = vpow2.f32 %v1902_v14  ;;  %v1920_v23 = vmul.f32 1.442695, %v1890_v41 }
 0x626   : > { %v4577_v51 = vpop.eup %3521  ;;  %3533 = vpow2.f32 %v1904_v44 }
 0x627   : > { %v4579_v4 = vpop.eup %3523  ;;  %v1924_v46 = vsel %vm764_vm5, %v4577_v51, 0.0  ;;  %3535 = vpow2.f32 %v1906_v21 }
 0x628   : > { %v4585_v40 = vpop.eup %3525  ;;  %v1925_v15 = vsel %vm764_vm5, %v4579_v4, 0.0  ;;  %3537 = vpow2.f32 %v1908_v47 }
 0x629   : > { %v4589_v13 = vpop.eup %3527  ;;  %v1926_v61 = vadd.f32 %v1925_v15, %v1924_v46  ;;  %v1927_v20 = vsel %vm764_vm5, %v4585_v40, 0.0  ;;  %3539 = vpow2.f32 %v1910_v29  ;;  %v1922_v46 = vmul.f32 1.442695, %v1891_v3 }
 0x62a   : > { %v4595_v48 = vpop.eup %3529  ;;  %v1929_v11 = vsel %vm764_vm5, %v4589_v13, 0.0  ;;  %3541 = vpow2.f32 %v1912_v59 }
 0x62b   : > { %v1928_v10 = vadd.f32 %v1927_v20, %v1926_v61  ;;  %v4601_v60 = vpop.eup %3531  ;;  %v1931_v19 = vsel %vm764_vm5, %v4595_v48, 0.0  ;;  %3543 = vpow2.f32 %v1914_v2 }
 0x62c   : > { %v4607_v6 = vpop.eup %3533  ;;  %v1933_v7 = vsel %vm764_vm5, %v4601_v60, 0.0  ;;  %3545 = vpow2.f32 %v1916_v63 }
 0x62d   : > { %v1930_v9 = vadd.f32 %v1929_v11, %v1928_v10  ;;  %v4613_v5 = vpop.eup %3535  ;;  %v1935_v1 = vsel %vm764_vm5, %v4607_v6, 0.0  ;;  %3547 = vpow2.f32 %v1918_v24 }
 0x62e   : > { %v4619_v37 = vpop.eup %3537  ;;  %v1937_v52 = vsel %vm764_vm5, %v4613_v5, 0.0  ;;  %3549 = vpow2.f32 %v1920_v23 }
 0x62f   : > { %v1932_v38 = vadd.f32 %v1931_v19, %v1930_v9  ;;  %v4625_v14 = vpop.eup %3539  ;;  %v1939_v44 = vsel %vm764_vm5, %v4619_v37, 0.0  ;;  %3551 = vpow2.f32 %v1922_v46 }
 0x630   : > { %v4629_v34 = vpop.eup %3541  ;;  %v1941_v15 = vsel %vm764_vm5, %v4625_v14, 0.0 }
 0x631   : > { %v1934_v57 = vadd.f32 %v1933_v7, %v1932_v38  ;;  %v4633_v32 = vpop.eup %3543  ;;  %v1943_v16 = vsel %vm764_vm5, %v4629_v34, 0.0 }
 0x632   : > { %v4637_v47 = vpop.eup %3545  ;;  %v1945_v20 = vsel %vm764_vm5, %v4633_v32, 0.0 }
 0x633   : > { %v1936_v17 = vadd.f32 %v1935_v1, %v1934_v57  ;;  %v4641_v33 = vpop.eup %3547  ;;  %v1947_v10 = vsel %vm764_vm5, %v4637_v47, 0.0 }
 0x634   : > { %v4645_v11 = vpop.eup %3549  ;;  %v1949_v59 = vsel %vm764_vm5, %v4641_v33, 0.0 }
 0x635   : > { %v1938_v28 = vadd.f32 %v1937_v52, %v1936_v17  ;;  %v4649_v9 = vpop.eup %3551  ;;  %v1951_v0 = vsel %vm764_vm5, %v4645_v11, 0.0 }
 0x636   : > { %v1953_v38 = vsel %vm764_vm5, %v4649_v9, 0.0 }
 0x637   : > { %v1940_v21 = vadd.f32 %v1939_v44, %v1938_v28 }
 0x639   : > { %v1942_v12 = vadd.f32 %v1941_v15, %v1940_v21 }
 0x63b   : > { %v1944_v61 = vadd.f32 %v1943_v16, %v1942_v12 }
 0x63d   : > { %v1946_v29 = vadd.f32 %v1945_v20, %v1944_v61 }
 0x63f   : > { %v1948_v36 = vadd.f32 %v1947_v10, %v1946_v29 }
 0x641   : > { %v1950_v19 = vadd.f32 %v1949_v59, %v1948_v36 }
 0x643   : > { %v1952_v2 = vadd.f32 %v1951_v0, %v1950_v19 }
 0x645   : > { %v1954_v7 = vadd.f32 %v1953_v38, %v1952_v2 }
 0x647   : > { %v1955_v41 = vrot.slane %v1954_v7, 4 }
 0x649   : > { %v1956_v63 = vadd.f32 %v1955_v41, %v1954_v7 }
 0x64b   : > { %v1957_v57 = vrot.slane %v1956_v63, 2 }
 0x64d   : > { %v1958_v1 = vadd.f32 %v1957_v57, %v1956_v63 }
 0x64f   : > { %v1959_v24 = vrot.slane %v1958_v1, 1 }
 0x651   : > { %v1960_v17 = vadd.f32 %v1959_v24, %v1958_v1 }
 0x653   : > { %v1961_v3 = vadd.f32 1e-16, %v1960_v17 }
 0x655   : > { %3553 = vrcp.f32 %v1961_v3  ;;  %v1973_v44 = vand.u32 2147483648, %v1961_v3  ;;  %v1971_v46 = vand.u32 2147483647, %v1961_v3  ;;  %vm1967_vm6 = vweird.f32 %v1961_v3 }
 0x657   : > { %v1974_v12 = vor.u32 1.1754944e-38, %v1973_v44  ;;  %vm1972_vm8 = vcmp.eq.f32.partialorder %v1971_v46, 8.507059e+37 }
 0x65b   : > { %v3554_v52 = vpop.eup %3553 }
 0x65c   : > { %v1963_v23 = vmul.f32 %v3554_v52, %v1961_v3  ;;  %vm1968_vm3 = vweird.f32 %v3554_v52 }
 0x65d   : > { %vm1969_vm7 = vmor %vm1967_vm6, %vm1968_vm3 }
 0x65e   : > { %v1964_v28 = vsub.f32 1.0, %v1963_v23 }
 0x660   : > { %v1965_v21 = vmul.f32 %v3554_v52, %v1964_v28 }
 0x662   : > { %v1966_v15 = vadd.f32 %v3554_v52, %v1965_v21 }
 0x664   : > { %v1970_v16 = vsel %vm1969_vm7, %v3554_v52, %v1966_v15 }
 0x665   : > { %v4655_v61 = vsel %vm1972_vm8, %v1974_v12, %v1970_v16 }
 0x666   : > { %v1976_v20 = vmul.f32 %v4655_v61, %v4307_v50  ;;  %v4661_v29 = vmul.f32 %v4595_v48, %v4655_v61  ;;  %v4665_v10 = vmul.f32 %v4601_v60, %v4655_v61  ;;  %v4669_v36 = vmul.f32 %v4607_v6, %v4655_v61 }
 0x667   : > { %v2011_v46 = vmul.f32 %v4629_v34, %v4655_v61  ;;  %v2012_v15 = vmul.f32 %v4633_v32, %v4655_v61  ;;  %v4707_v16 = vmul.f32 %v4645_v11, %v4655_v61 }
 0x668   : > { %v1991_v59 = vmul.f32 %v4645_v11, %v1976_v20  ;;  %v1992_v19 = vmul.f32 %v4649_v9, %v1976_v20  ;;  %v1989_v0 = vmul.f32 %v4637_v47, %v1976_v20  ;;  %v1985_v2 = vmul.f32 %v4619_v37, %v1976_v20 }
 0x669   : > { %v1986_v38 = vmul.f32 %v4625_v14, %v1976_v20  ;;  %v1990_v41 = vmul.f32 %v4641_v33, %v1976_v20  ;;  %v1983_v63 = vmul.f32 %v4607_v6, %v1976_v20  ;;  %v1984_v57 = vmul.f32 %v4613_v5, %v1976_v20 }
 0x66a   : > { %v2000_v7 = vpack.c.bf16 %v1992_v19, %v1991_v59  ;;  %v1981_v24 = vmul.f32 %v4595_v48, %v1976_v20  ;;  %v1982_v17 = vmul.f32 %v4601_v60, %v1976_v20  ;;  %v1987_v52 = vmul.f32 %v4629_v34, %v1976_v20 }
 0x66b   : > { %v1997_v1 = vpack.c.bf16 %v1986_v38, %v1985_v2  ;;  %v1996_v3 = vpack.c.bf16 %v1984_v57, %v1983_v63  ;;  %v1988_v23 = vmul.f32 %v4633_v32, %v1976_v20  ;;  %v1999_v44 = vpack.c.bf16 %v1990_v41, %v1989_v0 }
 0x66c   : > { %3381 = vmatpush.lsf.bf16.msrb.mxu2 %v2000_v7  ;;  %v1995_v28 = vpack.c.bf16 %v1982_v17, %v1981_v24  ;;  %v2019_v21 = vpack.c.bf16 %v4665_v10, %v4661_v29  ;;  %v4687_v6 = vmul.f32 %v4613_v5, %v4655_v61  ;;  %v4691_v48 = vmul.f32 %v4619_v37, %v4655_v61 }
 0x66d   : > { %v2010_v60 = vmul.f32 %v4625_v14, %v4655_v61  ;;  %v2013_v5 = vmul.f32 %v4637_v47, %v4655_v61  ;;  %v2014_v37 = vmul.f32 %v4641_v33, %v4655_v61  ;;  %v2022_v34 = vpack.c.bf16 %v2012_v15, %v2011_v46  ;;  %v3450_v15 = vld [vmem:[%s5179_s8 + $0x1] ss:$0 sm:$0xff] }
 0x66e   : > { %v2020_v12 = vpack.c.bf16 %v4687_v6, %v4669_v36  ;;  %v4712_v32 = vmul.f32 %v4649_v9, %v4655_v61  ;;  %v1998_v29 = vpack.c.bf16 %v1988_v23, %v1987_v52  ;;  %v1979_v47 = vmul.f32 %v4585_v40, %v1976_v20 }
 0x66f   : > { %v2021_v14 = vpack.c.bf16 %v2010_v60, %v4691_v48  ;;  %v2023_v10 = vpack.c.bf16 %v2014_v37, %v2013_v5  ;;  %v1980_v33 = vmul.f32 %v4589_v13, %v1976_v20  ;;  %v1977_v59 = vmul.f32 %v4577_v51, %v1976_v20 }
 0x670   : > { %3382 = vmatpush.lsf.bf16.msrb.mxu2 %v1999_v44  ;;  %v2024_v36 = vpack.c.bf16 %v4712_v32, %v4707_v16  ;;  %v1978_v19 = vmul.f32 %v4579_v4, %v1976_v20  ;;  %v2002_v52 = vmul.f32 %v4579_v4, %v4655_v61  ;;  %v2003_v44 = vmul.f32 %v4585_v40, %v4655_v61 }
 0x671   : > { %v1994_v11 = vpack.c.bf16 %v1980_v33, %v1979_v47  ;;  %v2004_v6 = vmul.f32 %v4589_v13, %v4655_v61 }
 0x672   : > { %v1993_v9 = vpack.c.bf16 %v1978_v19, %v1977_v59 }
 0x673   : > { %v2018_v48 = vpack.c.bf16 %v2004_v6, %v2003_v44 }
 0x674   : > { %3383 = vmatpush.lsf.bf16.msrb.mxu2 %v1998_v29 }
 0x678   : > { %3384 = vmatpush.lsf.bf16.msrb.mxu2 %v1997_v1 }
 0x67c   : > { %3385 = vmatpush.lsf.bf16.msrb.mxu2 %v1996_v3  ;;  %v2001_v3 = vmul.f32 %v4577_v51, %v4655_v61  ;;  %v3287_v51 = vld [vmem:[%s5177_s6 + $0x38] sm:$0x3]  ;;  %v3356_v61 = vld [vmem:[%s5177_s6 + $0x30] sm:$0xff] }
 0x67d   : > { %v2215_v4 = vunpack.c.l.b16 %v3287_v51 }
 0x67f   : > { %v2218_v40 = vpack.c.b16 %v2215_v4, %v2215_v4 }
 0x680   : > { %3386 = vmatpush.lsf.bf16.msrb.mxu2 %v1995_v28  ;;  %v2017_v28 = vpack.c.bf16 %v2002_v52, %v2001_v3 }
 0x681   : > { %v2246_v13 = vand.u32 %v2218_v40, %v3838_v22 }
 0x683   : > { %2253 = vmatpush.bf16.msra.mxu1 %v2246_v13 }
 0x684   : > { %3387 = vmatpush.lsf.bf16.msrb.mxu2 %v1994_v11 }
 0x687   : > { %2254 = vmatpush.bf16.msra.mxu1 %v3356_v61 }
 0x688   : > { %3388 = vmatpush.lsf.bf16.msrb.mxu2 %v1993_v9 }
 0x68a   : > { %3389 = vllmr.8.mxu2 }
 0x6ab   : > { %3390 = vmatmul.lmr.bf16.vlgmr.msra.gmra.8.mxu2 }
 0x6b3   : > { %3391 = vmatmul.lmr.bf16.gmra.8.mxu2 }
 0x6bb   : > { %3392 = vmatmul.lmr.bf16.gmra.8.mxu2 }
 0x6c3   : > { %3393 = vmatmul.lmr.bf16.gmra.8.mxu2 }
 0x6cb   : > { %3394 = vmatmul.lmr.bf16.gmra.8.mxu2 }
 0x6d3   : > { %3395 = vmatmul.lmr.bf16.gmra.8.mxu2 }
 0x6db   : > { %3396 = vmatmul.lmr.bf16.gmra.8.mxu2 }
 0x6e3   : > { %3397 = vmatmul.lmr.bf16.gmra.8.mxu2 }
 0x72e   : > { %v2058_v0 = vpop.f32.mrf.mxu2 }
 0x736   : > { %v2060_v2 = vpop.f32.mrf.mxu2 }
 0x737   : > { %v2078_v23 = vpack.c.bf16 %v2060_v2, %v2058_v0 }
 0x73e   : > { %v2063_v38 = vpop.f32.mrf.mxu2 }
 0x746   : > { %v2065_v7 = vpop.f32.mrf.mxu2 }
 0x747   : > { %v2079_v17 = vpack.c.bf16 %v2065_v7, %v2063_v38 }
 0x74e   : > { %v2068_v41 = vpop.f32.mrf.mxu2 }
 0x756   : > { %v2070_v63 = vpop.f32.mrf.mxu2 }
 0x757   : > { %v2080_v24 = vpack.c.bf16 %v2070_v63, %v2068_v41 }
 0x75e   : > { %v2073_v57 = vpop.f32.mrf.mxu2 }
 0x766   : > { %v2075_v20 = vpop.f32.mrf.mxu2 }
 0x767   : > { %v2081_v1 = vpack.c.bf16 %v2075_v20, %v2073_v57 }
 0x769   : > { %2110 = vmatpush.bf16.msra.mxu0 %v2081_v1 }
 0x76d   : > { %2111 = vmatpush.bf16.msra.mxu0 %v2080_v24 }
 0x771   : > { %2112 = vmatpush.bf16.msra.mxu0 %v2079_v17 }
 0x775   : > { %2113 = vmatpush.bf16.msra.mxu0 %v2078_v23 }
 0x778   : > { %3274 = vmatmul.msk.bf16.vlgmr.msra.gmra.mxu0 %vm764_vm5, %v2017_v28 }
 0x788   : > { %3275 = vmatmul.msk.bf16.gmra.mxu0 %vm764_vm5, %v2018_v48 }
 0x798   : > { %3276 = vmatmul.msk.bf16.gmra.mxu0 %vm764_vm5, %v2019_v21  ;;  %v3355_v21 = vld [vmem:[%s5177_s6 + $0x28] sm:$0xff] }
 0x799   : > { %2255 = vmatpush.bf16.msra.mxu1 %v3355_v21 }
 0x7a8   : > { %3277 = vmatmul.msk.bf16.gmra.mxu0 %vm764_vm5, %v2020_v12 }
 0x7b8   : > { %3278 = vmatmul.msk.bf16.gmra.mxu0 %vm764_vm5, %v2021_v14 }
 0x7c8   : > { %3279 = vmatmul.msk.bf16.gmra.mxu0 %vm764_vm5, %v2022_v34 }
 0x7d8   : > { %3280 = vmatmul.msk.bf16.gmra.mxu0 %vm764_vm5, %v2023_v10 }
 0x7e8   : > { %3281 = vmatmul.msk.bf16.gmra.mxu0 %vm764_vm5, %v2024_v36 }
 0x7f5   : > { %v2115_v60 = vpop.f32.mrf.mxu0 }
 0x7f6   : > { %v2155_v46 = vmul.f32 %v2115_v60, %v4381_v53 }
 0x7f8   : > { %v2176_v37 = vadd.f32 %v3450_v15, %v2155_v46 }
 0x7fd   : > { %v2117_v12 = vpop.f32.mrf.mxu0 }
 0x7fe   : > { %v2156_v5 = vmul.f32 %v2117_v12, %v4389_v49 }
 0x800   : > { %v2177_v16 = vadd.f32 %v3450_v15, %v2156_v5 }
 0x802   : > { %v2192_v14 = vpack.c.bf16 %v2177_v16, %v2176_v37 }
 0x804   : > { %3296 = vmatmul.msk.bf16.vlgmr.msra.gmra.mxu1 %vm923_vm4, %v2192_v14 }
 0x805   : > { %v2120_v34 = vpop.f32.mrf.mxu0 }
 0x806   : > { %v2157_v32 = vmul.f32 %v2120_v34, %v4395_v18 }
 0x808   : > { %v2178_v36 = vadd.f32 %v3450_v15, %v2157_v32 }
 0x80d   : > { %v2122_v29 = vpop.f32.mrf.mxu0 }
 0x80e   : > { %v2158_v10 = vmul.f32 %v2122_v29, %v4398_v30 }
 0x810   : > { %v2179_v47 = vadd.f32 %v3450_v15, %v2158_v10 }
 0x812   : > { %v2193_v33 = vpack.c.bf16 %v2179_v47, %v2178_v36 }
 0x814   : > { %3297 = vmatmul.msk.bf16.gmra.mxu1 %vm923_vm4, %v2193_v33 }
 0x815   : > { %v2125_v11 = vpop.f32.mrf.mxu0 }
 0x816   : > { %v2159_v59 = vmul.f32 %v2125_v11, %v4404_v8 }
 0x818   : > { %v2180_v0 = vadd.f32 %v3450_v15, %v2159_v59 }
 0x81d   : > { %v2127_v19 = vpop.f32.mrf.mxu0 }
 0x81e   : > { %v2160_v9 = vmul.f32 %v2127_v19, %v4407_v42 }
 0x820   : > { %v2181_v2 = vadd.f32 %v3450_v15, %v2160_v9 }
 0x822   : > { %v2194_v38 = vpack.c.bf16 %v2181_v2, %v2180_v0 }
 0x824   : > { %3298 = vmatmul.msk.bf16.gmra.mxu1 %vm923_vm4, %v2194_v38 }
 0x825   : > { %v2130_v7 = vpop.f32.mrf.mxu0 }
 0x826   : > { %v2161_v41 = vmul.f32 %v2130_v7, %v4413_v56 }
 0x828   : > { %v2182_v20 = vadd.f32 %v3450_v15, %v2161_v41 }
 0x82d   : > { %v2132_v63 = vpop.f32.mrf.mxu0 }
 0x82e   : > { %v2162_v57 = vmul.f32 %v2132_v63, %v4416_v45 }
 0x830   : > { %v2183_v1 = vadd.f32 %v3450_v15, %v2162_v57 }
 0x832   : > { %v2195_v24 = vpack.c.bf16 %v2183_v1, %v2182_v20 }
 0x834   : > { %3299 = vmatmul.msk.bf16.gmra.mxu1 %vm923_vm4, %v2195_v24 }
 0x835   : > { %v2135_v17 = vpop.f32.mrf.mxu0 }
 0x836   : > { %v2163_v3 = vmul.f32 %v2135_v17, %v4422_v39 }
 0x838   : > { %v2184_v28 = vadd.f32 %v3450_v15, %v2163_v3 }
 0x83d   : > { %v2137_v52 = vpop.f32.mrf.mxu0 }
 0x83e   : > { %v2164_v23 = vmul.f32 %v2137_v52, %v4425_v55 }
 0x840   : > { %v2185_v44 = vadd.f32 %v3450_v15, %v2164_v23 }
 0x842   : > { %v2196_v6 = vpack.c.bf16 %v2185_v44, %v2184_v28 }
 0x844   : > { %3300 = vmatmul.msk.bf16.gmra.mxu1 %vm923_vm4, %v2196_v6 }
 0x845   : > { %v2140_v48 = vpop.f32.mrf.mxu0 }
 0x846   : > { %v2165_v51 = vmul.f32 %v2140_v48, %v4431_v58 }
 0x848   : > { %v2186_v13 = vadd.f32 %v3450_v15, %v2165_v51 }
 0x84d   : > { %v2142_v4 = vpop.f32.mrf.mxu0 }
 0x84e   : > { %v2166_v40 = vmul.f32 %v2142_v4, %v4434_v27 }
 0x850   : > { %v2187_v61 = vadd.f32 %v3450_v15, %v2166_v40 }
 0x852   : > { %v2197_v21 = vpack.c.bf16 %v2187_v61, %v2186_v13 }
 0x854   : > { %3301 = vmatmul.msk.bf16.gmra.mxu1 %vm923_vm4, %v2197_v21 }
 0x855   : > { %v2145_v60 = vpop.f32.mrf.mxu0 }
 0x856   : > { %v2167_v46 = vmul.f32 %v2145_v60, %v4440_v62 }
 0x858   : > { %v2188_v37 = vadd.f32 %v3450_v15, %v2167_v46 }
 0x85d   : > { %v2147_v12 = vpop.f32.mrf.mxu0 }
 0x85e   : > { %v2168_v5 = vmul.f32 %v2147_v12, %v4443_v54 }
 0x860   : > { %v2189_v16 = vadd.f32 %v3450_v15, %v2168_v5 }
 0x862   : > { %v2198_v14 = vpack.c.bf16 %v2189_v16, %v2188_v37 }
 0x864   : > { %3302 = vmatmul.msk.bf16.gmra.mxu1 %vm923_vm4, %v2198_v14  ;;  %v4774_v14 = vperm.slane %v3917_v26, 2 }
 0x865   : > { %v2150_v34 = vpop.f32.mrf.mxu0 }
 0x866   : > { %v2169_v32 = vmul.f32 %v2150_v34, %v4449_v25 }
 0x868   : > { %v2190_v36 = vadd.f32 %v3450_v15, %v2169_v32 }
 0x86d   : > { %v2152_v29 = vpop.f32.mrf.mxu0 }
 0x86e   : > { %v2170_v10 = vmul.f32 %v2152_v29, %v4452_v43 }
 0x870   : > { %v2191_v47 = vadd.f32 %v3450_v15, %v2170_v10 }
 0x872   : > { %v2199_v33 = vpack.c.bf16 %v2191_v47, %v2190_v36 }
 0x874   : > { %3303 = vmatmul.msk.bf16.gmra.mxu1 %vm923_vm4, %v2199_v33 }
 0x881   : > { %v2257_v11 = vpop.f32.mrf.mxu1 }
 0x882   : > { %2299 = vperm.xlu0 %3442, %v2257_v11  }
 0x889   : > { %v2259_v59 = vpop.f32.mrf.mxu1 }
 0x88a   : > { %v2644_v19 = vpack.c.bf16 %v2259_v59, %v2257_v11  ;;  %2304 = vperm.xlu2 %3444, %v2259_v59  }
 0x891   : > { %v2262_v9 = vpop.f32.mrf.mxu1 }
 0x892   : > { %2309 = vperm.xlu0 %3442, %v2262_v9  }
 0x899   : > { %v2264_v0 = vpop.f32.mrf.mxu1 }
 0x89a   : > { %v2645_v2 = vpack.c.bf16 %v2264_v0, %v2262_v9  ;;  %2314 = vperm.xlu2 %3444, %v2264_v0  }
 0x8a1   : > { %v2267_v38 = vpop.f32.mrf.mxu1 }
 0x8a2   : > { %2319 = vperm.xlu0 %3442, %v2267_v38  }
 0x8a9   : > { %v2269_v7 = vpop.f32.mrf.mxu1 }
 0x8aa   : > { %v2646_v41 = vpack.c.bf16 %v2269_v7, %v2267_v38  ;;  %2324 = vperm.xlu2 %3444, %v2269_v7  }
 0x8b1   : > { %v2272_v63 = vpop.f32.mrf.mxu1 }
 0x8b2   : > { %2329 = vperm.xlu0 %3442, %v2272_v63  }
 0x8b9   : > { %v2274_v15 = vpop.f32.mrf.mxu1 }
 0x8ba   : > { %v2647_v57 = vpack.c.bf16 %v2274_v15, %v2272_v63  ;;  %2334 = vperm.xlu2 %3444, %v2274_v15  }
 0x8c1   : > { %v2277_v20 = vpop.f32.mrf.mxu1 }
 0x8c2   : > { %2339 = vperm.xlu0 %3442, %v2277_v20  }
 0x8c9   : > { %v2279_v1 = vpop.f32.mrf.mxu1 }
 0x8ca   : > { %2344 = vperm.xlu2 %3444, %v2279_v1   ;;  %v2648_v51 = vpack.c.bf16 %v2279_v1, %v2277_v20 }
 0x8d1   : > { %v2282_v24 = vpop.f32.mrf.mxu1 }
 0x8d2   : > { %2349 = vperm.xlu0 %3442, %v2282_v24  }
 0x8d9   : > { %v2284_v17 = vpop.f32.mrf.mxu1 }
 0x8da   : > { %2354 = vperm.xlu2 %3444, %v2284_v17   ;;  %v2649_v48 = vpack.c.bf16 %v2284_v17, %v2282_v24  ;;  %v5218_v24 = vld [vmem:[#allocation10_spill] sm:$0xff] }
 0x8e1   : > { %v2287_v3 = vpop.f32.mrf.mxu1 }
 0x8e2   : > { %2359 = vperm.xlu0 %3442, %v2287_v3  }
 0x8e4   : > { %v2305_v4 = vpop.permute.xlu2 %2304 }
 0x8e5   : > { %v2379_v34 = vadd.f32 %v4774_v14, %v2305_v4 }
 0x8e7   : > { %vm2395_vm9 = vcmp.gt.f32.partialorder %v2379_v34, 0.0  ;;  %v2411_v33 = vmul.f32 0.2, %v2379_v34 }
 0x8e9   : > { %v2289_v52 = vpop.f32.mrf.mxu1 }
 0x8ea   : > { %2364 = vperm.xlu2 %3444, %v2289_v52   ;;  %v2650_v6 = vpack.c.bf16 %v2289_v52, %v2287_v3  ;;  %v5219_v3 = vld [vmem:[#allocation9_spill] sm:$0xff] }
 0x8f1   : > { %v2292_v23 = vpop.f32.mrf.mxu1 }
 0x8f2   : > { %2369 = vperm.xlu0 %3442, %v2292_v23  }
 0x8f4   : > { %v2300_v40 = vpop.permute.xlu0 %2299  ;;  %v2315_v13 = vpop.permute.xlu2 %2314 }
 0x8f5   : > { %v2378_v32 = vadd.f32 %v4774_v14, %v2300_v40  ;;  %v2381_v29 = vadd.f32 %v4774_v14, %v2315_v13  ;;  %v5220_v13 = vld [vmem:[#allocation12_spill] sm:$0xff] }
 0x8f7   : > { %v2410_v11 = vmul.f32 0.2, %v2378_v32  ;;  %vm2394_vm10 = vcmp.gt.f32.partialorder %v2378_v32, 0.0  ;;  %v2413_v59 = vmul.f32 0.2, %v2381_v29  ;;  %vm2397_vm11 = vcmp.gt.f32.partialorder %v2381_v29, 0.0 }
 0x8f9   : > { %v2294_v28 = vpop.f32.mrf.mxu1  ;;  %v2426_v38 = vsel %vm2394_vm10, %v2378_v32, %v2410_v11  ;;  %v2429_v7 = vsel %vm2397_vm11, %v2381_v29, %v2413_v59  ;;  %v5222_v59 = vld [vmem:[#allocation11_spill] sm:$0xff] }
 0x8fa   : > { %v2651_v44 = vpack.c.bf16 %v2294_v28, %v2292_v23  ;;  %2374 = vperm.xlu2 %3444, %v2294_v28   ;;  %v4789_v52 = vadd.f32 %v2426_v38, %v5219_v3  ;;  %v4796_v4 = vadd.f32 %v2429_v7, %v4077_v35 }
 0x8fc   : > { %2668 = vmatpush.bf16.msra.mxu2 %v2651_v44 }
 0x900   : > { %2669 = vmatpush.bf16.msra.mxu2 %v2650_v6 }
 0x904   : > { %2670 = vmatpush.bf16.msra.mxu2 %v2649_v48  ;;  %v2310_v61 = vpop.permute.xlu0 %2309  ;;  %v2325_v21 = vpop.permute.xlu2 %2324 }
 0x905   : > { %v2383_v36 = vadd.f32 %v4774_v14, %v2325_v21 }
 0x907   : > { %v2415_v9 = vmul.f32 0.2, %v2383_v36  ;;  %vm2399_vm12 = vcmp.gt.f32.partialorder %v2383_v36, 0.0 }
 0x908   : > { %2671 = vmatpush.bf16.msra.mxu2 %v2648_v51 }
 0x90c   : > { %2672 = vmatpush.bf16.msra.mxu2 %v2647_v57  ;;  %v2431_v57 = vsel %vm2399_vm12, %v2383_v36, %v2415_v9 }
 0x910   : > { %2673 = vmatpush.bf16.msra.mxu2 %v2646_v41 }
 0x914   : > { %2674 = vmatpush.bf16.msra.mxu2 %v2645_v2  ;;  %v2320_v60 = vpop.permute.xlu0 %2319  ;;  %v2335_v46 = vpop.permute.xlu2 %2334  ;;  %v2427_v2 = vsel %vm2395_vm9, %v2379_v34, %v2411_v33  ;;  %v5221_v34 = vld [vmem:[#allocation8_spill] sm:$0xff] }
 0x915   : > { %v2382_v26 = vadd.f32 %v4774_v14, %v2320_v60  ;;  %v2385_v0 = vadd.f32 %v4774_v14, %v2335_v46  ;;  %v4786_v17 = vadd.f32 %v2427_v2, %v5218_v24 }
 0x917   : > { %v2414_v63 = vmul.f32 0.2, %v2382_v26  ;;  %vm2398_vm14 = vcmp.gt.f32.partialorder %v2382_v26, 0.0  ;;  %v2417_v23 = vmul.f32 0.2, %v2385_v0  ;;  %vm2401_vm15 = vcmp.gt.f32.partialorder %v2385_v0, 0.0 }
 0x918   : > { %2675 = vmatpush.bf16.msra.mxu2 %v2644_v19  ;;  %v2380_v19 = vadd.f32 %v4774_v14, %v2310_v61  ;;  %v4800_v61 = vadd.f32 %v2431_v57, %v5220_v13 }
 0x919   : > { %v2430_v21 = vsel %vm2398_vm14, %v2382_v26, %v2414_v63  ;;  %v5223_v26 = vld [vmem:[#allocation15_spill] sm:$0xff]  ;;  %v2458_v63 = vsel %vm764_vm5, %v4789_v52, -inf }
 0x91a   : > { %vm2396_vm13 = vcmp.gt.f32.partialorder %v2380_v19, 0.0  ;;  %v2412_v41 = vmul.f32 0.2, %v2380_v19  ;;  %v4805_v32 = vadd.f32 %v2430_v21, %v5221_v34  ;;  %v2464_v24 = vsel %vm764_vm5, %v4800_v61, -inf  ;;  %v5229_v21 = vld [vmem:[#allocation20_spill] sm:$0xff] }
 0x91c   : > { %v2428_v40 = vsel %vm2396_vm13, %v2380_v19, %v2412_v41  ;;  %v2459_v41 = vsel %vm764_vm5, %v4786_v17, -inf  ;;  %v2462_v3 = vsel %vm764_vm5, %v4805_v32, -inf }
 0x91d   : > { %v4808_v19 = vadd.f32 %v2428_v40, %v5222_v59  ;;  %v5228_v40 = vld [vmem:[#allocation18_spill] sm:$0xff] }
 0x924   : > { %v2330_v12 = vpop.permute.xlu0 %2329  ;;  %v2345_v5 = vpop.permute.xlu2 %2344 }
 0x925   : > { %v2384_v20 = vadd.f32 %v4774_v14, %v2330_v12  ;;  %v2387_v28 = vadd.f32 %v4774_v14, %v2345_v5 }
 0x927   : > { %v2416_v60 = vmul.f32 0.2, %v2384_v20  ;;  %vm2400_vm0 = vcmp.gt.f32.partialorder %v2384_v20, 0.0  ;;  %vm2403_vm2 = vcmp.gt.f32.partialorder %v2387_v28, 0.0 }
 0x929   : > { %v2432_v36 = vsel %vm2400_vm0, %v2384_v20, %v2416_v60  ;;  %v5225_v20 = vld [vmem:[#allocation13_spill] sm:$0xff]  ;;  %vm3030_vm0 = vcmask 122880  }
 0x934   : > { %v2340_v37 = vpop.permute.xlu0 %2339  ;;  %v2355_v16 = vpop.permute.xlu2 %2354 }
 0x935   : > { %v2386_v1 = vadd.f32 %v4774_v14, %v2340_v37  ;;  %v2389_v6 = vadd.f32 %v4774_v14, %v2355_v16  ;;  %v2433_v37 = vsel %vm2401_vm15, %v2385_v0, %v2417_v23  ;;  %v2419_v16 = vmul.f32 0.2, %v2387_v28 }
 0x936   : > { %v4811_v9 = vadd.f32 %v2433_v37, %v5223_v26  ;;  %v2461_v37 = vsel %vm764_vm5, %v4796_v4, -inf  ;;  %vm3000_vm15 = vcmask 130048  }
 0x937   : > { %v2418_v46 = vmul.f32 0.2, %v2386_v1  ;;  %vm2402_vm1 = vcmp.gt.f32.partialorder %v2386_v1, 0.0  ;;  %v2421_v35 = vmul.f32 0.2, %v2389_v6  ;;  %vm2405_vm3 = vcmp.gt.f32.partialorder %v2389_v6, 0.0 }
 0x938   : > { %v2435_v0 = vsel %vm2403_vm2, %v2387_v28, %v2419_v16 }
 0x939   : > { %v2434_v33 = vsel %vm2402_vm1, %v2386_v1, %v2418_v46  ;;  %v2437_v2 = vsel %vm2405_vm3, %v2389_v6, %v2421_v35 }
 0x93a   : > { %v4821_v1 = vadd.f32 %v2434_v33, %v5225_v20 }
 0x93c   : > { %v2470_v35 = vsel %vm764_vm5, %v4821_v1, -inf }
 0x944   : > { %v2350_v10 = vpop.permute.xlu0 %2349  ;;  %v2365_v47 = vpop.permute.xlu2 %2364 }
 0x945   : > { %v2388_v48 = vadd.f32 %v4774_v14, %v2350_v10  ;;  %v2391_v12 = vadd.f32 %v4774_v14, %v2365_v47 }
 0x947   : > { %v2420_v29 = vmul.f32 0.2, %v2388_v48  ;;  %vm2404_vm6 = vcmp.gt.f32.partialorder %v2388_v48, 0.0  ;;  %v2423_v11 = vmul.f32 0.2, %v2391_v12  ;;  %vm2407_vm8 = vcmp.gt.f32.partialorder %v2391_v12, 0.0 }
 0x949   : > { %v2436_v38 = vsel %vm2404_vm6, %v2388_v48, %v2420_v29  ;;  %v2439_v23 = vsel %vm2407_vm8, %v2391_v12, %v2423_v11  ;;  %v5227_v48 = vld [vmem:[#allocation16_spill] sm:$0xff]  ;;  %v2460_v12 = vsel %vm764_vm5, %v4808_v19, -inf  ;;  %v5230_v29 = vld [vmem:[#allocation19_spill] sm:$0xff]  ;;  %v2465_v11 = vmax.f32 %v2459_v41, %v2464_v24 }
 0x94a   : > { %v4834_v13 = vadd.f32 %v2436_v38, %v5228_v40 }
 0x954   : > { %v2360_v15 = vpop.permute.xlu0 %2359  ;;  %v2375_v44 = vpop.permute.xlu2 %2374 }
 0x955   : > { %v2390_v51 = vadd.f32 %v4774_v14, %v2360_v15  ;;  %v2393_v5 = vadd.f32 %v4774_v14, %v2375_v44  ;;  %v5224_v15 = vld [vmem:[#allocation14_spill] sm:$0xff]  ;;  %v5226_v44 = vld [vmem:[#allocation17_spill] sm:$0xff] }
 0x956   : > { %v4818_v57 = vadd.f32 %v2432_v36, %v5224_v15  ;;  %v4828_v6 = vadd.f32 %v2435_v0, %v5226_v44  ;;  %v5231_v36 = vld [vmem:[#allocation21_spill] sm:$0xff]  ;;  %v2474_v0 = vsel %vm764_vm5, %v4834_v13, -inf }
 0x957   : > { %v2422_v10 = vmul.f32 0.2, %v2390_v51  ;;  %vm2406_vm7 = vcmp.gt.f32.partialorder %v2390_v51, 0.0  ;;  %v2425_v47 = vmul.f32 0.2, %v2393_v5  ;;  %vm2409_vm9 = vcmp.gt.f32.partialorder %v2393_v5, 0.0 }
 0x958   : > { %v2466_v34 = vsel %vm764_vm5, %v4818_v57, -inf  ;;  %v2472_v26 = vsel %vm764_vm5, %v4828_v6, -inf }
 0x959   : > { %v2438_v7 = vsel %vm2406_vm7, %v2390_v51, %v2422_v10  ;;  %v2441_v28 = vsel %vm2409_vm9, %v2393_v5, %v2425_v47  ;;  %v4831_v51 = vadd.f32 %v2437_v2, %v5227_v48  ;;  %v2468_v5 = vsel %vm764_vm5, %v4811_v9, -inf }
 0x95a   : > { %v4837_v60 = vadd.f32 %v2438_v7, %v5229_v21  ;;  %v4851_v10 = vadd.f32 %v2439_v23, %v5230_v29  ;;  %v4854_v33 = vadd.f32 %v2441_v28, %v5231_v36  ;;  %v2463_v47 = vmax.f32 %v2458_v63, %v2462_v3 }
 0x95b   : > { %v2469_v38 = vmax.f32 %v2461_v37, %v2468_v5  ;;  %v2467_v7 = vmax.f32 %v2460_v12, %v2466_v34  ;;  %v2473_v3 = vmax.f32 %v2465_v11, %v2472_v26 }
 0x95c   : > { %v2478_v2 = vsel %vm764_vm5, %v4837_v60, -inf  ;;  %v2471_v15 = vmax.f32 %v2463_v47, %v2470_v35  ;;  %v2480_v41 = vsel %vm764_vm5, %v4851_v10, -inf  ;;  %v2484_v63 = vsel %vm764_vm5, %v4854_v33, -inf }
 0x95d   : > { %v2475_v28 = vmax.f32 %v2467_v7, %v2474_v0  ;;  %v2481_v40 = vmax.f32 %v2473_v3, %v2480_v41 }
 0x95e   : > { %v2479_v44 = vmax.f32 %v2471_v15, %v2478_v2 }
 0x960   : > { %v2486_v37 = vmax.f32 %v2479_v44, %v2481_v40 }
 0x964   : > { %v2370_v46 = vpop.permute.xlu0 %2369 }
 0x965   : > { %v2392_v16 = vadd.f32 %v4774_v14, %v2370_v46  ;;  %v2476_v14 = vsel %vm764_vm5, %v4831_v51, -inf }
 0x966   : > { %v2477_v23 = vmax.f32 %v2469_v38, %v2476_v14 }
 0x967   : > { %vm2408_vm10 = vcmp.gt.f32.partialorder %v2392_v16, 0.0  ;;  %v2424_v59 = vmul.f32 0.2, %v2392_v16 }
 0x968   : > { %v2485_v21 = vmax.f32 %v2477_v23, %v2484_v63 }
 0x969   : > { %v2440_v20 = vsel %vm2408_vm10, %v2392_v16, %v2424_v59 }
 0x96a   : > { %v4869_v24 = vadd.f32 %v2440_v20, %v4152_v31 }
 0x96c   : > { %v2482_v48 = vsel %vm764_vm5, %v4869_v24, -inf }
 0x96d   : > { %v2483_v46 = vmax.f32 %v2475_v28, %v2482_v48 }
 0x96f   : > { %v2487_v12 = vmax.f32 %v2483_v46, %v2485_v21 }
 0x971   : > { %v2488_v5 = vmax.f32 %v2486_v37, %v2487_v12 }
 0x973   : > { %v2489_v16 = vrot.slane %v2488_v5, 4 }
 0x975   : > { %v2490_v34 = vmax.f32 %v2488_v5, %v2489_v16 }
 0x977   : > { %v2491_v35 = vrot.slane %v2490_v34, 2 }
 0x979   : > { %v2492_v29 = vmax.f32 %v2490_v34, %v2491_v35 }
 0x97b   : > { %v2493_v36 = vrot.slane %v2492_v29, 1 }
 0x97d   : > { %v4873_v31 = vmax.f32 %v2492_v29, %v2493_v36 }
 0x97f   : > { %v2495_v11 = vsub.f32 %v4789_v52, %v4873_v31  ;;  %v2496_v47 = vsub.f32 %v4786_v17, %v4873_v31  ;;  %v2497_v59 = vsub.f32 %v4808_v19, %v4873_v31  ;;  %v2498_v26 = vsub.f32 %v4796_v4, %v4873_v31 }
 0x980   : > { %v2499_v14 = vsub.f32 %v4805_v32, %v4873_v31  ;;  %v2500_v38 = vsub.f32 %v4800_v61, %v4873_v31  ;;  %v2501_v17 = vsub.f32 %v4818_v57, %v4873_v31  ;;  %v2502_v4 = vsub.f32 %v4811_v9, %v4873_v31 }
 0x981   : > { %v2511_v0 = vmul.f32 1.442695, %v2495_v11  ;;  %v2513_v2 = vmul.f32 1.442695, %v2496_v47  ;;  %v2515_v7 = vmul.f32 1.442695, %v2497_v59  ;;  %v2503_v32 = vsub.f32 %v4821_v1, %v4873_v31 }
 0x982   : > { %v2517_v15 = vmul.f32 1.442695, %v2498_v26  ;;  %v2519_v52 = vmul.f32 1.442695, %v2499_v14  ;;  %v2521_v19 = vmul.f32 1.442695, %v2500_v38  ;;  %v2504_v57 = vsub.f32 %v4828_v6, %v4873_v31 }
 0x983   : > { %3555 = vpow2.f32 %v2511_v0  ;;  %v2523_v20 = vmul.f32 1.442695, %v2501_v17  ;;  %v2525_v63 = vmul.f32 1.442695, %v2502_v4  ;;  %v2505_v28 = vsub.f32 %v4834_v13, %v4873_v31 }
 0x984   : > { %3557 = vpow2.f32 %v2513_v2  ;;  %v2527_v44 = vmul.f32 1.442695, %v2503_v32  ;;  %v2506_v21 = vsub.f32 %v4831_v51, %v4873_v31  ;;  %v2529_v46 = vmul.f32 1.442695, %v2504_v57 }
 0x985   : > { %3559 = vpow2.f32 %v2515_v7  ;;  %v2507_v13 = vsub.f32 %v4837_v60, %v4873_v31  ;;  %v2531_v16 = vmul.f32 1.442695, %v2505_v28  ;;  %v2508_v51 = vsub.f32 %v4851_v10, %v4873_v31 }
 0x986   : > { %3561 = vpow2.f32 %v2517_v15  ;;  %v2533_v36 = vmul.f32 1.442695, %v2506_v21  ;;  %v2509_v60 = vsub.f32 %v4869_v24, %v4873_v31  ;;  %v2510_v10 = vsub.f32 %v4854_v33, %v4873_v31 }
 0x987   : > { %3563 = vpow2.f32 %v2519_v52  ;;  %v2535_v26 = vmul.f32 1.442695, %v2507_v13  ;;  %v2537_v38 = vmul.f32 1.442695, %v2508_v51 }
 0x988   : > { %3565 = vpow2.f32 %v2521_v19  ;;  %v2539_v24 = vmul.f32 1.442695, %v2509_v60  ;;  %v2541_v32 = vmul.f32 1.442695, %v2510_v10 }
 0x989   : > { %v4893_v61 = vpop.eup %3555  ;;  %3567 = vpow2.f32 %v2523_v20 }
 0x98a   : > { %v4895_v41 = vpop.eup %3557  ;;  %v2543_v3 = vsel %vm764_vm5, %v4893_v61, 0.0  ;;  %3569 = vpow2.f32 %v2525_v63 }
 0x98b   : > { %v4901_v9 = vpop.eup %3559  ;;  %v2544_v23 = vsel %vm764_vm5, %v4895_v41, 0.0  ;;  %3571 = vpow2.f32 %v2527_v44 }
 0x98c   : > { %v4905_v1 = vpop.eup %3561  ;;  %v2545_v48 = vadd.f32 %v2544_v23, %v2543_v3  ;;  %v2546_v6 = vsel %vm764_vm5, %v4901_v9, 0.0  ;;  %3573 = vpow2.f32 %v2529_v46 }
 0x98d   : > { %v4911_v40 = vpop.eup %3563  ;;  %v2548_v12 = vsel %vm764_vm5, %v4905_v1, 0.0  ;;  %3575 = vpow2.f32 %v2531_v16 }
 0x98e   : > { %v2547_v37 = vadd.f32 %v2546_v6, %v2545_v48  ;;  %v4917_v5 = vpop.eup %3565  ;;  %v2550_v35 = vsel %vm764_vm5, %v4911_v40, 0.0  ;;  %3577 = vpow2.f32 %v2533_v36 }
 0x98f   : > { %v4923_v29 = vpop.eup %3567  ;;  %v2552_v47 = vsel %vm764_vm5, %v4917_v5, 0.0  ;;  %3579 = vpow2.f32 %v2535_v26 }
 0x990   : > { %v2549_v34 = vadd.f32 %v2548_v12, %v2547_v37  ;;  %v4929_v59 = vpop.eup %3569  ;;  %v2554_v0 = vsel %vm764_vm5, %v4923_v29, 0.0  ;;  %3581 = vpow2.f32 %v2537_v38 }
 0x991   : > { %v4935_v2 = vpop.eup %3571  ;;  %v2556_v15 = vsel %vm764_vm5, %v4929_v59, 0.0  ;;  %3583 = vpow2.f32 %v2539_v24 }
 0x992   : > { %v2551_v11 = vadd.f32 %v2550_v35, %v2549_v34  ;;  %v4941_v17 = vpop.eup %3573  ;;  %v2558_v4 = vsel %vm764_vm5, %v4935_v2, 0.0  ;;  %3585 = vpow2.f32 %v2541_v32 }
 0x993   : > { %v4945_v19 = vpop.eup %3575  ;;  %v2560_v33 = vsel %vm764_vm5, %v4941_v17, 0.0 }
 0x994   : > { %v2553_v14 = vadd.f32 %v2552_v47, %v2551_v11  ;;  %v4949_v31 = vpop.eup %3577  ;;  %v2562_v63 = vsel %vm764_vm5, %v4945_v19, 0.0 }
 0x995   : > { %v4953_v3 = vpop.eup %3579  ;;  %v2564_v28 = vsel %vm764_vm5, %v4949_v31, 0.0 }
 0x996   : > { %v2555_v7 = vadd.f32 %v2554_v0, %v2553_v14  ;;  %v4957_v44 = vpop.eup %3581  ;;  %v2566_v6 = vsel %vm764_vm5, %v4953_v3, 0.0 }
 0x997   : > { %v4961_v21 = vpop.eup %3583  ;;  %v2568_v37 = vsel %vm764_vm5, %v4957_v44, 0.0 }
 0x998   : > { %v2557_v52 = vadd.f32 %v2556_v15, %v2555_v7  ;;  %v4965_v12 = vpop.eup %3585  ;;  %v2570_v16 = vsel %vm764_vm5, %v4961_v21, 0.0 }
 0x999   : > { %v2572_v35 = vsel %vm764_vm5, %v4965_v12, 0.0 }
 0x99a   : > { %v2559_v20 = vadd.f32 %v2558_v4, %v2557_v52 }
 0x99c   : > { %v2561_v57 = vadd.f32 %v2560_v33, %v2559_v20 }
 0x99e   : > { %v2563_v23 = vadd.f32 %v2562_v63, %v2561_v57 }
 0x9a0   : > { %v2565_v48 = vadd.f32 %v2564_v28, %v2563_v23 }
 0x9a2   : > { %v2567_v46 = vadd.f32 %v2566_v6, %v2565_v48 }
 0x9a4   : > { %v2569_v13 = vadd.f32 %v2568_v37, %v2567_v46 }
 0x9a6   : > { %v2571_v34 = vadd.f32 %v2570_v16, %v2569_v13 }
 0x9a8   : > { %v2573_v51 = vadd.f32 %v2572_v35, %v2571_v34 }
 0x9aa   : > { %v2574_v36 = vrot.slane %v2573_v51, 4 }
 0x9ac   : > { %v2575_v11 = vadd.f32 %v2574_v36, %v2573_v51 }
 0x9ae   : > { %v2576_v47 = vrot.slane %v2575_v11, 2 }
 0x9b0   : > { %v2577_v60 = vadd.f32 %v2576_v47, %v2575_v11 }
 0x9b2   : > { %v2578_v26 = vrot.slane %v2577_v60, 1 }
 0x9b4   : > { %v2579_v14 = vadd.f32 %v2578_v26, %v2577_v60 }
 0x9b6   : > { %v2580_v0 = vadd.f32 1e-16, %v2579_v14 }
 0x9b8   : > { %3587 = vrcp.f32 %v2580_v0  ;;  %v2592_v15 = vand.u32 2147483648, %v2580_v0  ;;  %v2590_v52 = vand.u32 2147483647, %v2580_v0  ;;  %vm2586_vm12 = vweird.f32 %v2580_v0 }
 0x9ba   : > { %v2593_v32 = vor.u32 1.1754944e-38, %v2592_v15  ;;  %vm2591_vm14 = vcmp.eq.f32.partialorder %v2590_v52, 8.507059e+37 }
 0x9be   : > { %v3588_v10 = vpop.eup %3587 }
 0x9bf   : > { %v2582_v38 = vmul.f32 %v3588_v10, %v2580_v0  ;;  %vm2587_vm11 = vweird.f32 %v3588_v10 }
 0x9c0   : > { %vm2588_vm13 = vmor %vm2586_vm12, %vm2587_vm11 }
 0x9c1   : > { %v2583_v7 = vsub.f32 1.0, %v2582_v38 }
 0x9c3   : > { %v2584_v24 = vmul.f32 %v3588_v10, %v2583_v7 }
 0x9c5   : > { %v2585_v4 = vadd.f32 %v3588_v10, %v2584_v24 }
 0x9c7   : > { %v2589_v20 = vsel %vm2588_vm13, %v3588_v10, %v2585_v4 }
 0x9c8   : > { %v2594_v33 = vsel %vm2591_vm14, %v2593_v32, %v2589_v20 }
 0x9c9   : > { %v2595_v57 = vmul.f32 %v2594_v33, %v4307_v50  ;;  %v4973_v63 = vmul.f32 %v4893_v61, %v2594_v33  ;;  %v4976_v23 = vmul.f32 %v4895_v41, %v2594_v33  ;;  %v4979_v28 = vmul.f32 %v4901_v9, %v2594_v33 }
 0x9ca   : > { %v4982_v48 = vmul.f32 %v4905_v1, %v2594_v33  ;;  %v4985_v6 = vmul.f32 %v4911_v40, %v2594_v33  ;;  %v4988_v46 = vmul.f32 %v4917_v5, %v2594_v33  ;;  %v4991_v50 = vmul.f32 %v4923_v29, %v2594_v33 }
 0x9cb   : > { %v2596_v37 = vmul.f32 %v4893_v61, %v2595_v57  ;;  %v2597_v13 = vmul.f32 %v4895_v41, %v2595_v57  ;;  %v2598_v16 = vmul.f32 %v4901_v9, %v2595_v57  ;;  %v2599_v34 = vmul.f32 %v4905_v1, %v2595_v57 }
 0x9cc   : > { %v2600_v35 = vmul.f32 %v4911_v40, %v2595_v57  ;;  %v2601_v51 = vmul.f32 %v4917_v5, %v2595_v57  ;;  %v2602_v36 = vmul.f32 %v4923_v29, %v2595_v57  ;;  %v2603_v11 = vmul.f32 %v4929_v59, %v2595_v57 }
 0x9cd   : > { %v2612_v47 = vpack.c.bf16 %v2597_v13, %v2596_v37  ;;  %v2613_v60 = vpack.c.bf16 %v2599_v34, %v2598_v16  ;;  %v2604_v26 = vmul.f32 %v4935_v2, %v2595_v57  ;;  %v2605_v61 = vmul.f32 %v4941_v17, %v2595_v57 }
 0x9ce   : > { %v2614_v14 = vpack.c.bf16 %v2601_v51, %v2600_v35  ;;  %v2615_v41 = vpack.c.bf16 %v2603_v11, %v2602_v36  ;;  %v2606_v9 = vmul.f32 %v4945_v19, %v2595_v57  ;;  %v2607_v1 = vmul.f32 %v4949_v31, %v2595_v57 }
 0x9cf   : > { %2652 = vxpose.xlu0.c.b16.start [1/8] (narrow) %v2612_v47, 64  ;;  %v2616_v40 = vpack.c.bf16 %v2605_v61, %v2604_v26  ;;  %v2608_v5 = vmul.f32 %v4953_v3, %v2595_v57  ;;  %v2609_v29 = vmul.f32 %v4957_v44, %v2595_v57  ;;  %v2610_v0 = vmul.f32 %v4961_v21, %v2595_v57 }
 0x9d0   : > { %v2617_v10 = vpack.c.bf16 %v2607_v1, %v2606_v9  ;;  %v2611_v38 = vmul.f32 %v4965_v12, %v2595_v57  ;;  %v2636_v7 = vpack.c.bf16 %v4976_v23, %v4973_v63  ;;  %v2637_v15 = vpack.c.bf16 %v4982_v48, %v4979_v28 }
 0x9d1   : > { %v2618_v24 = vpack.c.bf16 %v2609_v29, %v2608_v5  ;;  %v2638_v52 = vpack.c.bf16 %v4988_v46, %v4985_v6  ;;  %v2627_v4 = vmul.f32 %v4929_v59, %v2594_v33  ;;  %v2628_v32 = vmul.f32 %v4935_v2, %v2594_v33 }
 0x9d2   : > { %v2619_v20 = vpack.c.bf16 %v2611_v38, %v2610_v0  ;;  %v2629_v37 = vmul.f32 %v4941_v17, %v2594_v33  ;;  %v2630_v13 = vmul.f32 %v4945_v19, %v2594_v33  ;;  %v2631_v57 = vmul.f32 %v4949_v31, %v2594_v33 }
 0x9d3   : > { %v2639_v63 = vpack.c.bf16 %v2627_v4, %v4991_v50  ;;  %v2632_v23 = vmul.f32 %v4953_v3, %v2594_v33  ;;  %v2633_v28 = vmul.f32 %v4957_v44, %v2594_v33  ;;  %v2634_v48 = vmul.f32 %v4961_v21, %v2594_v33 }
 0x9d4   : > { %v2640_v6 = vpack.c.bf16 %v2629_v37, %v2628_v32  ;;  %v2641_v46 = vpack.c.bf16 %v2631_v57, %v2630_v13  ;;  %v2635_v59 = vmul.f32 %v4965_v12, %v2594_v33 }
 0x9d5   : > { %v2642_v2 = vpack.c.bf16 %v2633_v28, %v2632_v23 }
 0x9d6   : > { %v2643_v16 = vpack.c.bf16 %v2635_v59, %v2634_v48 }
 0x9df   : > { %2653 = vxpose.xlu0.c.b16.cont [2/8] (narrow) %v2613_v60, 64 }
 0x9ef   : > { %2654 = vxpose.xlu0.c.b16.cont [3/8] (narrow) %v2614_v14, 64  ;;  %v5037_v14 = vld [vmem:[%s5179_s8 + $0x2] ss:$0 sm:$0xff] }
 0x9ff   : > { %2655 = vxpose.xlu0.c.b16.cont [4/8] (narrow) %v2615_v41, 64 }
 0xa0f   : > { %2656 = vxpose.xlu0.c.b16.cont [5/8] (narrow) %v2616_v40, 64 }
 0xa1f   : > { %2657 = vxpose.xlu0.c.b16.cont [6/8] (narrow) %v2617_v10, 64 }
 0xa2f   : > { %2658 = vxpose.xlu0.c.b16.cont [7/8] (narrow) %v2618_v24, 64 }
 0xa3f   : > { %2659 = vxpose.xlu0.c.b16.end [8/8] (narrow) %v2619_v20, 64 }
 0xa7b   : > { %v2660_v17 = vpop.trf.xlu0 }
 0xa7c   : > { %2676 = vmatmul.bf16.vlgmr.msra.gmra.mxu2 %v2660_v17 }
 0xa8b   : > { %v2661_v19 = vpop.trf.xlu0 }
 0xa8c   : > { %2681 = vmatmul.bf16.gmra.mxu2 %v2661_v19 }
 0xa9b   : > { %v2662_v31 = vpop.trf.xlu0 }
 0xa9c   : > { %2686 = vmatmul.bf16.gmra.mxu2 %v2662_v31 }
 0xaab   : > { %v2663_v3 = vpop.trf.xlu0 }
 0xaac   : > { %2691 = vmatmul.bf16.gmra.mxu2 %v2663_v3 }
 0xaff   : > { %v2677_v44 = vpop.f32.mrf.mxu2 }
 0xb07   : > { %v2679_v21 = vpop.f32.mrf.mxu2 }
 0xb08   : > { %v2697_v60 = vpack.c.bf16 %v2679_v21, %v2677_v44 }
 0xb0f   : > { %v2682_v12 = vpop.f32.mrf.mxu2 }
 0xb17   : > { %v2684_v33 = vpop.f32.mrf.mxu2 }
 0xb18   : > { %v2698_v47 = vpack.c.bf16 %v2684_v33, %v2682_v12 }
 0xb1f   : > { %v2687_v50 = vpop.f32.mrf.mxu2 }
 0xb27   : > { %v2689_v34 = vpop.f32.mrf.mxu2 }
 0xb28   : > { %v2699_v11 = vpack.c.bf16 %v2689_v34, %v2687_v50 }
 0xb2f   : > { %v2692_v35 = vpop.f32.mrf.mxu2 }
 0xb37   : > { %v2694_v51 = vpop.f32.mrf.mxu2 }
 0xb38   : > { %v2700_v36 = vpack.c.bf16 %v2694_v51, %v2692_v35 }
 0xb3a   : > { %2729 = vmatpush.bf16.msra.mxu3 %v2700_v36 }
 0xb3e   : > { %2730 = vmatpush.bf16.msra.mxu3 %v2699_v11 }
 0xb42   : > { %2731 = vmatpush.bf16.msra.mxu3 %v2698_v47 }
 0xb46   : > { %2732 = vmatpush.bf16.msra.mxu3 %v2697_v60 }
 0xb49   : > { %3304 = vmatmul.msk.bf16.vlgmr.msra.gmra.mxu3 %vm764_vm5, %v2636_v7 }
 0xb59   : > { %3305 = vmatmul.msk.bf16.gmra.mxu3 %vm764_vm5, %v2637_v15 }
 0xb69   : > { %3306 = vmatmul.msk.bf16.gmra.mxu3 %vm764_vm5, %v2638_v52 }
 0xb79   : > { %3307 = vmatmul.msk.bf16.gmra.mxu3 %vm764_vm5, %v2639_v63 }
 0xb89   : > { %3308 = vmatmul.msk.bf16.gmra.mxu3 %vm764_vm5, %v2640_v6 }
 0xb99   : > { %3309 = vmatmul.msk.bf16.gmra.mxu3 %vm764_vm5, %v2641_v46 }
 0xba9   : > { %3310 = vmatmul.msk.bf16.gmra.mxu3 %vm764_vm5, %v2642_v2 }
 0xbb9   : > { %3311 = vmatmul.msk.bf16.gmra.mxu3 %vm764_vm5, %v2643_v16 }
 0xbcc   : > { %v2734_v26 = vpop.f32.mrf.mxu3 }
 0xbcd   : > { %v2774_v61 = vmul.f32 %v2734_v26, %v4381_v53 }
 0xbcf   : > { %v5041_v1 = vadd.f32 %v5037_v14, %v2774_v61 }
 0xbd4   : > { %v2736_v41 = vpop.f32.mrf.mxu3 }
 0xbd5   : > { %v2775_v9 = vmul.f32 %v2736_v41, %v4389_v49 }
 0xbd7   : > { %v5044_v40 = vadd.f32 %v5037_v14, %v2775_v9 }
 0xbd9   : > { %v2817_v5 = vpack.c.bf16 %v5044_v40, %v5041_v1  ;;  %v3452_v40 = vld [vmem:[%s5181_s10] ss:$0 sm:$0xff] }
 0xbdc   : > { %v2739_v29 = vpop.f32.mrf.mxu3 }
 0xbdd   : > { %v2776_v53 = vmul.f32 %v2739_v29, %v4395_v18 }
 0xbdf   : > { %v5051_v38 = vadd.f32 %v5037_v14, %v2776_v53 }
 0xbe4   : > { %v2741_v0 = vpop.f32.mrf.mxu3 }
 0xbe5   : > { %v2777_v10 = vmul.f32 %v2741_v0, %v4398_v30 }
 0xbe7   : > { %v5054_v49 = vadd.f32 %v5037_v14, %v2777_v10 }
 0xbe9   : > { %v2818_v7 = vpack.c.bf16 %v5054_v49, %v5051_v38 }
 0xbec   : > { %v2744_v15 = vpop.f32.mrf.mxu3 }
 0xbed   : > { %v2778_v24 = vmul.f32 %v2744_v15, %v4404_v8 }
 0xbef   : > { %v2799_v18 = vadd.f32 %v5037_v14, %v2778_v24 }
 0xbf4   : > { %v2746_v52 = vpop.f32.mrf.mxu3 }
 0xbf5   : > { %v2779_v4 = vmul.f32 %v2746_v52, %v4407_v42  ;;  %v2944_v52 = vld [vmem:[%s5182_s11] sm:$0xff] }
 0xbf7   : > { %v2800_v32 = vadd.f32 %v5037_v14, %v2779_v4 }
 0xbf9   : > { %v2819_v30 = vpack.c.bf16 %v2800_v32, %v2799_v18  ;;  %v3668_v18 = vmov 0  }
 0xbfa   : > { %3445 = vset.pattern.permute.xlu1 %v3668_v18  ;;  %3447 = vset.pattern.permute.xlu0 %v3668_v18 }
 0xbfc   : > { %v2749_v20 = vpop.f32.mrf.mxu3 }
 0xbfd   : > { %v2780_v37 = vmul.f32 %v2749_v20, %v4413_v56 }
 0xbff   : > { %v2801_v63 = vadd.f32 %v5037_v14, %v2780_v37  ;;  %v2945_v37 = vld [vmem:[%s5182_s11 + $0x8] sm:$0xff] }
 0xc04   : > { %v2751_v13 = vpop.f32.mrf.mxu3 }
 0xc05   : > { %v2781_v57 = vmul.f32 %v2751_v13, %v4416_v45 }
 0xc07   : > { %v2802_v23 = vadd.f32 %v5037_v14, %v2781_v57 }
 0xc09   : > { %v2820_v8 = vpack.c.bf16 %v2802_v23, %v2801_v63 }
 0xc0c   : > { %v2754_v28 = vpop.f32.mrf.mxu3 }
 0xc14   : > { %v2756_v48 = vpop.f32.mrf.mxu3 }
 0xc15   : > { %v2783_v34 = vmul.f32 %v2756_v48, %v4425_v55  ;;  %v3358_v55 = vld [vmem:[%s5180_s9 + $0x8] sm:$0xff] }
 0xc17   : > { %v2804_v60 = vadd.f32 %v5037_v14, %v2783_v34 }
 0xc1c   : > { %v2759_v42 = vpop.f32.mrf.mxu3 }
 0xc24   : > { %v2761_v6 = vpop.f32.mrf.mxu3 }
 0xc25   : > { %v2785_v44 = vmul.f32 %v2761_v6, %v4434_v27 }
 0xc27   : > { %v2806_v35 = vadd.f32 %v5037_v14, %v2785_v44 }
 0xc2c   : > { %v2764_v46 = vpop.f32.mrf.mxu3 }
 0xc2d   : > { %v2786_v45 = vmul.f32 %v2764_v46, %v4440_v62  ;;  %v2856_v62 = vld [vmem:[%s5180_s9 + $0x10] sm:$0x3] }
 0xc2e   : > { %v2870_v50 = vunpack.c.l.b16 %v2856_v62 }
 0xc30   : > { %v2873_v36 = vpack.c.b16 %v2870_v50, %v2870_v50 }
 0xc32   : > { %v2880_v47 = vand.u32 %v2873_v36, %v3838_v22  ;;  %v3357_v22 = vld [vmem:[%s5180_s9] sm:$0xff] }
 0xc34   : > { %v2766_v59 = vpop.f32.mrf.mxu3  ;;  %2887 = vmatpush.bf16.msrb.mxu0 %v2880_v47 }
 0xc35   : > { %v2787_v56 = vmul.f32 %v2766_v59, %v4443_v54  ;;  %v2784_v54 = vmul.f32 %v2759_v42, %v4431_v58  ;;  %v2782_v58 = vmul.f32 %v2754_v28, %v4422_v39  ;;  %v3344_v39 = vld [vmem:[%s5078_s29] sm:$0xff] }
 0xc36   : > { %v2948_v59 = vld [vmem:[%s5182_s11 + $0x20] sm:$0xff] }
 0xc37   : > { %v2808_v21 = vadd.f32 %v5037_v14, %v2787_v56  ;;  %v2805_v11 = vadd.f32 %v5037_v14, %v2784_v54  ;;  %v2803_v61 = vadd.f32 %v5037_v14, %v2782_v58  ;;  %v2949_v56 = vld [vmem:[%s5182_s11 + $0x28] sm:$0xff] }
 0xc38   : > { %2888 = vmatpush.bf16.msrb.mxu0 %v3358_v55 }
 0xc39   : > { %v2822_v26 = vpack.c.bf16 %v2806_v35, %v2805_v11  ;;  %v2821_v41 = vpack.c.bf16 %v2804_v60, %v2803_v61 }
 0xc3c   : > { %v2769_v2 = vpop.f32.mrf.mxu3  ;;  %2889 = vmatpush.bf16.msrb.mxu0 %v3357_v22 }
 0xc3d   : > { %v2788_v16 = vmul.f32 %v2769_v2, %v4449_v25  ;;  %v562_v25 = vld [vmem:[%s5078_s29] sm:$0xff]   ;;  %s3615_s29 = sshra.s32 %s3046_s26, 4  ;;  %s3616_s29 = int_to_ptr.hbm [resolvable:$true] %s3615_s29 }
 0xc3e   : > { %v2812_v27 = vunpack.c.h.bf16 %v562_v25  ;;  %v2811_v33 = vunpack.c.l.bf16 %v562_v25  ;;  %s3617_s22 = scalar_lea.hbm %s3616_s29, 1  ;;  %p3622_p0 = scmp.lt.s32.totalorder %s3616_s29, %s5184_s13 }
 0xc3f   : > { %v2809_v31 = vadd.f32 %v5037_v14, %v2788_v16  ;;  %p3618_p11 = scmp.ne.s32.totalorder %s3616_s29, %s3617_s22  ;;  %p3623_p1 = scmp.lt.s32.totalorder %s3621_s17, %s3617_s22 }
 0xc40   : > { %2815 = vadd.xlane.f32.xlu1 %v2812_v27  ;;  %2813 = vadd.xlane.f32.xlu2 %v2811_v33 }
 0xc41   : > { %p3619_p12 = pnand %p3618_p11, %p3781_p5  ;;  %p3624_p2 = por %p3623_p1, %p3622_p0 }
 0xc43   : > { %p3620_p13 = pneg %p3619_p12 }
 0xc44   : > { %v2771_v17 = vpop.f32.mrf.mxu3 }
 0xc45   : > { %v2789_v19 = vmul.f32 %v2771_v17, %v4452_v43  ;;  %v2807_v43 = vadd.f32 %v5037_v14, %v2786_v45  ;;  %v2951_v45 = vld [vmem:[%s5182_s11 + $0x38] sm:$0xff]  ;;  %p3625_p3 = pnand %p3624_p2, %p3620_p13 }
 0xc47   : > { %v2810_v3 = vadd.f32 %v5037_v14, %v2789_v19  ;;  %v2823_v51 = vpack.c.bf16 %v2808_v21, %v2807_v43  ;;  %v2950_v19 = vld [vmem:[%s5182_s11 + $0x30] sm:$0xff] }
 0xc49   : > { %v2824_v12 = vpack.c.bf16 %v2810_v3, %v2809_v31  ;;  %v3022_v31 = vld [vmem:[#allocation2] sm:$0x1]  ;;  %v2947_v3 = vld [vmem:[%s5182_s11 + $0x18] sm:$0xff] }
 0xc4b   : > { %2831 = vmatpush.bf16.msra.mxu2 %v2824_v12 }
 0xc4f   : > { %2832 = vmatpush.bf16.msra.mxu2 %v2823_v51 }
 0xc53   : > { %2833 = vmatpush.bf16.msra.mxu2 %v2822_v26 }
 0xc57   : > { %2834 = vmatpush.bf16.msra.mxu2 %v2821_v41 }
 0xc59   : > { %2954 = vperm.xlu1 %3445, %v2944_v52  }
 0xc5b   : > { %2835 = vmatpush.bf16.msra.mxu2 %v2820_v8  ;;  %v2946_v8 = vld [vmem:[%s5182_s11 + $0x10] sm:$0xff] }
 0xc5f   : > { %2836 = vmatpush.bf16.msra.mxu2 %v2819_v30 }
 0xc61   : > { %2959 = vperm.xlu1 %3445, %v2945_v37  }
 0xc63   : > { %2837 = vmatpush.bf16.msra.mxu2 %v2818_v7 }
 0xc67   : > { %2838 = vmatpush.bf16.msra.mxu2 %v2817_v5 }
 0xc69   : > { %2964 = vperm.xlu1 %3445, %v2946_v8  }
 0xc6a   : > { %2839 = vmatmul.bf16.vlgmr.msra.gmra.mxu2 %v3344_v39 }
 0xc71   : > { %2974 = vperm.xlu1 %3445, %v2948_v59  }
 0xc79   : > { %2979 = vperm.xlu1 %3445, %v2949_v56  }
 0xc81   : > { %2984 = vperm.xlu1 %3445, %v2950_v19  }
 0xc89   : > { %2989 = vperm.xlu1 %3445, %v2951_v45  }
 0xc91   : > { %3025 = vperm.xlu1 %3445, %v3022_v31  }
 0xcb3   : > { %v2816_v9 = vpop.xlane.xlu1 %2815  ;;  %v2814_v14 = vpop.xlane.xlu2 %2813 }
 0xcb4   : > { %v2846_v29 = vmax.f32 %v2816_v9, 1.0  ;;  %v2845_v53 = vmax.f32 %v2814_v14, 1.0 }
 0xcb6   : > { %3589 = vrcp.f32 %v2846_v29 }
 0xcb7   : > { %3591 = vrcp.f32 %v2845_v53 }
 0xcbc   : > { %v3590_v10 = vpop.eup %3589 }
 0xcbd   : > { %v3592_v38 = vpop.eup %3591 }
 0xccb   : > { %v2955_v54 = vpop.permute.xlu1 %2954 }
 0xcd3   : > { %v2960_v62 = vpop.permute.xlu1 %2959 }
 0xcdb   : > { %v2965_v27 = vpop.permute.xlu1 %2964 }
 0xce3   : > { %v2975_v50 = vpop.permute.xlu1 %2974 }
 0xceb   : > { %v2980_v35 = vpop.permute.xlu1 %2979 }
 0xced   : > { %v2840_v0 = vpop.f32.mrf.mxu2 }
 0xcee   : > { %v2849_v7 = vmul.f32 %v3592_v38, %v2840_v0 }
 0xcf3   : > { %v2985_v26 = vpop.permute.xlu1 %2984 }
 0xcf5   : > { %v2842_v49 = vpop.f32.mrf.mxu2 }
 0xcf6   : > { %v2850_v15 = vmul.f32 %v3590_v10, %v2842_v49 }
 0xcf8   : > { %v2851_v1 = vpack.c.bf16 %v2850_v15, %v2849_v7 }
 0xcfa   : > { %3325 = vmatmul.msk.bf16.vlgmr.msrb.gmra.mxu0 %vm923_vm4, %v2851_v1 }
 0xcfb   : > { %v2990_v49 = vpop.permute.xlu1 %2989 }
 0xd77   : > { %v2891_v5 = vpop.f32.mrf.mxu0 }
 0xd78   : > { %v2892_v24 = vadd.f32 %v3452_v40, %v2891_v5 }
 0xd7a   : > { %v2898_v4 = vmin.f32 %v2892_v24, 20.0  ;;  %vm2896_vm4 = vcmp.gt.f32.partialorder %v2892_v24, 20.0 }
 0xd7c   : > { %v2900_v32 = vmul.f32 1.442695, %v2898_v4 }
 0xd7e   : > { %3593 = vpow2.f32 %v2900_v32 }
 0xd7f   : > { %v2893_v30 = vpop.f32.mrf.mxu0 }
 0xd80   : > { %v2894_v20 = vadd.f32 %v3452_v40, %v2893_v30 }
 0xd82   : > { %v2899_v13 = vmin.f32 %v2894_v20, 20.0  ;;  %vm2897_vm5 = vcmp.gt.f32.partialorder %v2894_v20, 20.0 }
 0xd84   : > { %v3594_v57 = vpop.eup %3593  ;;  %v2902_v63 = vmul.f32 1.442695, %v2899_v13 }
 0xd85   : > { %v2904_v23 = vadd.f32 1.0, %v3594_v57 }
 0xd86   : > { %3595 = vpow2.f32 %v2902_v63 }
 0xd87   : > { %3597 = vlog2.f32 %v2904_v23 }
 0xd8c   : > { %v3596_v28 = vpop.eup %3595 }
 0xd8d   : > { %v3598_v48 = vpop.eup %3597  ;;  %v2905_v42 = vadd.f32 1.0, %v3596_v28 }
 0xd8e   : > { %v2907_v6 = vmul.f32 0.6931472, %v3598_v48 }
 0xd8f   : > { %3599 = vlog2.f32 %v2905_v42 }
 0xd90   : > { %v2910_v46 = vsel %vm2896_vm4, %v2892_v24, %v2907_v6 }
 0xd91   : > { %2912 = vxpose.xlu2.b32.start [1/2] (short) (narrow) %v2910_v46, 64 }
 0xd95   : > { %v3600_v2 = vpop.eup %3599 }
 0xd96   : > { %v2909_v16 = vmul.f32 0.6931472, %v3600_v2 }
 0xd98   : > { %v2911_v17 = vsel %vm2897_vm5, %v2894_v20, %v2909_v16  ;;  %v3026_v20 = vpop.permute.xlu1 %3025 }
 0xd99   : > { %2913 = vxpose.xlu2.b32.end [2/2] (short) (narrow) %v2911_v17, 64  ;;  %v3028_v57 = vperm.slane %v3026_v20, 0 }
 0xdfb   : > { %3446 = vset.pattern.permute.xlu2 %v3668_v18 }
 0xe2a   : > { %v2928_v44 = vpop.trf.xlu2 }
 0xe2b   : > { %v2992_v51 = vmul.f32 %v2955_v54, %v2928_v44 }
 0xe2d   : > { %v3001_v11 = vsel %vm3000_vm15, %v2992_v51, 0.0 }
 0xe32   : > { %2969 = vperm.xlu2 %3446, %v2947_v3   ;;  %v2929_v21 = vpop.trf.xlu2 }
 0xe33   : > { %v2993_v36 = vmul.f32 %v2960_v62, %v2929_v21 }
 0xe35   : > { %v3002_v47 = vsel %vm3000_vm15, %v2993_v36, 0.0 }
 0xe36   : > { %v3003_v55 = vadd.f32 %v3002_v47, %v3001_v11 }
 0xe3a   : > { %v2930_v12 = vpop.trf.xlu2 }
 0xe3b   : > { %v2994_v60 = vmul.f32 %v2965_v27, %v2930_v12 }
 0xe3d   : > { %v3004_v61 = vsel %vm3000_vm15, %v2994_v60, 0.0 }
 0xe3e   : > { %v3005_v9 = vadd.f32 %v3004_v61, %v3003_v55 }
 0xe42   : > { %v2931_v25 = vpop.trf.xlu2 }
 0xe4a   : > { %v2932_v43 = vpop.trf.xlu2 }
 0xe4b   : > { %v2996_v39 = vmul.f32 %v2975_v50, %v2932_v43 }
 0xe4d   : > { %v3008_v0 = vsel %vm3000_vm15, %v2996_v39, 0.0 }
 0xe52   : > { %v2933_v33 = vpop.trf.xlu2 }
 0xe53   : > { %v2997_v14 = vmul.f32 %v2980_v35, %v2933_v33 }
 0xe55   : > { %v3010_v7 = vsel %vm3000_vm15, %v2997_v14, 0.0 }
 0xe5a   : > { %v2934_v34 = vpop.trf.xlu2 }
 0xe5b   : > { %v2998_v10 = vmul.f32 %v2985_v26, %v2934_v34 }
 0xe5d   : > { %v3012_v40 = vsel %vm3000_vm15, %v2998_v10, 0.0 }
 0xe62   : > { %v2935_v58 = vpop.trf.xlu2 }
 0xe63   : > { %v2999_v15 = vmul.f32 %v2990_v49, %v2935_v58 }
 0xe65   : > { %v3014_v24 = vsel %vm3000_vm15, %v2999_v15, 0.0 }
 0xe8c   : > { %v2970_v41 = vpop.permute.xlu2 %2969 }
 0xe8d   : > { %v2995_v22 = vmul.f32 %v2970_v41, %v2931_v25 }
 0xe8f   : > { %v3006_v29 = vsel %vm3000_vm15, %v2995_v22, 0.0 }
 0xe90   : > { %v3007_v53 = vadd.f32 %v3006_v29, %v3005_v9 }
 0xe92   : > { %v3009_v38 = vadd.f32 %v3008_v0, %v3007_v53 }
 0xe94   : > { %v3011_v1 = vadd.f32 %v3010_v7, %v3009_v38 }
 0xe96   : > { %v3013_v5 = vadd.f32 %v3012_v40, %v3011_v1 }
 0xe98   : > { %v3015_v52 = vadd.f32 %v3014_v24, %v3013_v5 }
 0xe9a   : > { %v3016_v4 = vrot.slane %v3015_v52, 4 }
 0xe9c   : > { %v3017_v18 = vadd.f32 %v3016_v4, %v3015_v52 }
 0xe9e   : > { %v3018_v32 = vrot.slane %v3017_v18, 2 }
 0xea0   : > { %v3019_v30 = vadd.f32 %v3018_v32, %v3017_v18 }
 0xea2   : > { %v3020_v37 = vrot.slane %v3019_v30, 1 }
 0xea4   : > { %v3021_v13 = vadd.f32 %v3020_v37, %v3019_v30 }
 0xea6   : > { %v3029_v63 = vadd.f32 %v3028_v57, %v3021_v13 }
 0xea8   : > { %3031 = vst.msk [vmem:[%s479_s24] sm:$0x1] %vm3030_vm0, %v3029_v63 }
 0xea9   : > { %3628 = shalt.err (!%p3625_p3)
}
 0xeaa   : > { %3398 = dma.vmem_to_hbm [thread:$0]  (%p3781_p5), %s3044_s25, 16, %s3046_s26, %s3033_s14  }
 0xeab PF: > { %p3404_p4 = scmp.ge.s32.totalorder %s3663_s30, 2  ;;  %s3057_s18 = sand.u32 1, %s3651_s27  }
 0xeac   : > { %s3058_s24 = scalar_lea.sflag [#allocation4], %s3057_s18 }
 0xead   : > { %p3401_p7 = pnand %p3404_p4, %p3785_p6 }
 0xeaf   : > { %p3402_p8 = pneg %p3401_p7 }
 0xeb1   : > { %3646 = dma.done.wait (%p3402_p8), %s3058_s24, 16  }
 0xeb2   : > { %3648 = vsyncadd (%p3402_p8), %s3058_s24, 4294967280  ;;  %s5232_s29 = sld [smem:[#allocation6_spill]]  ;;  %p25_p9 = scmp.ge.s32.totalorder %s3768_s15, 4  }
 0xeb3   : > { %s5233_s22 = sld [smem:[#allocation7_spill]]  ;;  %s5234_s27 = smov %s3655_s28 }
 0xeb4   : > { %s5237_s30 = smov %s3768_s15 }
 0xeb5   :  { %27 = sbr.rel (!%p25_p9) target bundleno = 6 (0x6), region = 120 }
 0xeb8   : > { %s5235_s28 = smov %s5232_s29 }
 0xeb9   : > { %s5236_s29 = smov %s5233_s22 }
 0xeba   :  { %3063 = vsyncpa [#allocation4], 1 }
 0xebb   :  { %3065 = vsyncpa [#allocation4 + $0x1], 1 }

</bundles_post_ra>
